<compile_context>
chip_gen: v5e
topology: v5e:2x2
jax: 0.10.0
libtpu: 0.0.40
codegen_flags: <defaults>
</compile_context>

<pallas_src>
import functools
import math

import jax
import jax.numpy as jnp
from jax.experimental import pallas as pl
from jax.experimental.pallas import tpu as pltpu


# --------------------------------------------------------------------------
# Compiler-parameter helpers
# --------------------------------------------------------------------------
@functools.lru_cache(maxsize=None)
def _vmem_limit_bytes():
    # Raise the scoped-VMEM cap (defaults: 16 MiB v5e / 32 MiB v6e,v7x) so the
    # resident bf16 weight set of a block fits at real ViT sizes.
    try:
        info = pltpu.get_tpu_info()
        cap = int(getattr(info, "vmem_capacity_bytes", 0) or 0)
        if cap > 0:
            return (cap * 3) // 4
    except Exception:
        pass
    return 48 * 1024 * 1024


def _cparams(*sem):
    return pltpu.CompilerParams(dimension_semantics=sem,
                                vmem_limit_bytes=_vmem_limit_bytes())


@functools.lru_cache(maxsize=None)
def _buffered_weights_ok():
    """Probe whether pipeline_mode=pl.Buffered(1) works on this JAX/TPU."""
    try:
        def k(x_ref, o_ref):
            o_ref[...] = x_ref[...]
        y = pl.pallas_call(
            k,
            out_shape=jax.ShapeDtypeStruct((8, 128), jnp.float32),
            grid=(1,),
            in_specs=[pl.BlockSpec((8, 128), lambda i: (0, 0),
                                   pipeline_mode=pl.Buffered(1))],
            out_specs=pl.BlockSpec((8, 128), lambda i: (0, 0)),
        )(jnp.zeros((8, 128), jnp.float32))
        jax.block_until_ready(y)
        return True
    except Exception:
        return False


def _const_spec(shape):
    """BlockSpec for a grid-invariant (weight/bias) operand: single-buffered."""
    nd = len(shape)
    im = lambda *args: (0,) * nd
    if _buffered_weights_ok():
        return pl.BlockSpec(shape, im, pipeline_mode=pl.Buffered(1))
    return pl.BlockSpec(shape, im)


def _pad_rows(x, target_rows):
    if x.shape[0] == target_rows:
        return x
    return jnp.pad(x, ((0, target_rows - x.shape[0]), (0, 0)))


# --------------------------------------------------------------------------
# Kernel 0: plain linear (patch embed)
# --------------------------------------------------------------------------
def _linear_kernel(x_ref, w_ref, b_ref, o_ref):
    x = x_ref[...].astype(jnp.bfloat16)              # bf16 MXU operands
    y = jnp.dot(x, w_ref[...], preferred_element_type=jnp.float32)
    o_ref[...] = y + b_ref[...]


def pallas_linear(x, w_bf16, b, block_m=256):
    """y = x @ w + b.  x:(M,K) f32, w:(K,N) bf16, b:(1,N) f32.  M-tiled."""
    M, K = x.shape
    N = w_bf16.shape[1]
    tm = M if M <= block_m else block_m
    Mp = pl.cdiv(M, tm) * tm
    xp = _pad_rows(x, Mp)
    y = pl.pallas_call(
        _linear_kernel,
        out_shape=jax.ShapeDtypeStruct((Mp, N), jnp.float32),
        grid=(Mp // tm,),
        in_specs=[pl.BlockSpec((tm, K), lambda i: (i, 0)),
                  _const_spec((K, N)),
                  _const_spec((1, N))],
        out_specs=pl.BlockSpec((tm, N), lambda i: (i, 0)),
        compiler_params=_cparams("parallel"),
    )(xp, w_bf16, b)
    return y if Mp == M else y[:M]


# --------------------------------------------------------------------------
# Kernel 1: LayerNorm1 + fused QKV projection (on a (B*N, D) view)
# --------------------------------------------------------------------------
def _ln_qkv_kernel(x_ref, g_ref, b_ref, w_ref, qb_ref,
                   q_ref, k_ref, v_ref, *, d, scale):
    x = x_ref[...]
    mu = jnp.mean(x, axis=-1, keepdims=True)
    var = jnp.mean(jnp.square(x - mu), axis=-1, keepdims=True)
    h = (x - mu) * jax.lax.rsqrt(var + 1e-5) * g_ref[...] + b_ref[...]
    qkv = jnp.dot(h.astype(jnp.bfloat16), w_ref[...],
                  preferred_element_type=jnp.float32) + qb_ref[...]
    # Fold 1/sqrt(Dh) into Q once (cheaper than scaling the (Nq,Nk) scores).
    q_ref[...] = (qkv[:, :d] * scale).astype(jnp.bfloat16)
    k_ref[...] = qkv[:, d:2 * d].astype(jnp.bfloat16)
    v_ref[...] = qkv[:, 2 * d:].astype(jnp.bfloat16)


def pallas_ln_qkv(x_flat, ln_g, ln_b, qkv_w_bf16, qkv_b, num_heads, block_m=256):
    M, D = x_flat.shape
    scale = (D // num_heads) ** -0.5
    tm = M if M <= block_m else block_m
    Mp = pl.cdiv(M, tm) * tm
    xp = _pad_rows(x_flat, Mp)
    kern = functools.partial(_ln_qkv_kernel, d=D, scale=scale)
    q, k, v = pl.pallas_call(
        kern,
        out_shape=tuple(jax.ShapeDtypeStruct((Mp, D), jnp.bfloat16)
                        for _ in range(3)),
        grid=(Mp // tm,),
        in_specs=[pl.BlockSpec((tm, D), lambda i: (i, 0)),
                  _const_spec((1, D)), _const_spec((1, D)),
                  _const_spec((D, 3 * D)), _const_spec((1, 3 * D))],
        out_specs=tuple(pl.BlockSpec((tm, D), lambda i: (i, 0))
                        for _ in range(3)),
        compiler_params=_cparams("parallel"),
    )(xp, ln_g, ln_b, qkv_w_bf16, qkv_b)
    if Mp != M:
        q, k, v = q[:M], k[:M], v[:M]
    return q, k, v


# --------------------------------------------------------------------------
# Kernel 2: attention core (per batch element)
# --------------------------------------------------------------------------
def _attn_kernel(q_ref, k_ref, v_ref, ctx_ref, cls_ref, *, num_heads):
    q = q_ref[0]            # (Nq, D) bf16 (already scaled)
    k = k_ref[0]            # (Nk, D) bf16
    v = v_ref[0]            # (Nk, D) bf16
    d = q.shape[-1]
    dh = d // num_heads
    cls_acc = None
    for h in range(num_heads):                       # static unroll over heads
        sl = slice(h * dh, (h + 1) * dh)
        s = jax.lax.dot_general(q[:, sl], k[:, sl], (((1,), (1,)), ((), ())),
                                preferred_element_type=jnp.float32)
        m = jnp.max(s, axis=-1, keepdims=True)
        e = jnp.exp(s - m)
        p = e * pl.reciprocal(jnp.sum(e, axis=-1, keepdims=True), approx=True)
        # Write this head's context straight into the output ref slice
        # (no per-head list + concat -> no relayout, bounded live ranges).
        ctx_ref[0, :, sl] = jnp.dot(p.astype(jnp.bfloat16), v[:, sl],
                                    preferred_element_type=jnp.float32)
        row = p[0:1, :]                              # CLS-query attention row
        cls_acc = row if cls_acc is None else cls_acc + row
    cls_ref[0] = cls_acc * (1.0 / num_heads)


def pallas_attention(q, k, v, num_heads):
    B, Nq, D = q.shape
    Nk = k.shape[1]
    kern = functools.partial(_attn_kernel, num_heads=num_heads)
    ctx, cls = pl.pallas_call(
        kern,
        out_shape=(jax.ShapeDtypeStruct((B, Nq, D), jnp.float32),
                   jax.ShapeDtypeStruct((B, 1, Nk), jnp.float32)),
        grid=(B,),
        in_specs=[pl.BlockSpec((1, Nq, D), lambda i: (i, 0, 0)),
                  pl.BlockSpec((1, Nk, D), lambda i: (i, 0, 0)),
                  pl.BlockSpec((1, Nk, D), lambda i: (i, 0, 0))],
        out_specs=(pl.BlockSpec((1, Nq, D), lambda i: (i, 0, 0)),
                   pl.BlockSpec((1, 1, Nk), lambda i: (i, 0, 0))),
        compiler_params=_cparams("parallel"),
    )(q, k, v)
    return ctx, cls[:, 0, :]


def _attn_pair_kernel(q_ref, k1_ref, v1_ref, k2_ref, v2_ref, ctx_ref,
                      *, num_heads):
    """PWCA core: softmax over the union of two K/V sets (x and x_pair),
    without ever materializing kv = concat(x, x_pair) in HBM."""
    q = q_ref[0]
    k1, v1 = k1_ref[0], v1_ref[0]
    k2, v2 = k2_ref[0], v2_ref[0]
    d = q.shape[-1]
    dh = d // num_heads
    for h in range(num_heads):
        sl = slice(h * dh, (h + 1) * dh)
        qh = q[:, sl]
        s1 = jax.lax.dot_general(qh, k1[:, sl], (((1,), (1,)), ((), ())),
                                 preferred_element_type=jnp.float32)
        s2 = jax.lax.dot_general(qh, k2[:, sl], (((1,), (1,)), ((), ())),
                                 preferred_element_type=jnp.float32)
        m = jnp.maximum(jnp.max(s1, axis=-1, keepdims=True),
                        jnp.max(s2, axis=-1, keepdims=True))
        e1 = jnp.exp(s1 - m)
        e2 = jnp.exp(s2 - m)
        inv = pl.reciprocal(jnp.sum(e1, axis=-1, keepdims=True)
                            + jnp.sum(e2, axis=-1, keepdims=True), approx=True)
        ctx = (jnp.dot((e1 * inv).astype(jnp.bfloat16), v1[:, sl],
                       preferred_element_type=jnp.float32)
               + jnp.dot((e2 * inv).astype(jnp.bfloat16), v2[:, sl],
                         preferred_element_type=jnp.float32))
        ctx_ref[0, :, sl] = ctx


def pallas_attention_pair(q, k1, v1, k2, v2, num_heads):
    B, Nq, D = q.shape
    Nk1, Nk2 = k1.shape[1], k2.shape[1]
    kern = functools.partial(_attn_pair_kernel, num_heads=num_heads)
    return pl.pallas_call(
        kern,
        out_shape=jax.ShapeDtypeStruct((B, Nq, D), jnp.float32),
        grid=(B,),
        in_specs=[pl.BlockSpec((1, Nq, D), lambda i: (i, 0, 0)),
                  pl.BlockSpec((1, Nk1, D), lambda i: (i, 0, 0)),
                  pl.BlockSpec((1, Nk1, D), lambda i: (i, 0, 0)),
                  pl.BlockSpec((1, Nk2, D), lambda i: (i, 0, 0)),
                  pl.BlockSpec((1, Nk2, D), lambda i: (i, 0, 0))],
        out_specs=pl.BlockSpec((1, Nq, D), lambda i: (i, 0, 0)),
        compiler_params=_cparams("parallel"),
    )(q, k1, v1, k2, v2)


# --------------------------------------------------------------------------
# Kernel 3: output proj + residual + LN2 + MLP + residual (on (B*N, D) view)
# --------------------------------------------------------------------------
def _post_kernel(ctx_ref, x_ref, pw_ref, pb_ref, g2_ref, b2_ref,
                 w1_ref, b1_ref, w2_ref, b2m_ref, o_ref):
    ctx = ctx_ref[...].astype(jnp.bfloat16)
    attn_out = jnp.dot(ctx, pw_ref[...],
                       preferred_element_type=jnp.float32) + pb_ref[...]
    x1 = x_ref[...] + attn_out
    mu = jnp.mean(x1, axis=-1, keepdims=True)
    var = jnp.mean(jnp.square(x1 - mu), axis=-1, keepdims=True)
    h = (x1 - mu) * jax.lax.rsqrt(var + 1e-5) * g2_ref[...] + b2_ref[...]
    mid = jnp.dot(h.astype(jnp.bfloat16), w1_ref[...],
                  preferred_element_type=jnp.float32) + b1_ref[...]
    # TODO(synk): PyTorch nn.GELU default is the exact erf form; tanh approx
    # used here (EUP-friendly, guaranteed Mosaic lowering).
    mid = jax.nn.gelu(mid, approximate=True)
    mlp = jnp.dot(mid.astype(jnp.bfloat16), w2_ref[...],
                  preferred_element_type=jnp.float32) + b2m_ref[...]
    o_ref[...] = x1 + mlp


def pallas_post(ctx_flat, x_flat, bp, prefix, block_m=256):
    M, D = x_flat.shape
    MLP = bp[prefix + "fc1_w"].shape[1]
    tm = M if M <= block_m else block_m
    Mp = pl.cdiv(M, tm) * tm
    ctx_p = _pad_rows(ctx_flat, Mp)
    x_p = _pad_rows(x_flat, Mp)
    y = pl.pallas_call(
        _post_kernel,
        out_shape=jax.ShapeDtypeStruct((Mp, D), jnp.float32),
        grid=(Mp // tm,),
        in_specs=[pl.BlockSpec((tm, D), lambda i: (i, 0)),
                  pl.BlockSpec((tm, D), lambda i: (i, 0)),
                  _const_spec((D, D)), _const_spec((1, D)),
                  _const_spec((1, D)), _const_spec((1, D)),
                  _const_spec((D, MLP)), _const_spec((1, MLP)),
                  _const_spec((MLP, D)), _const_spec((1, D))],
        out_specs=pl.BlockSpec((tm, D), lambda i: (i, 0)),
        compiler_params=_cparams("parallel"),
    )(ctx_p, x_p,
      bp[prefix + "proj_w"], bp[prefix + "proj_b"],
      bp[prefix + "ln2_g"], bp[prefix + "ln2_b"],
      bp[prefix + "fc1_w"], bp[prefix + "fc1_b"],
      bp[prefix + "fc2_w"], bp[prefix + "fc2_b"])
    return y if Mp == M else y[:M]


# --------------------------------------------------------------------------
# Model (JAX glue around the Pallas kernels)
# --------------------------------------------------------------------------
def backbone(img, params, patch):
    # TODO(synk): `create_vit_model` is undefined in the provided source; a
    # ViT tokenizer (patch-embed + CLS + positional embedding) stands in.
    # TODO(synk): the NCHW patchify transpose could be folded into the
    # patch-embed kernel's BlockSpec (or NHWC input) to skip one HBM rewrite.
    B, C, H, W = img.shape
    gh, gw = H // patch, W // patch
    x = img.reshape(B, C, gh, patch, gw, patch)
    x = x.transpose(0, 2, 4, 1, 3, 5).reshape(B * gh * gw, C * patch * patch)
    x = pallas_linear(x, params["patch_w"], params["patch_b"])
    x = x.reshape(B, gh * gw, -1)
    cls = jnp.broadcast_to(params["cls_token"], (B, 1, x.shape[2]))
    x = jnp.concatenate([cls, x], axis=1)
    return x + params["pos_embed"]


def encoder_forward(x_img, x_pair_img, params, cfg):
    num_heads = cfg["num_heads"]
    x = backbone(x_img, params, cfg["patch"])
    x_pair = (backbone(x_pair_img, params, cfg["patch"])
              if x_pair_img is not None else None)
    B, N, D = x.shape

    sa_final = glca_final = pwca_final = None
    for i, bp in enumerate(params["blocks"]):
        use_glca = i < cfg["num_glca_blocks"]
        use_pwca = (i < cfg["num_pwca_blocks"]) and (x_pair is not None)

        # ---- self-attention branch ----
        x_flat = x.reshape(B * N, D)
        q, k, v = pallas_ln_qkv(x_flat, bp["ln1_g"], bp["ln1_b"],
                                bp["qkv_w"], bp["qkv_b"], num_heads)
        qb = q.reshape(B, N, D)
        kb = k.reshape(B, N, D)
        vb = v.reshape(B, N, D)
        ctx, cls_attn = pallas_attention(qb, kb, vb, num_heads)
        x_sa = pallas_post(ctx.reshape(B * N, D), x_flat, bp, "").reshape(B, N, D)

        # ---- global-local cross-attention branch ----
        if use_glca:
            # TODO(synk): DCALTransformerBlock is undefined upstream; local
            # queries use this block's mean CLS attention (no cross-layer
            # rollout since attention_history is None when return_attention=False).
            patch_scores = cls_attn[:, 1:]                        # (B, N-1)
            k_local = max(1, int(math.ceil(cfg["local_ratio"] * (N - 1))))
            _, top_idx = jax.lax.top_k(patch_scores, k_local)
            local_idx = jnp.concatenate(
                [jnp.zeros((B, 1), jnp.int32), top_idx.astype(jnp.int32) + 1],
                axis=1)                                           # CLS first
            # TODO(synk): this gather could be pushed in-kernel via scalar
            # prefetch (PrefetchScalarGridSpec + pl.Element row mapping) to
            # avoid one HBM round trip; kept as a JAX gather here.
            x_local = jnp.take_along_axis(x, local_idx[:, :, None], axis=1)
            Nl = x_local.shape[1]
            xl_flat = x_local.reshape(B * Nl, D)
            ql, _, _ = pallas_ln_qkv(xl_flat, bp["glca_ln1_g"], bp["glca_ln1_b"],
                                     bp["glca_qkv_w"], bp["glca_qkv_b"], num_heads)
            _, kg, vg = pallas_ln_qkv(x_flat, bp["glca_ln1_g"], bp["glca_ln1_b"],
                                      bp["glca_qkv_w"], bp["glca_qkv_b"], num_heads)
            ctx_g, _ = pallas_attention(ql.reshape(B, Nl, D),
                                        kg.reshape(B, N, D),
                                        vg.reshape(B, N, D), num_heads)
            glca_final = pallas_post(ctx_g.reshape(B * Nl, D), xl_flat,
                                     bp, "glca_").reshape(B, Nl, D)

        # ---- pair-wise cross-attention branch (weights shared with SA) ----
        if use_pwca:
            xp_flat = x_pair.reshape(B * N, D)
            _, kp, vp = pallas_ln_qkv(xp_flat, bp["ln1_b"] * 0 + bp["ln1_g"] * 0 + bp["ln1_g"] if False else xp_flat[:0],  # placeholder never used
                                      bp["ln1_b"], bp["qkv_w"], bp["qkv_b"], num_heads) if False else \
                pallas_ln_qkv(xp_flat, bp["ln1_g"], bp["ln1_b"],
                              bp["qkv_w"], bp["qkv_b"], num_heads)
            ctx_p = pallas_attention_pair(qb, kb, vb,
                                          kp.reshape(B, N, D),
                                          vp.reshape(B, N, D), num_heads)
            pwca_final = pallas_post(ctx_p.reshape(B * N, D), x_flat,
                                     bp, "").reshape(B, N, D)

        x = x_sa
        sa_final = x

    results = {"sa_final": sa_final, "glca_final": glca_final,
               "pwca_final": pwca_final}
    # Tiny (D / 2*D / num_classes wide) classifier GEMMs: plain XLA dots —
    # a pallas_call here is all launch overhead + lane-sparse masked stores.
    results["sa_logits"] = sa_final[:, 0] @ params["sa_cls_w"] + params["sa_cls_b"]
    if glca_final is not None:
        results["glca_logits"] = (glca_final[:, 0] @ params["glca_cls_w"]
                                  + params["glca_cls_b"])
    if pwca_final is not None:
        results["pwca_logits"] = (pwca_final[:, 0] @ params["pwca_cls_w"]
                                  + params["pwca_cls_b"])
    return results


def dcal_model_forward(x, x_pair, params, cfg):
    """Equivalent of DCALModel.forward(x, x_pair, return_attention=False)."""
    enc = encoder_forward(x, x_pair, params, cfg)

    # encoder.get_features(x) re-runs the encoder with x_pair=None in the
    # reference, but the SA / GLCA branches are independent of x_pair (PWCA
    # output never feeds back into x), so reuse this pass's logits instead of
    # a redundant second encoder pass.
    sa_logits = enc["sa_logits"]
    glca_logits = enc.get("glca_logits", None)
    if glca_logits is not None:
        features = jnp.concatenate([sa_logits, glca_logits], axis=1)
    else:
        features = jnp.concatenate([sa_logits, sa_logits], axis=1)

    logits = features @ params["cls_w"] + params["cls_b"]
    return {"logits": logits, "features": features, **enc}


# --------------------------------------------------------------------------
# Deterministic parameter initialization (matmul weights stored as bf16)
# --------------------------------------------------------------------------
def init_params(key, cfg):
    D = cfg["embed_dim"]
    MLP = int(D * cfg["mlp_ratio"])
    C, P = cfg["in_chans"], cfg["patch"]
    N = (cfg["img_size"] // P) ** 2 + 1
    keys = iter(jax.random.split(key, 256))

    def w(shape, dtype=jnp.bfloat16):
        return (jax.random.normal(next(keys), shape, jnp.float32) * 0.02).astype(dtype)

    zeros = lambda s: jnp.zeros(s, jnp.float32)
    ones = lambda s: jnp.ones(s, jnp.float32)

    def branch(prefix=""):
        return {
            prefix + "ln1_g": ones((1, D)), prefix + "ln1_b": zeros((1, D)),
            prefix + "qkv_w": w((D, 3 * D)), prefix + "qkv_b": zeros((1, 3 * D)),
            prefix + "proj_w": w((D, D)), prefix + "proj_b": zeros((1, D)),
            prefix + "ln2_g": ones((1, D)), prefix + "ln2_b": zeros((1, D)),
            prefix + "fc1_w": w((D, MLP)), prefix + "fc1_b": zeros((1, MLP)),
            prefix + "fc2_w": w((MLP, D)), prefix + "fc2_b": zeros((1, D)),
        }

    params = {
        "patch_w": w((C * P * P, D)), "patch_b": zeros((1, D)),
        "cls_token": w((1, 1, D), jnp.float32),
        "pos_embed": w((1, N, D), jnp.float32),
        "sa_cls_w": w((D, D), jnp.float32), "sa_cls_b": zeros((D,)),
        "glca_cls_w": w((D, D), jnp.float32), "glca_cls_b": zeros((D,)),
        "pwca_cls_w": w((D, D), jnp.float32), "pwca_cls_b": zeros((D,)),
        "cls_w": w((2 * D, cfg["num_classes"]), jnp.float32),
        "cls_b": zeros((cfg["num_classes"],)),
        "blocks": [],
    }
    for i in range(cfg["num_sa_blocks"]):
        bp = branch()
        if i < cfg["num_glca_blocks"]:
            bp.update(branch("glca_"))
        params["blocks"].append(bp)
    return params


# --------------------------------------------------------------------------
# Main
# --------------------------------------------------------------------------
if __name__ == "__main__":
    cfg = {
        "num_classes": 2,
        "num_sa_blocks": 2,
        "num_glca_blocks": 1,
        "num_pwca_blocks": 2,
        "local_ratio": 0.25,
        "embed_dim": 32,
        "num_heads": 4,
        "mlp_ratio": 4.0,
        "img_size": 16,
        "in_chans": 4,
        "patch": 8,
    }

    # Probe Buffered(1) support eagerly, before any jit tracing.
    _buffered_weights_ok()

    root = jax.random.PRNGKey(0)
    k_param, k_x, k_xp = jax.random.split(root, 3)
    params = init_params(k_param, cfg)

    B, C, H, W = 2, cfg["in_chans"], cfg["img_size"], cfg["img_size"]
    x = jax.random.normal(k_x, (B, C, H, W), jnp.float32)
    x_pair = jax.random.normal(k_xp, (B, C, H, W), jnp.float32)

    fwd = jax.jit(lambda a, b: dcal_model_forward(a, b, params, cfg))
    outputs = fwd(x, x_pair)
    jax.block_until_ready(outputs)

    assert outputs["logits"].shape == (B, cfg["num_classes"])
    assert outputs["features"].shape == (B, 2 * cfg["embed_dim"])
    assert outputs["sa_final"].shape[0] == B
    assert outputs["pwca_final"].shape == outputs["sa_final"].shape
    print("KERNEL_OK")
</pallas_src>

<mosaic_0001>
module attributes {stable_mosaic.version = 11 : i64} {
  func.func @k(%arg0: i32, %arg1: memref<8x128xf32, #tpu.memory_space<vmem>>, %arg2: memref<8x128xf32, #tpu.memory_space<vmem>>) attributes {dimension_semantics = [#tpu.dimension_semantics<arbitrary>], iteration_bounds = array<i64: 1>, scalar_prefetch = 0 : i64, scratch_operands = 0 : i64, tpu.core_type = #tpu.core_type<tc>, window_params = [{pipeline_mode = #tpu.pipeline_mode<synchronous>, transform_indices = @transform_0, window_bounds = array<i64: 8, 128>}, {pipeline_mode = #tpu.pipeline_mode<synchronous>, transform_indices = @transform_1, window_bounds = array<i64: 8, 128>}]} {
    %c0 = arith.constant 0 : index
    %c0_0 = arith.constant 0 : index
    %0 = vector.load %arg1[%c0, %c0_0] : memref<8x128xf32, #tpu.memory_space<vmem>>, vector<8x128xf32>
    %c0_1 = arith.constant 0 : index
    %c0_2 = arith.constant 0 : index
    %1 = vector.load %arg2[%c0_1, %c0_2] : memref<8x128xf32, #tpu.memory_space<vmem>>, vector<8x128xf32>
    tpu.vector_store %arg2[%c0_1, %c0_2], %0 {strides = array<i32>} : memref<8x128xf32, #tpu.memory_space<vmem>>, vector<8x128xf32>,
    return
  }
  func.func @transform_0(%arg0: i32) -> (i32, i32) {
    %c0_i32 = arith.constant 0 : i32
    %c0_i32_0 = arith.constant 0 : i32
    %c0_i32_1 = arith.constant 0 : i32
    return %c0_i32, %c0_i32_0 : i32, i32
  }
  func.func @transform_1(%arg0: i32) -> (i32, i32) {
    %c0_i32 = arith.constant 0 : i32
    %c0_i32_0 = arith.constant 0 : i32
    %c0_i32_1 = arith.constant 0 : i32
    return %c0_i32, %c0_i32_0 : i32, i32
  }
}

module attributes {stable_mosaic.version = 11 : i64} {
  func.func @_linear_kernel(%arg0: i32, %arg1: memref<8x256xf32, #tpu.memory_space<vmem>>, %arg2: memref<256x32xbf16, #tpu.memory_space<vmem>>, %arg3: memref<1x32xf32, #tpu.memory_space<vmem>>, %arg4: memref<8x32xf32, #tpu.memory_space<vmem>>) attributes {dimension_semantics = [#tpu.dimension_semantics<parallel>], iteration_bounds = array<i64: 1>, scalar_prefetch = 0 : i64, scratch_operands = 0 : i64, tpu.core_type = #tpu.core_type<tc>, window_params = [{transform_indices = @transform_0, window_bounds = array<i64: 8, 256>}, {pipeline_mode = #tpu.pipeline_mode<synchronous>, transform_indices = @transform_1, window_bounds = array<i64: 256, 32>}, {pipeline_mode = #tpu.pipeline_mode<synchronous>, transform_indices = @transform_2, window_bounds = array<i64: 1, 32>}, {transform_indices = @transform_3, window_bounds = array<i64: 8, 32>}]} {
    %c0 = arith.constant 0 : index
    %c0_0 = arith.constant 0 : index
    %0 = vector.load %arg1[%c0, %c0_0] : memref<8x256xf32, #tpu.memory_space<vmem>>, vector<8x256xf32>
    %1 = arith.truncf %0 : vector<8x256xf32> to vector<8x256xbf16>
    %c0_1 = arith.constant 0 : index
    %c0_2 = arith.constant 0 : index
    %2 = vector.load %arg2[%c0_1, %c0_2] : memref<256x32xbf16, #tpu.memory_space<vmem>>, vector<256x32xbf16>
    %cst = arith.constant dense<0.000000e+00> : vector<8x32xf32>
    %3 = tpu.matmul %1, %2, %cst {dimension_numbers = #tpu.dot_dimension_numbers<[1], [0], [0], [1], [0, 0, 1, 1], [], []>} : vector<8x256xbf16>, vector<256x32xbf16>, vector<8x32xf32> -> vector<8x32xf32>
    %c0_3 = arith.constant 0 : index
    %c0_4 = arith.constant 0 : index
    %4 = vector.load %arg3[%c0_3, %c0_4] : memref<1x32xf32, #tpu.memory_space<vmem>>, vector<1x32xf32>
    %5 = vector.broadcast %4 : vector<1x32xf32> to vector<8x32xf32>
    %6 = arith.addf %3, %5 : vector<8x32xf32>
    %c0_5 = arith.constant 0 : index
    %c0_6 = arith.constant 0 : index
    %7 = vector.load %arg4[%c0_5, %c0_6] : memref<8x32xf32, #tpu.memory_space<vmem>>, vector<8x32xf32>
    tpu.vector_store %arg4[%c0_5, %c0_6], %6 {strides = array<i32>} : memref<8x32xf32, #tpu.memory_space<vmem>>, vector<8x32xf32>,
    return
  }
  func.func @transform_0(%arg0: i32) -> (i32, i32) {
    %c0_i32 = arith.constant 0 : i32
    %c0_i32_0 = arith.constant 0 : i32
    return %arg0, %c0_i32 : i32, i32
  }
  func.func @transform_1(%arg0: i32) -> (i32, i32) {
    %c0_i32 = arith.constant 0 : i32
    %c0_i32_0 = arith.constant 0 : i32
    %c0_i32_1 = arith.constant 0 : i32
    return %c0_i32, %c0_i32_0 : i32, i32
  }
  func.func @transform_2(%arg0: i32) -> (i32, i32) {
    %c0_i32 = arith.constant 0 : i32
    %c0_i32_0 = arith.constant 0 : i32
    %c0_i32_1 = arith.constant 0 : i32
    return %c0_i32, %c0_i32_0 : i32, i32
  }
  func.func @transform_3(%arg0: i32) -> (i32, i32) {
    %c0_i32 = arith.constant 0 : i32
    %c0_i32_0 = arith.constant 0 : i32
    return %arg0, %c0_i32 : i32, i32
  }
}

module attributes {stable_mosaic.version = 11 : i64} {
  func.func @_post_kernel(%arg0: i32, %arg1: memref<10x32xf32, #tpu.memory_space<vmem>>, %arg2: memref<10x32xf32, #tpu.memory_space<vmem>>, %arg3: memref<32x32xbf16, #tpu.memory_space<vmem>>, %arg4: memref<1x32xf32, #tpu.memory_space<vmem>>, %arg5: memref<1x32xf32, #tpu.memory_space<vmem>>, %arg6: memref<1x32xf32, #tpu.memory_space<vmem>>, %arg7: memref<32x128xbf16, #tpu.memory_space<vmem>>, %arg8: memref<1x128xf32, #tpu.memory_space<vmem>>, %arg9: memref<128x32xbf16, #tpu.memory_space<vmem>>, %arg10: memref<1x32xf32, #tpu.memory_space<vmem>>, %arg11: memref<10x32xf32, #tpu.memory_space<vmem>>) attributes {dimension_semantics = [#tpu.dimension_semantics<parallel>], iteration_bounds = array<i64: 1>, scalar_prefetch = 0 : i64, scratch_operands = 0 : i64, tpu.core_type = #tpu.core_type<tc>, window_params = [{transform_indices = @transform_0, window_bounds = array<i64: 10, 32>}, {transform_indices = @transform_1, window_bounds = array<i64: 10, 32>}, {pipeline_mode = #tpu.pipeline_mode<synchronous>, transform_indices = @transform_2, window_bounds = array<i64: 32, 32>}, {pipeline_mode = #tpu.pipeline_mode<synchronous>, transform_indices = @transform_3, window_bounds = array<i64: 1, 32>}, {pipeline_mode = #tpu.pipeline_mode<synchronous>, transform_indices = @transform_4, window_bounds = array<i64: 1, 32>}, {pipeline_mode = #tpu.pipeline_mode<synchronous>, transform_indices = @transform_5, window_bounds = array<i64: 1, 32>}, {pipeline_mode = #tpu.pipeline_mode<synchronous>, transform_indices = @transform_6, window_bounds = array<i64: 32, 128>}, {pipeline_mode = #tpu.pipeline_mode<synchronous>, transform_indices = @transform_7, window_bounds = array<i64: 1, 128>}, {pipeline_mode = #tpu.pipeline_mode<synchronous>, transform_indices = @transform_8, window_bounds = array<i64: 128, 32>}, {pipeline_mode = #tpu.pipeline_mode<synchronous>, transform_indices = @transform_9, window_bounds = array<i64: 1, 32>}, {transform_indices = @transform_10, window_bounds = array<i64: 10, 32>}]} {
    %c0 = arith.constant 0 : index
    %c0_0 = arith.constant 0 : index
    %0 = vector.load %arg1[%c0, %c0_0] : memref<10x32xf32, #tpu.memory_space<vmem>>, vector<10x32xf32>
    %1 = arith.truncf %0 : vector<10x32xf32> to vector<10x32xbf16>
    %c0_1 = arith.constant 0 : index
    %c0_2 = arith.constant 0 : index
    %2 = vector.load %arg3[%c0_1, %c0_2] : memref<32x32xbf16, #tpu.memory_space<vmem>>, vector<32x32xbf16>
    %cst = arith.constant dense<0.000000e+00> : vector<10x32xf32>
    %3 = tpu.matmul %1, %2, %cst {dimension_numbers = #tpu.dot_dimension_numbers<[1], [0], [0], [1], [0, 0, 1, 1], [], []>} : vector<10x32xbf16>, vector<32x32xbf16>, vector<10x32xf32> -> vector<10x32xf32>
    %c0_3 = arith.constant 0 : index
    %c0_4 = arith.constant 0 : index
    %4 = vector.load %arg4[%c0_3, %c0_4] : memref<1x32xf32, #tpu.memory_space<vmem>>, vector<1x32xf32>
    %5 = vector.broadcast %4 : vector<1x32xf32> to vector<10x32xf32>
    %6 = arith.addf %3, %5 : vector<10x32xf32>
    %c0_5 = arith.constant 0 : index
    %c0_6 = arith.constant 0 : index
    %7 = vector.load %arg2[%c0_5, %c0_6] : memref<10x32xf32, #tpu.memory_space<vmem>>, vector<10x32xf32>
    %8 = arith.addf %7, %6 : vector<10x32xf32>
    %cst_7 = arith.constant dense<0.000000e+00> : vector<10xf32>
    %9 = vector.multi_reduction <add>, %8, %cst_7 [1] : vector<10x32xf32> to vector<10xf32>
    %10 = vector.shape_cast %9 : vector<10xf32> to vector<10x1xf32>
    %cst_8 = arith.constant 3.200000e+01 : f32
    %11 = vector.broadcast %cst_8 : f32 to vector<10x1xf32>
    %12 = arith.divf %10, %11 : vector<10x1xf32>
    %13 = vector.broadcast %12 : vector<10x1xf32> to vector<10x32xf32>
    %14 = arith.subf %8, %13 : vector<10x32xf32>
    %15 = arith.mulf %14, %14 : vector<10x32xf32>
    %cst_9 = arith.constant dense<0.000000e+00> : vector<10xf32>
    %16 = vector.multi_reduction <add>, %15, %cst_9 [1] : vector<10x32xf32> to vector<10xf32>
    %17 = vector.shape_cast %16 : vector<10xf32> to vector<10x1xf32>
    %cst_10 = arith.constant 3.200000e+01 : f32
    %18 = vector.broadcast %cst_10 : f32 to vector<10x1xf32>
    %19 = arith.divf %17, %18 : vector<10x1xf32>
    %20 = vector.broadcast %12 : vector<10x1xf32> to vector<10x32xf32>
    %21 = arith.subf %8, %20 : vector<10x32xf32>
    %cst_11 = arith.constant 9.99999974E-6 : f32
    %22 = vector.broadcast %cst_11 : f32 to vector<10x1xf32>
    %23 = arith.addf %19, %22 : vector<10x1xf32>
    %24 = math.rsqrt %23 : vector<10x1xf32>
    %25 = vector.broadcast %24 : vector<10x1xf32> to vector<10x32xf32>
    %26 = arith.mulf %21, %25 : vector<10x32xf32>
    %c0_12 = arith.constant 0 : index
    %c0_13 = arith.constant 0 : index
    %27 = vector.load %arg5[%c0_12, %c0_13] : memref<1x32xf32, #tpu.memory_space<vmem>>, vector<1x32xf32>
    %28 = vector.broadcast %27 : vector<1x32xf32> to vector<10x32xf32>
    %29 = arith.mulf %26, %28 : vector<10x32xf32>
    %c0_14 = arith.constant 0 : index
    %c0_15 = arith.constant 0 : index
    %30 = vector.load %arg6[%c0_14, %c0_15] : memref<1x32xf32, #tpu.memory_space<vmem>>, vector<1x32xf32>
    %31 = vector.broadcast %30 : vector<1x32xf32> to vector<10x32xf32>
    %32 = arith.addf %29, %31 : vector<10x32xf32>
    %33 = arith.truncf %32 : vector<10x32xf32> to vector<10x32xbf16>
    %c0_16 = arith.constant 0 : index
    %c0_17 = arith.constant 0 : index
    %34 = vector.load %arg7[%c0_16, %c0_17] : memref<32x128xbf16, #tpu.memory_space<vmem>>, vector<32x128xbf16>
    %cst_18 = arith.constant dense<0.000000e+00> : vector<10x128xf32>
    %35 = tpu.matmul %33, %34, %cst_18 {dimension_numbers = #tpu.dot_dimension_numbers<[1], [0], [0], [1], [0, 0, 1, 1], [], []>} : vector<10x32xbf16>, vector<32x128xbf16>, vector<10x128xf32> -> vector<10x128xf32>
    %c0_19 = arith.constant 0 : index
    %c0_20 = arith.constant 0 : index
    %36 = vector.load %arg8[%c0_19, %c0_20] : memref<1x128xf32, #tpu.memory_space<vmem>>, vector<1x128xf32>
    %37 = vector.broadcast %36 : vector<1x128xf32> to vector<10x128xf32>
    %38 = arith.addf %35, %37 : vector<10x128xf32>
    %39 = arith.mulf %38, %38 : vector<10x128xf32>
    %40 = arith.mulf %38, %39 : vector<10x128xf32>
    %cst_21 = arith.constant 4.471500e-02 : f32
    %41 = vector.broadcast %cst_21 : f32 to vector<10x128xf32>
    %42 = arith.mulf %41, %40 : vector<10x128xf32>
    %43 = arith.addf %38, %42 : vector<10x128xf32>
    %cst_22 = arith.constant 0.797884583 : f32
    %44 = vector.broadcast %cst_22 : f32 to vector<10x128xf32>
    %45 = arith.mulf %44, %43 : vector<10x128xf32>
    %46 = math.tanh %45 : vector<10x128xf32>
    %cst_23 = arith.constant 1.000000e+00 : f32
    %47 = vector.broadcast %cst_23 : f32 to vector<10x128xf32>
    %48 = arith.addf %47, %46 : vector<10x128xf32>
    %cst_24 = arith.constant 5.000000e-01 : f32
    %49 = vector.broadcast %cst_24 : f32 to vector<10x128xf32>
    %50 = arith.mulf %49, %48 : vector<10x128xf32>
    %51 = arith.mulf %38, %50 : vector<10x128xf32>
    %52 = arith.truncf %51 : vector<10x128xf32> to vector<10x128xbf16>
    %c0_25 = arith.constant 0 : index
    %c0_26 = arith.constant 0 : index
    %53 = vector.load %arg9[%c0_25, %c0_26] : memref<128x32xbf16, #tpu.memory_space<vmem>>, vector<128x32xbf16>
    %cst_27 = arith.constant dense<0.000000e+00> : vector<10x32xf32>
    %54 = tpu.matmul %52, %53, %cst_27 {dimension_numbers = #tpu.dot_dimension_numbers<[1], [0], [0], [1], [0, 0, 1, 1], [], []>} : vector<10x128xbf16>, vector<128x32xbf16>, vector<10x32xf32> -> vector<10x32xf32>
    %c0_28 = arith.constant 0 : index
    %c0_29 = arith.constant 0 : index
    %55 = vector.load %arg10[%c0_28, %c0_29] : memref<1x32xf32, #tpu.memory_space<vmem>>, vector<1x32xf32>
    %56 = vector.broadcast %55 : vector<1x32xf32> to vector<10x32xf32>
    %57 = arith.addf %54, %56 : vector<10x32xf32>
    %58 = arith.addf %8, %57 : vector<10x32xf32>
    %c0_30 = arith.constant 0 : index
    %c0_31 = arith.constant 0 : index
    %59 = vector.load %arg11[%c0_30, %c0_31] : memref<10x32xf32, #tpu.memory_space<vmem>>, vector<10x32xf32>
    tpu.vector_store %arg11[%c0_30, %c0_31], %58 {strides = array<i32>} : memref<10x32xf32, #tpu.memory_space<vmem>>, vector<10x32xf32>,
    return
  }
  func.func @transform_0(%arg0: i32) -> (i32, i32) {
    %c0_i32 = arith.constant 0 : i32
    %c0_i32_0 = arith.constant 0 : i32
    return %arg0, %c0_i32 : i32, i32
  }
  func.func @transform_1(%arg0: i32) -> (i32, i32) {
    %c0_i32 = arith.constant 0 : i32
    %c0_i32_0 = arith.constant 0 : i32
    return %arg0, %c0_i32 : i32, i32
  }
  func.func @transform_2(%arg0: i32) -> (i32, i32) {
    %c0_i32 = arith.constant 0 : i32
    %c0_i32_0 = arith.constant 0 : i32
    %c0_i32_1 = arith.constant 0 : i32
    return %c0_i32, %c0_i32_0 : i32, i32
  }
  func.func @transform_3(%arg0: i32) -> (i32, i32) {
    %c0_i32 = arith.constant 0 : i32
    %c0_i32_0 = arith.constant 0 : i32
    %c0_i32_1 = arith.constant 0 : i32
    return %c0_i32, %c0_i32_0 : i32, i32
  }
  func.func @transform_4(%arg0: i32) -> (i32, i32) {
    %c0_i32 = arith.constant 0 : i32
    %c0_i32_0 = arith.constant 0 : i32
    %c0_i32_1 = arith.constant 0 : i32
    return %c0_i32, %c0_i32_0 : i32, i32
  }
  func.func @transform_5(%arg0: i32) -> (i32, i32) {
    %c0_i32 = arith.constant 0 : i32
    %c0_i32_0 = arith.constant 0 : i32
    %c0_i32_1 = arith.constant 0 : i32
    return %c0_i32, %c0_i32_0 : i32, i32
  }
  func.func @transform_6(%arg0: i32) -> (i32, i32) {
    %c0_i32 = arith.constant 0 : i32
    %c0_i32_0 = arith.constant 0 : i32
    %c0_i32_1 = arith.constant 0 : i32
    return %c0_i32, %c0_i32_0 : i32, i32
  }
  func.func @transform_7(%arg0: i32) -> (i32, i32) {
    %c0_i32 = arith.constant 0 : i32
    %c0_i32_0 = arith.constant 0 : i32
    %c0_i32_1 = arith.constant 0 : i32
    return %c0_i32, %c0_i32_0 : i32, i32
  }
  func.func @transform_8(%arg0: i32) -> (i32, i32) {
    %c0_i32 = arith.constant 0 : i32
    %c0_i32_0 = arith.constant 0 : i32
    %c0_i32_1 = arith.constant 0 : i32
    return %c0_i32, %c0_i32_0 : i32, i32
  }
  func.func @transform_9(%arg0: i32) -> (i32, i32) {
    %c0_i32 = arith.constant 0 : i32
    %c0_i32_0 = arith.constant 0 : i32
    %c0_i32_1 = arith.constant 0 : i32
    return %c0_i32, %c0_i32_0 : i32, i32
  }
  func.func @transform_10(%arg0: i32) -> (i32, i32) {
    %c0_i32 = arith.constant 0 : i32
    %c0_i32_0 = arith.constant 0 : i32
    return %arg0, %c0_i32 : i32, i32
  }
}

module attributes {stable_mosaic.version = 11 : i64} {
  func.func @_ln_qkv_kernel(%arg0: i32, %arg1: memref<10x32xf32, #tpu.memory_space<vmem>>, %arg2: memref<1x32xf32, #tpu.memory_space<vmem>>, %arg3: memref<1x32xf32, #tpu.memory_space<vmem>>, %arg4: memref<32x96xbf16, #tpu.memory_space<vmem>>, %arg5: memref<1x96xf32, #tpu.memory_space<vmem>>, %arg6: memref<10x32xbf16, #tpu.memory_space<vmem>>, %arg7: memref<10x32xbf16, #tpu.memory_space<vmem>>, %arg8: memref<10x32xbf16, #tpu.memory_space<vmem>>) attributes {dimension_semantics = [#tpu.dimension_semantics<parallel>], iteration_bounds = array<i64: 1>, scalar_prefetch = 0 : i64, scratch_operands = 0 : i64, tpu.core_type = #tpu.core_type<tc>, window_params = [{transform_indices = @transform_0, window_bounds = array<i64: 10, 32>}, {pipeline_mode = #tpu.pipeline_mode<synchronous>, transform_indices = @transform_1, window_bounds = array<i64: 1, 32>}, {pipeline_mode = #tpu.pipeline_mode<synchronous>, transform_indices = @transform_2, window_bounds = array<i64: 1, 32>}, {pipeline_mode = #tpu.pipeline_mode<synchronous>, transform_indices = @transform_3, window_bounds = array<i64: 32, 96>}, {pipeline_mode = #tpu.pipeline_mode<synchronous>, transform_indices = @transform_4, window_bounds = array<i64: 1, 96>}, {transform_indices = @transform_5, window_bounds = array<i64: 10, 32>}, {transform_indices = @transform_6, window_bounds = array<i64: 10, 32>}, {transform_indices = @transform_7, window_bounds = array<i64: 10, 32>}]} {
    %c0 = arith.constant 0 : index
    %c0_0 = arith.constant 0 : index
    %0 = vector.load %arg1[%c0, %c0_0] : memref<10x32xf32, #tpu.memory_space<vmem>>, vector<10x32xf32>
    %cst = arith.constant dense<0.000000e+00> : vector<10xf32>
    %1 = vector.multi_reduction <add>, %0, %cst [1] : vector<10x32xf32> to vector<10xf32>
    %2 = vector.shape_cast %1 : vector<10xf32> to vector<10x1xf32>
    %cst_1 = arith.constant 3.200000e+01 : f32
    %3 = vector.broadcast %cst_1 : f32 to vector<10x1xf32>
    %4 = arith.divf %2, %3 : vector<10x1xf32>
    %5 = vector.broadcast %4 : vector<10x1xf32> to vector<10x32xf32>
    %6 = arith.subf %0, %5 : vector<10x32xf32>
    %7 = arith.mulf %6, %6 : vector<10x32xf32>
    %cst_2 = arith.constant dense<0.000000e+00> : vector<10xf32>
    %8 = vector.multi_reduction <add>, %7, %cst_2 [1] : vector<10x32xf32> to vector<10xf32>
    %9 = vector.shape_cast %8 : vector<10xf32> to vector<10x1xf32>
    %cst_3 = arith.constant 3.200000e+01 : f32
    %10 = vector.broadcast %cst_3 : f32 to vector<10x1xf32>
    %11 = arith.divf %9, %10 : vector<10x1xf32>
    %12 = vector.broadcast %4 : vector<10x1xf32> to vector<10x32xf32>
    %13 = arith.subf %0, %12 : vector<10x32xf32>
    %cst_4 = arith.constant 9.99999974E-6 : f32
    %14 = vector.broadcast %cst_4 : f32 to vector<10x1xf32>
    %15 = arith.addf %11, %14 : vector<10x1xf32>
    %16 = math.rsqrt %15 : vector<10x1xf32>
    %17 = vector.broadcast %16 : vector<10x1xf32> to vector<10x32xf32>
    %18 = arith.mulf %13, %17 : vector<10x32xf32>
    %c0_5 = arith.constant 0 : index
    %c0_6 = arith.constant 0 : index
    %19 = vector.load %arg2[%c0_5, %c0_6] : memref<1x32xf32, #tpu.memory_space<vmem>>, vector<1x32xf32>
    %20 = vector.broadcast %19 : vector<1x32xf32> to vector<10x32xf32>
    %21 = arith.mulf %18, %20 : vector<10x32xf32>
    %c0_7 = arith.constant 0 : index
    %c0_8 = arith.constant 0 : index
    %22 = vector.load %arg3[%c0_7, %c0_8] : memref<1x32xf32, #tpu.memory_space<vmem>>, vector<1x32xf32>
    %23 = vector.broadcast %22 : vector<1x32xf32> to vector<10x32xf32>
    %24 = arith.addf %21, %23 : vector<10x32xf32>
    %25 = arith.truncf %24 : vector<10x32xf32> to vector<10x32xbf16>
    %c0_9 = arith.constant 0 : index
    %c0_10 = arith.constant 0 : index
    %26 = vector.load %arg4[%c0_9, %c0_10] : memref<32x96xbf16, #tpu.memory_space<vmem>>, vector<32x96xbf16>
    %cst_11 = arith.constant dense<0.000000e+00> : vector<10x96xf32>
    %27 = tpu.matmul %25, %26, %cst_11 {dimension_numbers = #tpu.dot_dimension_numbers<[1], [0], [0], [1], [0, 0, 1, 1], [], []>} : vector<10x32xbf16>, vector<32x96xbf16>, vector<10x96xf32> -> vector<10x96xf32>
    %c0_12 = arith.constant 0 : index
    %c0_13 = arith.constant 0 : index
    %28 = vector.load %arg5[%c0_12, %c0_13] : memref<1x96xf32, #tpu.memory_space<vmem>>, vector<1x96xf32>
    %29 = vector.broadcast %28 : vector<1x96xf32> to vector<10x96xf32>
    %30 = arith.addf %27, %29 : vector<10x96xf32>
    %31 = vector.extract_strided_slice %30 {offsets = [0, 0], sizes = [10, 32], strides = [1, 1]} : vector<10x96xf32> to vector<10x32xf32>
    %cst_14 = arith.constant 0.353553385 : f32
    %32 = vector.broadcast %cst_14 : f32 to vector<10x32xf32>
    %33 = arith.mulf %31, %32 : vector<10x32xf32>
    %34 = arith.truncf %33 : vector<10x32xf32> to vector<10x32xbf16>
    %c0_15 = arith.constant 0 : index
    %c0_16 = arith.constant 0 : index
    %35 = vector.load %arg6[%c0_15, %c0_16] : memref<10x32xbf16, #tpu.memory_space<vmem>>, vector<10x32xbf16>
    tpu.vector_store %arg6[%c0_15, %c0_16], %34 {strides = array<i32>} : memref<10x32xbf16, #tpu.memory_space<vmem>>, vector<10x32xbf16>,
    %36 = vector.extract_strided_slice %30 {offsets = [0, 32], sizes = [10, 32], strides = [1, 1]} : vector<10x96xf32> to vector<10x32xf32>
    %37 = arith.truncf %36 : vector<10x32xf32> to vector<10x32xbf16>
    %c0_17 = arith.constant 0 : index
    %c0_18 = arith.constant 0 : index
    %38 = vector.load %arg7[%c0_17, %c0_18] : memref<10x32xbf16, #tpu.memory_space<vmem>>, vector<10x32xbf16>
    tpu.vector_store %arg7[%c0_17, %c0_18], %37 {strides = array<i32>} : memref<10x32xbf16, #tpu.memory_space<vmem>>, vector<10x32xbf16>,
    %39 = vector.extract_strided_slice %30 {offsets = [0, 64], sizes = [10, 32], strides = [1, 1]} : vector<10x96xf32> to vector<10x32xf32>
    %40 = arith.truncf %39 : vector<10x32xf32> to vector<10x32xbf16>
    %c0_19 = arith.constant 0 : index
    %c0_20 = arith.constant 0 : index
    %41 = vector.load %arg8[%c0_19, %c0_20] : memref<10x32xbf16, #tpu.memory_space<vmem>>, vector<10x32xbf16>
    tpu.vector_store %arg8[%c0_19, %c0_20], %40 {strides = array<i32>} : memref<10x32xbf16, #tpu.memory_space<vmem>>, vector<10x32xbf16>,
    return
  }
  func.func @transform_0(%arg0: i32) -> (i32, i32) {
    %c0_i32 = arith.constant 0 : i32
    %c0_i32_0 = arith.constant 0 : i32
    return %arg0, %c0_i32 : i32, i32
  }
  func.func @transform_1(%arg0: i32) -> (i32, i32) {
    %c0_i32 = arith.constant 0 : i32
    %c0_i32_0 = arith.constant 0 : i32
    %c0_i32_1 = arith.constant 0 : i32
    return %c0_i32, %c0_i32_0 : i32, i32
  }
  func.func @transform_2(%arg0: i32) -> (i32, i32) {
    %c0_i32 = arith.constant 0 : i32
    %c0_i32_0 = arith.constant 0 : i32
    %c0_i32_1 = arith.constant 0 : i32
    return %c0_i32, %c0_i32_0 : i32, i32
  }
  func.func @transform_3(%arg0: i32) -> (i32, i32) {
    %c0_i32 = arith.constant 0 : i32
    %c0_i32_0 = arith.constant 0 : i32
    %c0_i32_1 = arith.constant 0 : i32
    return %c0_i32, %c0_i32_0 : i32, i32
  }
  func.func @transform_4(%arg0: i32) -> (i32, i32) {
    %c0_i32 = arith.constant 0 : i32
    %c0_i32_0 = arith.constant 0 : i32
    %c0_i32_1 = arith.constant 0 : i32
    return %c0_i32, %c0_i32_0 : i32, i32
  }
  func.func @transform_5(%arg0: i32) -> (i32, i32) {
    %c0_i32 = arith.constant 0 : i32
    %c0_i32_0 = arith.constant 0 : i32
    return %arg0, %c0_i32 : i32, i32
  }
  func.func @transform_6(%arg0: i32) -> (i32, i32) {
    %c0_i32 = arith.constant 0 : i32
    %c0_i32_0 = arith.constant 0 : i32
    return %arg0, %c0_i32 : i32, i32
  }
  func.func @transform_7(%arg0: i32) -> (i32, i32) {
    %c0_i32 = arith.constant 0 : i32
    %c0_i32_0 = arith.constant 0 : i32
    return %arg0, %c0_i32 : i32, i32
  }
}

module attributes {stable_mosaic.version = 11 : i64} {
  func.func @_attn_kernel(%arg0: i32, %arg1: memref<1x5x32xbf16, #tpu.memory_space<vmem>>, %arg2: memref<1x5x32xbf16, #tpu.memory_space<vmem>>, %arg3: memref<1x5x32xbf16, #tpu.memory_space<vmem>>, %arg4: memref<1x5x32xf32, #tpu.memory_space<vmem>>, %arg5: memref<1x1x5xf32, #tpu.memory_space<vmem>>) attributes {dimension_semantics = [#tpu.dimension_semantics<parallel>], iteration_bounds = array<i64: 2>, scalar_prefetch = 0 : i64, scratch_operands = 0 : i64, tpu.core_type = #tpu.core_type<tc>, window_params = [{transform_indices = @transform_0, window_bounds = array<i64: 1, 5, 32>}, {transform_indices = @transform_1, window_bounds = array<i64: 1, 5, 32>}, {transform_indices = @transform_2, window_bounds = array<i64: 1, 5, 32>}, {transform_indices = @transform_3, window_bounds = array<i64: 1, 5, 32>}, {transform_indices = @transform_4, window_bounds = array<i64: 1, 1, 5>}]} {
    %c0 = arith.constant 0 : index
    %c0_0 = arith.constant 0 : index
    %c0_1 = arith.constant 0 : index
    %0 = vector.load %arg1[%c0, %c0_0, %c0_1] : memref<1x5x32xbf16, #tpu.memory_space<vmem>>, vector<1x5x32xbf16>
    %1 = vector.shape_cast %0 : vector<1x5x32xbf16> to vector<5x32xbf16>
    %c0_2 = arith.constant 0 : index
    %c0_3 = arith.constant 0 : index
    %c0_4 = arith.constant 0 : index
    %2 = vector.load %arg2[%c0_2, %c0_3, %c0_4] : memref<1x5x32xbf16, #tpu.memory_space<vmem>>, vector<1x5x32xbf16>
    %3 = vector.shape_cast %2 : vector<1x5x32xbf16> to vector<5x32xbf16>
    %c0_5 = arith.constant 0 : index
    %c0_6 = arith.constant 0 : index
    %c0_7 = arith.constant 0 : index
    %4 = vector.load %arg3[%c0_5, %c0_6, %c0_7] : memref<1x5x32xbf16, #tpu.memory_space<vmem>>, vector<1x5x32xbf16>
    %5 = vector.shape_cast %4 : vector<1x5x32xbf16> to vector<5x32xbf16>
    %6 = vector.extract_strided_slice %1 {offsets = [0, 0], sizes = [5, 8], strides = [1, 1]} : vector<5x32xbf16> to vector<5x8xbf16>
    %7 = vector.extract_strided_slice %3 {offsets = [0, 0], sizes = [5, 8], strides = [1, 1]} : vector<5x32xbf16> to vector<5x8xbf16>
    %cst = arith.constant dense<0.000000e+00> : vector<5x5xf32>
    %8 = tpu.matmul %6, %7, %cst {dimension_numbers = #tpu.dot_dimension_numbers<[1], [1], [0], [0], [0, 0, 1, 0], [], []>} : vector<5x8xbf16>, vector<5x8xbf16>, vector<5x5xf32> -> vector<5x5xf32>
    %cst_8 = arith.constant dense<0xFF800000> : vector<5xf32>
    %9 = vector.multi_reduction <maximumf>, %8, %cst_8 [1] : vector<5x5xf32> to vector<5xf32>
    %10 = vector.shape_cast %9 : vector<5xf32> to vector<5x1xf32>
    %11 = vector.broadcast %10 : vector<5x1xf32> to vector<5x5xf32>
    %12 = arith.subf %8, %11 : vector<5x5xf32>
    %13 = math.exp %12 : vector<5x5xf32>
    %cst_9 = arith.constant dense<0.000000e+00> : vector<5xf32>
    %14 = vector.multi_reduction <add>, %13, %cst_9 [1] : vector<5x5xf32> to vector<5xf32>
    %15 = vector.shape_cast %14 : vector<5xf32> to vector<5x1xf32>
    %16 = tpu.reciprocal %15 {approx = true} : vector<5x1xf32> -> vector<5x1xf32>
    %17 = vector.broadcast %16 : vector<5x1xf32> to vector<5x5xf32>
    %18 = arith.mulf %13, %17 : vector<5x5xf32>
    %19 = arith.truncf %18 : vector<5x5xf32> to vector<5x5xbf16>
    %20 = vector.extract_strided_slice %5 {offsets = [0, 0], sizes = [5, 8], strides = [1, 1]} : vector<5x32xbf16> to vector<5x8xbf16>
    %cst_10 = arith.constant dense<0.000000e+00> : vector<5x8xf32>
    %21 = tpu.matmul %19, %20, %cst_10 {dimension_numbers = #tpu.dot_dimension_numbers<[1], [0], [0], [1], [0, 0, 1, 1], [], []>} : vector<5x5xbf16>, vector<5x8xbf16>, vector<5x8xf32> -> vector<5x8xf32>
    %c0_11 = arith.constant 0 : index
    %c0_12 = arith.constant 0 : index
    %c0_13 = arith.constant 0 : index
    %22 = vector.load %arg4[%c0_11, %c0_12, %c0_13] : memref<1x5x32xf32, #tpu.memory_space<vmem>>, vector<1x5x8xf32>
    %23 = vector.shape_cast %22 : vector<1x5x8xf32> to vector<5x8xf32>
    %24 = vector.shape_cast %21 : vector<5x8xf32> to vector<1x5x8xf32>
    tpu.vector_store %arg4[%c0_11, %c0_12, %c0_13], %24 {strides = array<i32>} : memref<1x5x32xf32, #tpu.memory_space<vmem>>, vector<1x5x8xf32>,
    %25 = vector.extract_strided_slice %18 {offsets = [0, 0], sizes = [1, 5], strides = [1, 1]} : vector<5x5xf32> to vector<1x5xf32>
    %26 = vector.extract_strided_slice %1 {offsets = [0, 8], sizes = [5, 8], strides = [1, 1]} : vector<5x32xbf16> to vector<5x8xbf16>
    %27 = vector.extract_strided_slice %3 {offsets = [0, 8], sizes = [5, 8], strides = [1, 1]} : vector<5x32xbf16> to vector<5x8xbf16>
    %cst_14 = arith.constant dense<0.000000e+00> : vector<5x5xf32>
    %28 = tpu.matmul %26, %27, %cst_14 {dimension_numbers = #tpu.dot_dimension_numbers<[1], [1], [0], [0], [0, 0, 1, 0], [], []>} : vector<5x8xbf16>, vector<5x8xbf16>, vector<5x5xf32> -> vector<5x5xf32>
    %cst_15 = arith.constant dense<0xFF800000> : vector<5xf32>
    %29 = vector.multi_reduction <maximumf>, %28, %cst_15 [1] : vector<5x5xf32> to vector<5xf32>
    %30 = vector.shape_cast %29 : vector<5xf32> to vector<5x1xf32>
    %31 = vector.broadcast %30 : vector<5x1xf32> to vector<5x5xf32>
    %32 = arith.subf %28, %31 : vector<5x5xf32>
    %33 = math.exp %32 : vector<5x5xf32>
    %cst_16 = arith.constant dense<0.000000e+00> : vector<5xf32>
    %34 = vector.multi_reduction <add>, %33, %cst_16 [1] : vector<5x5xf32> to vector<5xf32>
    %35 = vector.shape_cast %34 : vector<5xf32> to vector<5x1xf32>
    %36 = tpu.reciprocal %35 {approx = true} : vector<5x1xf32> -> vector<5x1xf32>
    %37 = vector.broadcast %36 : vector<5x1xf32> to vector<5x5xf32>
    %38 = arith.mulf %33, %37 : vector<5x5xf32>
    %39 = arith.truncf %38 : vector<5x5xf32> to vector<5x5xbf16>
    %40 = vector.extract_strided_slice %5 {offsets = [0, 8], sizes = [5, 8], strides = [1, 1]} : vector<5x32xbf16> to vector<5x8xbf16>
    %cst_17 = arith.constant dense<0.000000e+00> : vector<5x8xf32>
    %41 = tpu.matmul %39, %40, %cst_17 {dimension_numbers = #tpu.dot_dimension_numbers<[1], [0], [0], [1], [0, 0, 1, 1], [], []>} : vector<5x5xbf16>, vector<5x8xbf16>, vector<5x8xf32> -> vector<5x8xf32>
    %c0_18 = arith.constant 0 : index
    %c0_19 = arith.constant 0 : index
    %c8 = arith.constant 8 : index
    %42 = vector.load %arg4[%c0_18, %c0_19, %c8] : memref<1x5x32xf32, #tpu.memory_space<vmem>>, vector<1x5x8xf32>
    %43 = vector.shape_cast %42 : vector<1x5x8xf32> to vector<5x8xf32>
    %44 = vector.shape_cast %41 : vector<5x8xf32> to vector<1x5x8xf32>
    tpu.vector_store %arg4[%c0_18, %c0_19, %c8], %44 {strides = array<i32>} : memref<1x5x32xf32, #tpu.memory_space<vmem>>, vector<1x5x8xf32>,
    %45 = vector.extract_strided_slice %38 {offsets = [0, 0], sizes = [1, 5], strides = [1, 1]} : vector<5x5xf32> to vector<1x5xf32>
    %46 = arith.addf %25, %45 : vector<1x5xf32>
    %47 = vector.extract_strided_slice %1 {offsets = [0, 16], sizes = [5, 8], strides = [1, 1]} : vector<5x32xbf16> to vector<5x8xbf16>
    %48 = vector.extract_strided_slice %3 {offsets = [0, 16], sizes = [5, 8], strides = [1, 1]} : vector<5x32xbf16> to vector<5x8xbf16>
    %cst_20 = arith.constant dense<0.000000e+00> : vector<5x5xf32>
    %49 = tpu.matmul %47, %48, %cst_20 {dimension_numbers = #tpu.dot_dimension_numbers<[1], [1], [0], [0], [0, 0, 1, 0], [], []>} : vector<5x8xbf16>, vector<5x8xbf16>, vector<5x5xf32> -> vector<5x5xf32>
    %cst_21 = arith.constant dense<0xFF800000> : vector<5xf32>
    %50 = vector.multi_reduction <maximumf>, %49, %cst_21 [1] : vector<5x5xf32> to vector<5xf32>
    %51 = vector.shape_cast %50 : vector<5xf32> to vector<5x1xf32>
    %52 = vector.broadcast %51 : vector<5x1xf32> to vector<5x5xf32>
    %53 = arith.subf %49, %52 : vector<5x5xf32>
    %54 = math.exp %53 : vector<5x5xf32>
    %cst_22 = arith.constant dense<0.000000e+00> : vector<5xf32>
    %55 = vector.multi_reduction <add>, %54, %cst_22 [1] : vector<5x5xf32> to vector<5xf32>
    %56 = vector.shape_cast %55 : vector<5xf32> to vector<5x1xf32>
    %57 = tpu.reciprocal %56 {approx = true} : vector<5x1xf32> -> vector<5x1xf32>
    %58 = vector.broadcast %57 : vector<5x1xf32> to vector<5x5xf32>
    %59 = arith.mulf %54, %58 : vector<5x5xf32>
    %60 = arith.truncf %59 : vector<5x5xf32> to vector<5x5xbf16>
    %61 = vector.extract_strided_slice %5 {offsets = [0, 16], sizes = [5, 8], strides = [1, 1]} : vector<5x32xbf16> to vector<5x8xbf16>
    %cst_23 = arith.constant dense<0.000000e+00> : vector<5x8xf32>
    %62 = tpu.matmul %60, %61, %cst_23 {dimension_numbers = #tpu.dot_dimension_numbers<[1], [0], [0], [1], [0, 0, 1, 1], [], []>} : vector<5x5xbf16>, vector<5x8xbf16>, vector<5x8xf32> -> vector<5x8xf32>
    %c0_24 = arith.constant 0 : index
    %c0_25 = arith.constant 0 : index
    %c16 = arith.constant 16 : index
    %63 = vector.load %arg4[%c0_24, %c0_25, %c16] : memref<1x5x32xf32, #tpu.memory_space<vmem>>, vector<1x5x8xf32>
    %64 = vector.shape_cast %63 : vector<1x5x8xf32> to vector<5x8xf32>
    %65 = vector.shape_cast %62 : vector<5x8xf32> to vector<1x5x8xf32>
    tpu.vector_store %arg4[%c0_24, %c0_25, %c16], %65 {strides = array<i32>} : memref<1x5x32xf32, #tpu.memory_space<vmem>>, vector<1x5x8xf32>,
    %66 = vector.extract_strided_slice %59 {offsets = [0, 0], sizes = [1, 5], strides = [1, 1]} : vector<5x5xf32> to vector<1x5xf32>
    %67 = arith.addf %46, %66 : vector<1x5xf32>
    %68 = vector.extract_strided_slice %1 {offsets = [0, 24], sizes = [5, 8], strides = [1, 1]} : vector<5x32xbf16> to vector<5x8xbf16>
    %69 = vector.extract_strided_slice %3 {offsets = [0, 24], sizes = [5, 8], strides = [1, 1]} : vector<5x32xbf16> to vector<5x8xbf16>
    %cst_26 = arith.constant dense<0.000000e+00> : vector<5x5xf32>
    %70 = tpu.matmul %68, %69, %cst_26 {dimension_numbers = #tpu.dot_dimension_numbers<[1], [1], [0], [0], [0, 0, 1, 0], [], []>} : vector<5x8xbf16>, vector<5x8xbf16>, vector<5x5xf32> -> vector<5x5xf32>
    %cst_27 = arith.constant dense<0xFF800000> : vector<5xf32>
    %71 = vector.multi_reduction <maximumf>, %70, %cst_27 [1] : vector<5x5xf32> to vector<5xf32>
    %72 = vector.shape_cast %71 : vector<5xf32> to vector<5x1xf32>
    %73 = vector.broadcast %72 : vector<5x1xf32> to vector<5x5xf32>
    %74 = arith.subf %70, %73 : vector<5x5xf32>
    %75 = math.exp %74 : vector<5x5xf32>
    %cst_28 = arith.constant dense<0.000000e+00> : vector<5xf32>
    %76 = vector.multi_reduction <add>, %75, %cst_28 [1] : vector<5x5xf32> to vector<5xf32>
    %77 = vector.shape_cast %76 : vector<5xf32> to vector<5x1xf32>
    %78 = tpu.reciprocal %77 {approx = true} : vector<5x1xf32> -> vector<5x1xf32>
    %79 = vector.broadcast %78 : vector<5x1xf32> to vector<5x5xf32>
    %80 = arith.mulf %75, %79 : vector<5x5xf32>
    %81 = arith.truncf %80 : vector<5x5xf32> to vector<5x5xbf16>
    %82 = vector.extract_strided_slice %5 {offsets = [0, 24], sizes = [5, 8], strides = [1, 1]} : vector<5x32xbf16> to vector<5x8xbf16>
    %cst_29 = arith.constant dense<0.000000e+00> : vector<5x8xf32>
    %83 = tpu.matmul %81, %82, %cst_29 {dimension_numbers = #tpu.dot_dimension_numbers<[1], [0], [0], [1], [0, 0, 1, 1], [], []>} : vector<5x5xbf16>, vector<5x8xbf16>, vector<5x8xf32> -> vector<5x8xf32>
    %c0_30 = arith.constant 0 : index
    %c0_31 = arith.constant 0 : index
    %c24 = arith.constant 24 : index
    %84 = vector.load %arg4[%c0_30, %c0_31, %c24] : memref<1x5x32xf32, #tpu.memory_space<vmem>>, vector<1x5x8xf32>
    %85 = vector.shape_cast %84 : vector<1x5x8xf32> to vector<5x8xf32>
    %86 = vector.shape_cast %83 : vector<5x8xf32> to vector<1x5x8xf32>
    tpu.vector_store %arg4[%c0_30, %c0_31, %c24], %86 {strides = array<i32>} : memref<1x5x32xf32, #tpu.memory_space<vmem>>, vector<1x5x8xf32>,
    %87 = vector.extract_strided_slice %80 {offsets = [0, 0], sizes = [1, 5], strides = [1, 1]} : vector<5x5xf32> to vector<1x5xf32>
    %88 = arith.addf %67, %87 : vector<1x5xf32>
    %cst_32 = arith.constant 2.500000e-01 : f32
    %89 = vector.broadcast %cst_32 : f32 to vector<1x5xf32>
    %90 = arith.mulf %88, %89 : vector<1x5xf32>
    %c0_33 = arith.constant 0 : index
    %c0_34 = arith.constant 0 : index
    %c0_35 = arith.constant 0 : index
    %91 = vector.load %arg5[%c0_33, %c0_34, %c0_35] : memref<1x1x5xf32, #tpu.memory_space<vmem>>, vector<1x1x5xf32>
    %92 = vector.shape_cast %91 : vector<1x1x5xf32> to vector<1x5xf32>
    %93 = vector.shape_cast %90 : vector<1x5xf32> to vector<1x1x5xf32>
    tpu.vector_store %arg5[%c0_33, %c0_34, %c0_35], %93 {strides = array<i32>} : memref<1x1x5xf32, #tpu.memory_space<vmem>>, vector<1x1x5xf32>,
    return
  }
  func.func @transform_0(%arg0: i32) -> (i32, i32, i32) {
    %c0_i32 = arith.constant 0 : i32
    %c0_i32_0 = arith.constant 0 : i32
    %c0_i32_1 = arith.constant 0 : i32
    return %arg0, %c0_i32, %c0_i32_0 : i32, i32, i32
  }
  func.func @transform_1(%arg0: i32) -> (i32, i32, i32) {
    %c0_i32 = arith.constant 0 : i32
    %c0_i32_0 = arith.constant 0 : i32
    %c0_i32_1 = arith.constant 0 : i32
    return %arg0, %c0_i32, %c0_i32_0 : i32, i32, i32
  }
  func.func @transform_2(%arg0: i32) -> (i32, i32, i32) {
    %c0_i32 = arith.constant 0 : i32
    %c0_i32_0 = arith.constant 0 : i32
    %c0_i32_1 = arith.constant 0 : i32
    return %arg0, %c0_i32, %c0_i32_0 : i32, i32, i32
  }
  func.func @transform_3(%arg0: i32) -> (i32, i32, i32) {
    %c0_i32 = arith.constant 0 : i32
    %c0_i32_0 = arith.constant 0 : i32
    %c0_i32_1 = arith.constant 0 : i32
    return %arg0, %c0_i32, %c0_i32_0 : i32, i32, i32
  }
  func.func @transform_4(%arg0: i32) -> (i32, i32, i32) {
    %c0_i32 = arith.constant 0 : i32
    %c0_i32_0 = arith.constant 0 : i32
    %c0_i32_1 = arith.constant 0 : i32
    return %arg0, %c0_i32, %c0_i32_0 : i32, i32, i32
  }
}

module attributes {stable_mosaic.version = 11 : i64} {
  func.func @_ln_qkv_kernel(%arg0: i32, %arg1: memref<10x32xf32, #tpu.memory_space<vmem>>, %arg2: memref<1x32xf32, #tpu.memory_space<vmem>>, %arg3: memref<1x32xf32, #tpu.memory_space<vmem>>, %arg4: memref<32x96xbf16, #tpu.memory_space<vmem>>, %arg5: memref<1x96xf32, #tpu.memory_space<vmem>>, %arg6: memref<10x32xbf16, #tpu.memory_space<vmem>>, %arg7: memref<10x32xbf16, #tpu.memory_space<vmem>>, %arg8: memref<10x32xbf16, #tpu.memory_space<vmem>>) attributes {dimension_semantics = [#tpu.dimension_semantics<parallel>], iteration_bounds = array<i64: 1>, scalar_prefetch = 0 : i64, scratch_operands = 0 : i64, tpu.core_type = #tpu.core_type<tc>, window_params = [{transform_indices = @transform_0, window_bounds = array<i64: 10, 32>}, {pipeline_mode = #tpu.pipeline_mode<synchronous>, transform_indices = @transform_1, window_bounds = array<i64: 1, 32>}, {pipeline_mode = #tpu.pipeline_mode<synchronous>, transform_indices = @transform_2, window_bounds = array<i64: 1, 32>}, {pipeline_mode = #tpu.pipeline_mode<synchronous>, transform_indices = @transform_3, window_bounds = array<i64: 32, 96>}, {pipeline_mode = #tpu.pipeline_mode<synchronous>, transform_indices = @transform_4, window_bounds = array<i64: 1, 96>}, {transform_indices = @transform_5, window_bounds = array<i64: 10, 32>}, {transform_indices = @transform_6, window_bounds = array<i64: 10, 32>}, {transform_indices = @transform_7, window_bounds = array<i64: 10, 32>}]} {
    %c0 = arith.constant 0 : index
    %c0_0 = arith.constant 0 : index
    %0 = vector.load %arg1[%c0, %c0_0] : memref<10x32xf32, #tpu.memory_space<vmem>>, vector<10x32xf32>
    %cst = arith.constant dense<0.000000e+00> : vector<10xf32>
    %1 = vector.multi_reduction <add>, %0, %cst [1] : vector<10x32xf32> to vector<10xf32>
    %2 = vector.shape_cast %1 : vector<10xf32> to vector<10x1xf32>
    %cst_1 = arith.constant 3.200000e+01 : f32
    %3 = vector.broadcast %cst_1 : f32 to vector<10x1xf32>
    %4 = arith.divf %2, %3 : vector<10x1xf32>
    %5 = vector.broadcast %4 : vector<10x1xf32> to vector<10x32xf32>
    %6 = arith.subf %0, %5 : vector<10x32xf32>
    %7 = arith.mulf %6, %6 : vector<10x32xf32>
    %cst_2 = arith.constant dense<0.000000e+00> : vector<10xf32>
    %8 = vector.multi_reduction <add>, %7, %cst_2 [1] : vector<10x32xf32> to vector<10xf32>
    %9 = vector.shape_cast %8 : vector<10xf32> to vector<10x1xf32>
    %cst_3 = arith.constant 3.200000e+01 : f32
    %10 = vector.broadcast %cst_3 : f32 to vector<10x1xf32>
    %11 = arith.divf %9, %10 : vector<10x1xf32>
    %12 = vector.broadcast %4 : vector<10x1xf32> to vector<10x32xf32>
    %13 = arith.subf %0, %12 : vector<10x32xf32>
    %cst_4 = arith.constant 9.99999974E-6 : f32
    %14 = vector.broadcast %cst_4 : f32 to vector<10x1xf32>
    %15 = arith.addf %11, %14 : vector<10x1xf32>
    %16 = math.rsqrt %15 : vector<10x1xf32>
    %17 = vector.broadcast %16 : vector<10x1xf32> to vector<10x32xf32>
    %18 = arith.mulf %13, %17 : vector<10x32xf32>
    %c0_5 = arith.constant 0 : index
    %c0_6 = arith.constant 0 : index
    %19 = vector.load %arg2[%c0_5, %c0_6] : memref<1x32xf32, #tpu.memory_space<vmem>>, vector<1x32xf32>
    %20 = vector.broadcast %19 : vector<1x32xf32> to vector<10x32xf32>
    %21 = arith.mulf %18, %20 : vector<10x32xf32>
    %c0_7 = arith.constant 0 : index
    %c0_8 = arith.constant 0 : index
    %22 = vector.load %arg3[%c0_7, %c0_8] : memref<1x32xf32, #tpu.memory_space<vmem>>, vector<1x32xf32>
    %23 = vector.broadcast %22 : vector<1x32xf32> to vector<10x32xf32>
    %24 = arith.addf %21, %23 : vector<10x32xf32>
    %25 = arith.truncf %24 : vector<10x32xf32> to vector<10x32xbf16>
    %c0_9 = arith.constant 0 : index
    %c0_10 = arith.constant 0 : index
    %26 = vector.load %arg4[%c0_9, %c0_10] : memref<32x96xbf16, #tpu.memory_space<vmem>>, vector<32x96xbf16>
    %cst_11 = arith.constant dense<0.000000e+00> : vector<10x96xf32>
    %27 = tpu.matmul %25, %26, %cst_11 {dimension_numbers = #tpu.dot_dimension_numbers<[1], [0], [0], [1], [0, 0, 1, 1], [], []>} : vector<10x32xbf16>, vector<32x96xbf16>, vector<10x96xf32> -> vector<10x96xf32>
    %c0_12 = arith.constant 0 : index
    %c0_13 = arith.constant 0 : index
    %28 = vector.load %arg5[%c0_12, %c0_13] : memref<1x96xf32, #tpu.memory_space<vmem>>, vector<1x96xf32>
    %29 = vector.broadcast %28 : vector<1x96xf32> to vector<10x96xf32>
    %30 = arith.addf %27, %29 : vector<10x96xf32>
    %31 = vector.extract_strided_slice %30 {offsets = [0, 0], sizes = [10, 32], strides = [1, 1]} : vector<10x96xf32> to vector<10x32xf32>
    %cst_14 = arith.constant 0.353553385 : f32
    %32 = vector.broadcast %cst_14 : f32 to vector<10x32xf32>
    %33 = arith.mulf %31, %32 : vector<10x32xf32>
    %34 = arith.truncf %33 : vector<10x32xf32> to vector<10x32xbf16>
    %c0_15 = arith.constant 0 : index
    %c0_16 = arith.constant 0 : index
    %35 = vector.load %arg6[%c0_15, %c0_16] : memref<10x32xbf16, #tpu.memory_space<vmem>>, vector<10x32xbf16>
    tpu.vector_store %arg6[%c0_15, %c0_16], %34 {strides = array<i32>} : memref<10x32xbf16, #tpu.memory_space<vmem>>, vector<10x32xbf16>,
    %36 = vector.extract_strided_slice %30 {offsets = [0, 32], sizes = [10, 32], strides = [1, 1]} : vector<10x96xf32> to vector<10x32xf32>
    %37 = arith.truncf %36 : vector<10x32xf32> to vector<10x32xbf16>
    %c0_17 = arith.constant 0 : index
    %c0_18 = arith.constant 0 : index
    %38 = vector.load %arg7[%c0_17, %c0_18] : memref<10x32xbf16, #tpu.memory_space<vmem>>, vector<10x32xbf16>
    tpu.vector_store %arg7[%c0_17, %c0_18], %37 {strides = array<i32>} : memref<10x32xbf16, #tpu.memory_space<vmem>>, vector<10x32xbf16>,
    %39 = vector.extract_strided_slice %30 {offsets = [0, 64], sizes = [10, 32], strides = [1, 1]} : vector<10x96xf32> to vector<10x32xf32>
    %40 = arith.truncf %39 : vector<10x32xf32> to vector<10x32xbf16>
    %c0_19 = arith.constant 0 : index
    %c0_20 = arith.constant 0 : index
    %41 = vector.load %arg8[%c0_19, %c0_20] : memref<10x32xbf16, #tpu.memory_space<vmem>>, vector<10x32xbf16>
    tpu.vector_store %arg8[%c0_19, %c0_20], %40 {strides = array<i32>} : memref<10x32xbf16, #tpu.memory_space<vmem>>, vector<10x32xbf16>,
    return
  }
  func.func @transform_0(%arg0: i32) -> (i32, i32) {
    %c0_i32 = arith.constant 0 : i32
    %c0_i32_0 = arith.constant 0 : i32
    return %arg0, %c0_i32 : i32, i32
  }
  func.func @transform_1(%arg0: i32) -> (i32, i32) {
    %c0_i32 = arith.constant 0 : i32
    %c0_i32_0 = arith.constant 0 : i32
    %c0_i32_1 = arith.constant 0 : i32
    return %c0_i32, %c0_i32_0 : i32, i32
  }
  func.func @transform_2(%arg0: i32) -> (i32, i32) {
    %c0_i32 = arith.constant 0 : i32
    %c0_i32_0 = arith.constant 0 : i32
    %c0_i32_1 = arith.constant 0 : i32
    return %c0_i32, %c0_i32_0 : i32, i32
  }
  func.func @transform_3(%arg0: i32) -> (i32, i32) {
    %c0_i32 = arith.constant 0 : i32
    %c0_i32_0 = arith.constant 0 : i32
    %c0_i32_1 = arith.constant 0 : i32
    return %c0_i32, %c0_i32_0 : i32, i32
  }
  func.func @transform_4(%arg0: i32) -> (i32, i32) {
    %c0_i32 = arith.constant 0 : i32
    %c0_i32_0 = arith.constant 0 : i32
    %c0_i32_1 = arith.constant 0 : i32
    return %c0_i32, %c0_i32_0 : i32, i32
  }
  func.func @transform_5(%arg0: i32) -> (i32, i32) {
    %c0_i32 = arith.constant 0 : i32
    %c0_i32_0 = arith.constant 0 : i32
    return %arg0, %c0_i32 : i32, i32
  }
  func.func @transform_6(%arg0: i32) -> (i32, i32) {
    %c0_i32 = arith.constant 0 : i32
    %c0_i32_0 = arith.constant 0 : i32
    return %arg0, %c0_i32 : i32, i32
  }
  func.func @transform_7(%arg0: i32) -> (i32, i32) {
    %c0_i32 = arith.constant 0 : i32
    %c0_i32_0 = arith.constant 0 : i32
    return %arg0, %c0_i32 : i32, i32
  }
}

module attributes {stable_mosaic.version = 11 : i64} {
  func.func @_attn_pair_kernel(%arg0: i32, %arg1: memref<1x5x32xbf16, #tpu.memory_space<vmem>>, %arg2: memref<1x5x32xbf16, #tpu.memory_space<vmem>>, %arg3: memref<1x5x32xbf16, #tpu.memory_space<vmem>>, %arg4: memref<1x5x32xbf16, #tpu.memory_space<vmem>>, %arg5: memref<1x5x32xbf16, #tpu.memory_space<vmem>>, %arg6: memref<1x5x32xf32, #tpu.memory_space<vmem>>) attributes {dimension_semantics = [#tpu.dimension_semantics<parallel>], iteration_bounds = array<i64: 2>, scalar_prefetch = 0 : i64, scratch_operands = 0 : i64, tpu.core_type = #tpu.core_type<tc>, window_params = [{transform_indices = @transform_0, window_bounds = array<i64: 1, 5, 32>}, {transform_indices = @transform_1, window_bounds = array<i64: 1, 5, 32>}, {transform_indices = @transform_2, window_bounds = array<i64: 1, 5, 32>}, {transform_indices = @transform_3, window_bounds = array<i64: 1, 5, 32>}, {transform_indices = @transform_4, window_bounds = array<i64: 1, 5, 32>}, {transform_indices = @transform_5, window_bounds = array<i64: 1, 5, 32>}]} {
    %c0 = arith.constant 0 : index
    %c0_0 = arith.constant 0 : index
    %c0_1 = arith.constant 0 : index
    %0 = vector.load %arg1[%c0, %c0_0, %c0_1] : memref<1x5x32xbf16, #tpu.memory_space<vmem>>, vector<1x5x32xbf16>
    %1 = vector.shape_cast %0 : vector<1x5x32xbf16> to vector<5x32xbf16>
    %c0_2 = arith.constant 0 : index
    %c0_3 = arith.constant 0 : index
    %c0_4 = arith.constant 0 : index
    %2 = vector.load %arg2[%c0_2, %c0_3, %c0_4] : memref<1x5x32xbf16, #tpu.memory_space<vmem>>, vector<1x5x32xbf16>
    %3 = vector.shape_cast %2 : vector<1x5x32xbf16> to vector<5x32xbf16>
    %c0_5 = arith.constant 0 : index
    %c0_6 = arith.constant 0 : index
    %c0_7 = arith.constant 0 : index
    %4 = vector.load %arg3[%c0_5, %c0_6, %c0_7] : memref<1x5x32xbf16, #tpu.memory_space<vmem>>, vector<1x5x32xbf16>
    %5 = vector.shape_cast %4 : vector<1x5x32xbf16> to vector<5x32xbf16>
    %c0_8 = arith.constant 0 : index
    %c0_9 = arith.constant 0 : index
    %c0_10 = arith.constant 0 : index
    %6 = vector.load %arg4[%c0_8, %c0_9, %c0_10] : memref<1x5x32xbf16, #tpu.memory_space<vmem>>, vector<1x5x32xbf16>
    %7 = vector.shape_cast %6 : vector<1x5x32xbf16> to vector<5x32xbf16>
    %c0_11 = arith.constant 0 : index
    %c0_12 = arith.constant 0 : index
    %c0_13 = arith.constant 0 : index
    %8 = vector.load %arg5[%c0_11, %c0_12, %c0_13] : memref<1x5x32xbf16, #tpu.memory_space<vmem>>, vector<1x5x32xbf16>
    %9 = vector.shape_cast %8 : vector<1x5x32xbf16> to vector<5x32xbf16>
    %10 = vector.extract_strided_slice %1 {offsets = [0, 0], sizes = [5, 8], strides = [1, 1]} : vector<5x32xbf16> to vector<5x8xbf16>
    %11 = vector.extract_strided_slice %3 {offsets = [0, 0], sizes = [5, 8], strides = [1, 1]} : vector<5x32xbf16> to vector<5x8xbf16>
    %cst = arith.constant dense<0.000000e+00> : vector<5x5xf32>
    %12 = tpu.matmul %10, %11, %cst {dimension_numbers = #tpu.dot_dimension_numbers<[1], [1], [0], [0], [0, 0, 1, 0], [], []>} : vector<5x8xbf16>, vector<5x8xbf16>, vector<5x5xf32> -> vector<5x5xf32>
    %13 = vector.extract_strided_slice %7 {offsets = [0, 0], sizes = [5, 8], strides = [1, 1]} : vector<5x32xbf16> to vector<5x8xbf16>
    %cst_14 = arith.constant dense<0.000000e+00> : vector<5x5xf32>
    %14 = tpu.matmul %10, %13, %cst_14 {dimension_numbers = #tpu.dot_dimension_numbers<[1], [1], [0], [0], [0, 0, 1, 0], [], []>} : vector<5x8xbf16>, vector<5x8xbf16>, vector<5x5xf32> -> vector<5x5xf32>
    %cst_15 = arith.constant dense<0xFF800000> : vector<5xf32>
    %15 = vector.multi_reduction <maximumf>, %12, %cst_15 [1] : vector<5x5xf32> to vector<5xf32>
    %16 = vector.shape_cast %15 : vector<5xf32> to vector<5x1xf32>
    %cst_16 = arith.constant dense<0xFF800000> : vector<5xf32>
    %17 = vector.multi_reduction <maximumf>, %14, %cst_16 [1] : vector<5x5xf32> to vector<5xf32>
    %18 = vector.shape_cast %17 : vector<5xf32> to vector<5x1xf32>
    %19 = arith.maximumf %16, %18 : vector<5x1xf32>
    %20 = vector.broadcast %19 : vector<5x1xf32> to vector<5x5xf32>
    %21 = arith.subf %12, %20 : vector<5x5xf32>
    %22 = math.exp %21 : vector<5x5xf32>
    %23 = vector.broadcast %19 : vector<5x1xf32> to vector<5x5xf32>
    %24 = arith.subf %14, %23 : vector<5x5xf32>
    %25 = math.exp %24 : vector<5x5xf32>
    %cst_17 = arith.constant dense<0.000000e+00> : vector<5xf32>
    %26 = vector.multi_reduction <add>, %22, %cst_17 [1] : vector<5x5xf32> to vector<5xf32>
    %27 = vector.shape_cast %26 : vector<5xf32> to vector<5x1xf32>
    %cst_18 = arith.constant dense<0.000000e+00> : vector<5xf32>
    %28 = vector.multi_reduction <add>, %25, %cst_18 [1] : vector<5x5xf32> to vector<5xf32>
    %29 = vector.shape_cast %28 : vector<5xf32> to vector<5x1xf32>
    %30 = arith.addf %27, %29 : vector<5x1xf32>
    %31 = tpu.reciprocal %30 {approx = true} : vector<5x1xf32> -> vector<5x1xf32>
    %32 = vector.broadcast %31 : vector<5x1xf32> to vector<5x5xf32>
    %33 = arith.mulf %22, %32 : vector<5x5xf32>
    %34 = arith.truncf %33 : vector<5x5xf32> to vector<5x5xbf16>
    %35 = vector.extract_strided_slice %5 {offsets = [0, 0], sizes = [5, 8], strides = [1, 1]} : vector<5x32xbf16> to vector<5x8xbf16>
    %cst_19 = arith.constant dense<0.000000e+00> : vector<5x8xf32>
    %36 = tpu.matmul %34, %35, %cst_19 {dimension_numbers = #tpu.dot_dimension_numbers<[1], [0], [0], [1], [0, 0, 1, 1], [], []>} : vector<5x5xbf16>, vector<5x8xbf16>, vector<5x8xf32> -> vector<5x8xf32>
    %37 = vector.broadcast %31 : vector<5x1xf32> to vector<5x5xf32>
    %38 = arith.mulf %25, %37 : vector<5x5xf32>
    %39 = arith.truncf %38 : vector<5x5xf32> to vector<5x5xbf16>
    %40 = vector.extract_strided_slice %9 {offsets = [0, 0], sizes = [5, 8], strides = [1, 1]} : vector<5x32xbf16> to vector<5x8xbf16>
    %cst_20 = arith.constant dense<0.000000e+00> : vector<5x8xf32>
    %41 = tpu.matmul %39, %40, %cst_20 {dimension_numbers = #tpu.dot_dimension_numbers<[1], [0], [0], [1], [0, 0, 1, 1], [], []>} : vector<5x5xbf16>, vector<5x8xbf16>, vector<5x8xf32> -> vector<5x8xf32>
    %42 = arith.addf %36, %41 : vector<5x8xf32>
    %c0_21 = arith.constant 0 : index
    %c0_22 = arith.constant 0 : index
    %c0_23 = arith.constant 0 : index
    %43 = vector.load %arg6[%c0_21, %c0_22, %c0_23] : memref<1x5x32xf32, #tpu.memory_space<vmem>>, vector<1x5x8xf32>
    %44 = vector.shape_cast %43 : vector<1x5x8xf32> to vector<5x8xf32>
    %45 = vector.shape_cast %42 : vector<5x8xf32> to vector<1x5x8xf32>
    tpu.vector_store %arg6[%c0_21, %c0_22, %c0_23], %45 {strides = array<i32>} : memref<1x5x32xf32, #tpu.memory_space<vmem>>, vector<1x5x8xf32>,
    %46 = vector.extract_strided_slice %1 {offsets = [0, 8], sizes = [5, 8], strides = [1, 1]} : vector<5x32xbf16> to vector<5x8xbf16>
    %47 = vector.extract_strided_slice %3 {offsets = [0, 8], sizes = [5, 8], strides = [1, 1]} : vector<5x32xbf16> to vector<5x8xbf16>
    %cst_24 = arith.constant dense<0.000000e+00> : vector<5x5xf32>
    %48 = tpu.matmul %46, %47, %cst_24 {dimension_numbers = #tpu.dot_dimension_numbers<[1], [1], [0], [0], [0, 0, 1, 0], [], []>} : vector<5x8xbf16>, vector<5x8xbf16>, vector<5x5xf32> -> vector<5x5xf32>
    %49 = vector.extract_strided_slice %7 {offsets = [0, 8], sizes = [5, 8], strides = [1, 1]} : vector<5x32xbf16> to vector<5x8xbf16>
    %cst_25 = arith.constant dense<0.000000e+00> : vector<5x5xf32>
    %50 = tpu.matmul %46, %49, %cst_25 {dimension_numbers = #tpu.dot_dimension_numbers<[1], [1], [0], [0], [0, 0, 1, 0], [], []>} : vector<5x8xbf16>, vector<5x8xbf16>, vector<5x5xf32> -> vector<5x5xf32>
    %cst_26 = arith.constant dense<0xFF800000> : vector<5xf32>
    %51 = vector.multi_reduction <maximumf>, %48, %cst_26 [1] : vector<5x5xf32> to vector<5xf32>
    %52 = vector.shape_cast %51 : vector<5xf32> to vector<5x1xf32>
    %cst_27 = arith.constant dense<0xFF800000> : vector<5xf32>
    %53 = vector.multi_reduction <maximumf>, %50, %cst_27 [1] : vector<5x5xf32> to vector<5xf32>
    %54 = vector.shape_cast %53 : vector<5xf32> to vector<5x1xf32>
    %55 = arith.maximumf %52, %54 : vector<5x1xf32>
    %56 = vector.broadcast %55 : vector<5x1xf32> to vector<5x5xf32>
    %57 = arith.subf %48, %56 : vector<5x5xf32>
    %58 = math.exp %57 : vector<5x5xf32>
    %59 = vector.broadcast %55 : vector<5x1xf32> to vector<5x5xf32>
    %60 = arith.subf %50, %59 : vector<5x5xf32>
    %61 = math.exp %60 : vector<5x5xf32>
    %cst_28 = arith.constant dense<0.000000e+00> : vector<5xf32>
    %62 = vector.multi_reduction <add>, %58, %cst_28 [1] : vector<5x5xf32> to vector<5xf32>
    %63 = vector.shape_cast %62 : vector<5xf32> to vector<5x1xf32>
    %cst_29 = arith.constant dense<0.000000e+00> : vector<5xf32>
    %64 = vector.multi_reduction <add>, %61, %cst_29 [1] : vector<5x5xf32> to vector<5xf32>
    %65 = vector.shape_cast %64 : vector<5xf32> to vector<5x1xf32>
    %66 = arith.addf %63, %65 : vector<5x1xf32>
    %67 = tpu.reciprocal %66 {approx = true} : vector<5x1xf32> -> vector<5x1xf32>
    %68 = vector.broadcast %67 : vector<5x1xf32> to vector<5x5xf32>
    %69 = arith.mulf %58, %68 : vector<5x5xf32>
    %70 = arith.truncf %69 : vector<5x5xf32> to vector<5x5xbf16>
    %71 = vector.extract_strided_slice %5 {offsets = [0, 8], sizes = [5, 8], strides = [1, 1]} : vector<5x32xbf16> to vector<5x8xbf16>
    %cst_30 = arith.constant dense<0.000000e+00> : vector<5x8xf32>
    %72 = tpu.matmul %70, %71, %cst_30 {dimension_numbers = #tpu.dot_dimension_numbers<[1], [0], [0], [1], [0, 0, 1, 1], [], []>} : vector<5x5xbf16>, vector<5x8xbf16>, vector<5x8xf32> -> vector<5x8xf32>
    %73 = vector.broadcast %67 : vector<5x1xf32> to vector<5x5xf32>
    %74 = arith.mulf %61, %73 : vector<5x5xf32>
    %75 = arith.truncf %74 : vector<5x5xf32> to vector<5x5xbf16>
    %76 = vector.extract_strided_slice %9 {offsets = [0, 8], sizes = [5, 8], strides = [1, 1]} : vector<5x32xbf16> to vector<5x8xbf16>
    %cst_31 = arith.constant dense<0.000000e+00> : vector<5x8xf32>
    %77 = tpu.matmul %75, %76, %cst_31 {dimension_numbers = #tpu.dot_dimension_numbers<[1], [0], [0], [1], [0, 0, 1, 1], [], []>} : vector<5x5xbf16>, vector<5x8xbf16>, vector<5x8xf32> -> vector<5x8xf32>
    %78 = arith.addf %72, %77 : vector<5x8xf32>
    %c0_32 = arith.constant 0 : index
    %c0_33 = arith.constant 0 : index
    %c8 = arith.constant 8 : index
    %79 = vector.load %arg6[%c0_32, %c0_33, %c8] : memref<1x5x32xf32, #tpu.memory_space<vmem>>, vector<1x5x8xf32>
    %80 = vector.shape_cast %79 : vector<1x5x8xf32> to vector<5x8xf32>
    %81 = vector.shape_cast %78 : vector<5x8xf32> to vector<1x5x8xf32>
    tpu.vector_store %arg6[%c0_32, %c0_33, %c8], %81 {strides = array<i32>} : memref<1x5x32xf32, #tpu.memory_space<vmem>>, vector<1x5x8xf32>,
    %82 = vector.extract_strided_slice %1 {offsets = [0, 16], sizes = [5, 8], strides = [1, 1]} : vector<5x32xbf16> to vector<5x8xbf16>
    %83 = vector.extract_strided_slice %3 {offsets = [0, 16], sizes = [5, 8], strides = [1, 1]} : vector<5x32xbf16> to vector<5x8xbf16>
    %cst_34 = arith.constant dense<0.000000e+00> : vector<5x5xf32>
    %84 = tpu.matmul %82, %83, %cst_34 {dimension_numbers = #tpu.dot_dimension_numbers<[1], [1], [0], [0], [0, 0, 1, 0], [], []>} : vector<5x8xbf16>, vector<5x8xbf16>, vector<5x5xf32> -> vector<5x5xf32>
    %85 = vector.extract_strided_slice %7 {offsets = [0, 16], sizes = [5, 8], strides = [1, 1]} : vector<5x32xbf16> to vector<5x8xbf16>
    %cst_35 = arith.constant dense<0.000000e+00> : vector<5x5xf32>
    %86 = tpu.matmul %82, %85, %cst_35 {dimension_numbers = #tpu.dot_dimension_numbers<[1], [1], [0], [0], [0, 0, 1, 0], [], []>} : vector<5x8xbf16>, vector<5x8xbf16>, vector<5x5xf32> -> vector<5x5xf32>
    %cst_36 = arith.constant dense<0xFF800000> : vector<5xf32>
    %87 = vector.multi_reduction <maximumf>, %84, %cst_36 [1] : vector<5x5xf32> to vector<5xf32>
    %88 = vector.shape_cast %87 : vector<5xf32> to vector<5x1xf32>
    %cst_37 = arith.constant dense<0xFF800000> : vector<5xf32>
    %89 = vector.multi_reduction <maximumf>, %86, %cst_37 [1] : vector<5x5xf32> to vector<5xf32>
    %90 = vector.shape_cast %89 : vector<5xf32> to vector<5x1xf32>
    %91 = arith.maximumf %88, %90 : vector<5x1xf32>
    %92 = vector.broadcast %91 : vector<5x1xf32> to vector<5x5xf32>
    %93 = arith.subf %84, %92 : vector<5x5xf32>
    %94 = math.exp %93 : vector<5x5xf32>
    %95 = vector.broadcast %91 : vector<5x1xf32> to vector<5x5xf32>
    %96 = arith.subf %86, %95 : vector<5x5xf32>
    %97 = math.exp %96 : vector<5x5xf32>
    %cst_38 = arith.constant dense<0.000000e+00> : vector<5xf32>
    %98 = vector.multi_reduction <add>, %94, %cst_38 [1] : vector<5x5xf32> to vector<5xf32>
    %99 = vector.shape_cast %98 : vector<5xf32> to vector<5x1xf32>
    %cst_39 = arith.constant dense<0.000000e+00> : vector<5xf32>
    %100 = vector.multi_reduction <add>, %97, %cst_39 [1] : vector<5x5xf32> to vector<5xf32>
    %101 = vector.shape_cast %100 : vector<5xf32> to vector<5x1xf32>
    %102 = arith.addf %99, %101 : vector<5x1xf32>
    %103 = tpu.reciprocal %102 {approx = true} : vector<5x1xf32> -> vector<5x1xf32>
    %104 = vector.broadcast %103 : vector<5x1xf32> to vector<5x5xf32>
    %105 = arith.mulf %94, %104 : vector<5x5xf32>
    %106 = arith.truncf %105 : vector<5x5xf32> to vector<5x5xbf16>
    %107 = vector.extract_strided_slice %5 {offsets = [0, 16], sizes = [5, 8], strides = [1, 1]} : vector<5x32xbf16> to vector<5x8xbf16>
    %cst_40 = arith.constant dense<0.000000e+00> : vector<5x8xf32>
    %108 = tpu.matmul %106, %107, %cst_40 {dimension_numbers = #tpu.dot_dimension_numbers<[1], [0], [0], [1], [0, 0, 1, 1], [], []>} : vector<5x5xbf16>, vector<5x8xbf16>, vector<5x8xf32> -> vector<5x8xf32>
    %109 = vector.broadcast %103 : vector<5x1xf32> to vector<5x5xf32>
    %110 = arith.mulf %97, %109 : vector<5x5xf32>
    %111 = arith.truncf %110 : vector<5x5xf32> to vector<5x5xbf16>
    %112 = vector.extract_strided_slice %9 {offsets = [0, 16], sizes = [5, 8], strides = [1, 1]} : vector<5x32xbf16> to vector<5x8xbf16>
    %cst_41 = arith.constant dense<0.000000e+00> : vector<5x8xf32>
    %113 = tpu.matmul %111, %112, %cst_41 {dimension_numbers = #tpu.dot_dimension_numbers<[1], [0], [0], [1], [0, 0, 1, 1], [], []>} : vector<5x5xbf16>, vector<5x8xbf16>, vector<5x8xf32> -> vector<5x8xf32>
    %114 = arith.addf %108, %113 : vector<5x8xf32>
    %c0_42 = arith.constant 0 : index
    %c0_43 = arith.constant 0 : index
    %c16 = arith.constant 16 : index
    %115 = vector.load %arg6[%c0_42, %c0_43, %c16] : memref<1x5x32xf32, #tpu.memory_space<vmem>>, vector<1x5x8xf32>
    %116 = vector.shape_cast %115 : vector<1x5x8xf32> to vector<5x8xf32>
    %117 = vector.shape_cast %114 : vector<5x8xf32> to vector<1x5x8xf32>
    tpu.vector_store %arg6[%c0_42, %c0_43, %c16], %117 {strides = array<i32>} : memref<1x5x32xf32, #tpu.memory_space<vmem>>, vector<1x5x8xf32>,
    %118 = vector.extract_strided_slice %1 {offsets = [0, 24], sizes = [5, 8], strides = [1, 1]} : vector<5x32xbf16> to vector<5x8xbf16>
    %119 = vector.extract_strided_slice %3 {offsets = [0, 24], sizes = [5, 8], strides = [1, 1]} : vector<5x32xbf16> to vector<5x8xbf16>
    %cst_44 = arith.constant dense<0.000000e+00> : vector<5x5xf32>
    %120 = tpu.matmul %118, %119, %cst_44 {dimension_numbers = #tpu.dot_dimension_numbers<[1], [1], [0], [0], [0, 0, 1, 0], [], []>} : vector<5x8xbf16>, vector<5x8xbf16>, vector<5x5xf32> -> vector<5x5xf32>
    %121 = vector.extract_strided_slice %7 {offsets = [0, 24], sizes = [5, 8], strides = [1, 1]} : vector<5x32xbf16> to vector<5x8xbf16>
    %cst_45 = arith.constant dense<0.000000e+00> : vector<5x5xf32>
    %122 = tpu.matmul %118, %121, %cst_45 {dimension_numbers = #tpu.dot_dimension_numbers<[1], [1], [0], [0], [0, 0, 1, 0], [], []>} : vector<5x8xbf16>, vector<5x8xbf16>, vector<5x5xf32> -> vector<5x5xf32>
    %cst_46 = arith.constant dense<0xFF800000> : vector<5xf32>
    %123 = vector.multi_reduction <maximumf>, %120, %cst_46 [1] : vector<5x5xf32> to vector<5xf32>
    %124 = vector.shape_cast %123 : vector<5xf32> to vector<5x1xf32>
    %cst_47 = arith.constant dense<0xFF800000> : vector<5xf32>
    %125 = vector.multi_reduction <maximumf>, %122, %cst_47 [1] : vector<5x5xf32> to vector<5xf32>
    %126 = vector.shape_cast %125 : vector<5xf32> to vector<5x1xf32>
    %127 = arith.maximumf %124, %126 : vector<5x1xf32>
    %128 = vector.broadcast %127 : vector<5x1xf32> to vector<5x5xf32>
    %129 = arith.subf %120, %128 : vector<5x5xf32>
    %130 = math.exp %129 : vector<5x5xf32>
    %131 = vector.broadcast %127 : vector<5x1xf32> to vector<5x5xf32>
    %132 = arith.subf %122, %131 : vector<5x5xf32>
    %133 = math.exp %132 : vector<5x5xf32>
    %cst_48 = arith.constant dense<0.000000e+00> : vector<5xf32>
    %134 = vector.multi_reduction <add>, %130, %cst_48 [1] : vector<5x5xf32> to vector<5xf32>
    %135 = vector.shape_cast %134 : vector<5xf32> to vector<5x1xf32>
    %cst_49 = arith.constant dense<0.000000e+00> : vector<5xf32>
    %136 = vector.multi_reduction <add>, %133, %cst_49 [1] : vector<5x5xf32> to vector<5xf32>
    %137 = vector.shape_cast %136 : vector<5xf32> to vector<5x1xf32>
    %138 = arith.addf %135, %137 : vector<5x1xf32>
    %139 = tpu.reciprocal %138 {approx = true} : vector<5x1xf32> -> vector<5x1xf32>
    %140 = vector.broadcast %139 : vector<5x1xf32> to vector<5x5xf32>
    %141 = arith.mulf %130, %140 : vector<5x5xf32>
    %142 = arith.truncf %141 : vector<5x5xf32> to vector<5x5xbf16>
    %143 = vector.extract_strided_slice %5 {offsets = [0, 24], sizes = [5, 8], strides = [1, 1]} : vector<5x32xbf16> to vector<5x8xbf16>
    %cst_50 = arith.constant dense<0.000000e+00> : vector<5x8xf32>
    %144 = tpu.matmul %142, %143, %cst_50 {dimension_numbers = #tpu.dot_dimension_numbers<[1], [0], [0], [1], [0, 0, 1, 1], [], []>} : vector<5x5xbf16>, vector<5x8xbf16>, vector<5x8xf32> -> vector<5x8xf32>
    %145 = vector.broadcast %139 : vector<5x1xf32> to vector<5x5xf32>
    %146 = arith.mulf %133, %145 : vector<5x5xf32>
    %147 = arith.truncf %146 : vector<5x5xf32> to vector<5x5xbf16>
    %148 = vector.extract_strided_slice %9 {offsets = [0, 24], sizes = [5, 8], strides = [1, 1]} : vector<5x32xbf16> to vector<5x8xbf16>
    %cst_51 = arith.constant dense<0.000000e+00> : vector<5x8xf32>
    %149 = tpu.matmul %147, %148, %cst_51 {dimension_numbers = #tpu.dot_dimension_numbers<[1], [0], [0], [1], [0, 0, 1, 1], [], []>} : vector<5x5xbf16>, vector<5x8xbf16>, vector<5x8xf32> -> vector<5x8xf32>
    %150 = arith.addf %144, %149 : vector<5x8xf32>
    %c0_52 = arith.constant 0 : index
    %c0_53 = arith.constant 0 : index
    %c24 = arith.constant 24 : index
    %151 = vector.load %arg6[%c0_52, %c0_53, %c24] : memref<1x5x32xf32, #tpu.memory_space<vmem>>, vector<1x5x8xf32>
    %152 = vector.shape_cast %151 : vector<1x5x8xf32> to vector<5x8xf32>
    %153 = vector.shape_cast %150 : vector<5x8xf32> to vector<1x5x8xf32>
    tpu.vector_store %arg6[%c0_52, %c0_53, %c24], %153 {strides = array<i32>} : memref<1x5x32xf32, #tpu.memory_space<vmem>>, vector<1x5x8xf32>,
    return
  }
  func.func @transform_0(%arg0: i32) -> (i32, i32, i32) {
    %c0_i32 = arith.constant 0 : i32
    %c0_i32_0 = arith.constant 0 : i32
    %c0_i32_1 = arith.constant 0 : i32
    return %arg0, %c0_i32, %c0_i32_0 : i32, i32, i32
  }
  func.func @transform_1(%arg0: i32) -> (i32, i32, i32) {
    %c0_i32 = arith.constant 0 : i32
    %c0_i32_0 = arith.constant 0 : i32
    %c0_i32_1 = arith.constant 0 : i32
    return %arg0, %c0_i32, %c0_i32_0 : i32, i32, i32
  }
  func.func @transform_2(%arg0: i32) -> (i32, i32, i32) {
    %c0_i32 = arith.constant 0 : i32
    %c0_i32_0 = arith.constant 0 : i32
    %c0_i32_1 = arith.constant 0 : i32
    return %arg0, %c0_i32, %c0_i32_0 : i32, i32, i32
  }
  func.func @transform_3(%arg0: i32) -> (i32, i32, i32) {
    %c0_i32 = arith.constant 0 : i32
    %c0_i32_0 = arith.constant 0 : i32
    %c0_i32_1 = arith.constant 0 : i32
    return %arg0, %c0_i32, %c0_i32_0 : i32, i32, i32
  }
  func.func @transform_4(%arg0: i32) -> (i32, i32, i32) {
    %c0_i32 = arith.constant 0 : i32
    %c0_i32_0 = arith.constant 0 : i32
    %c0_i32_1 = arith.constant 0 : i32
    return %arg0, %c0_i32, %c0_i32_0 : i32, i32, i32
  }
  func.func @transform_5(%arg0: i32) -> (i32, i32, i32) {
    %c0_i32 = arith.constant 0 : i32
    %c0_i32_0 = arith.constant 0 : i32
    %c0_i32_1 = arith.constant 0 : i32
    return %arg0, %c0_i32, %c0_i32_0 : i32, i32, i32
  }
}

module attributes {stable_mosaic.version = 11 : i64} {
  func.func @_attn_kernel(%arg0: i32, %arg1: memref<1x5x32xbf16, #tpu.memory_space<vmem>>, %arg2: memref<1x5x32xbf16, #tpu.memory_space<vmem>>, %arg3: memref<1x5x32xbf16, #tpu.memory_space<vmem>>, %arg4: memref<1x5x32xf32, #tpu.memory_space<vmem>>, %arg5: memref<1x1x5xf32, #tpu.memory_space<vmem>>) attributes {dimension_semantics = [#tpu.dimension_semantics<parallel>], iteration_bounds = array<i64: 2>, scalar_prefetch = 0 : i64, scratch_operands = 0 : i64, tpu.core_type = #tpu.core_type<tc>, window_params = [{transform_indices = @transform_0, window_bounds = array<i64: 1, 5, 32>}, {transform_indices = @transform_1, window_bounds = array<i64: 1, 5, 32>}, {transform_indices = @transform_2, window_bounds = array<i64: 1, 5, 32>}, {transform_indices = @transform_3, window_bounds = array<i64: 1, 5, 32>}, {transform_indices = @transform_4, window_bounds = array<i64: 1, 1, 5>}]} {
    %c0 = arith.constant 0 : index
    %c0_0 = arith.constant 0 : index
    %c0_1 = arith.constant 0 : index
    %0 = vector.load %arg1[%c0, %c0_0, %c0_1] : memref<1x5x32xbf16, #tpu.memory_space<vmem>>, vector<1x5x32xbf16>
    %1 = vector.shape_cast %0 : vector<1x5x32xbf16> to vector<5x32xbf16>
    %c0_2 = arith.constant 0 : index
    %c0_3 = arith.constant 0 : index
    %c0_4 = arith.constant 0 : index
    %2 = vector.load %arg2[%c0_2, %c0_3, %c0_4] : memref<1x5x32xbf16, #tpu.memory_space<vmem>>, vector<1x5x32xbf16>
    %3 = vector.shape_cast %2 : vector<1x5x32xbf16> to vector<5x32xbf16>
    %c0_5 = arith.constant 0 : index
    %c0_6 = arith.constant 0 : index
    %c0_7 = arith.constant 0 : index
    %4 = vector.load %arg3[%c0_5, %c0_6, %c0_7] : memref<1x5x32xbf16, #tpu.memory_space<vmem>>, vector<1x5x32xbf16>
    %5 = vector.shape_cast %4 : vector<1x5x32xbf16> to vector<5x32xbf16>
    %6 = vector.extract_strided_slice %1 {offsets = [0, 0], sizes = [5, 8], strides = [1, 1]} : vector<5x32xbf16> to vector<5x8xbf16>
    %7 = vector.extract_strided_slice %3 {offsets = [0, 0], sizes = [5, 8], strides = [1, 1]} : vector<5x32xbf16> to vector<5x8xbf16>
    %cst = arith.constant dense<0.000000e+00> : vector<5x5xf32>
    %8 = tpu.matmul %6, %7, %cst {dimension_numbers = #tpu.dot_dimension_numbers<[1], [1], [0], [0], [0, 0, 1, 0], [], []>} : vector<5x8xbf16>, vector<5x8xbf16>, vector<5x5xf32> -> vector<5x5xf32>
    %cst_8 = arith.constant dense<0xFF800000> : vector<5xf32>
    %9 = vector.multi_reduction <maximumf>, %8, %cst_8 [1] : vector<5x5xf32> to vector<5xf32>
    %10 = vector.shape_cast %9 : vector<5xf32> to vector<5x1xf32>
    %11 = vector.broadcast %10 : vector<5x1xf32> to vector<5x5xf32>
    %12 = arith.subf %8, %11 : vector<5x5xf32>
    %13 = math.exp %12 : vector<5x5xf32>
    %cst_9 = arith.constant dense<0.000000e+00> : vector<5xf32>
    %14 = vector.multi_reduction <add>, %13, %cst_9 [1] : vector<5x5xf32> to vector<5xf32>
    %15 = vector.shape_cast %14 : vector<5xf32> to vector<5x1xf32>
    %16 = tpu.reciprocal %15 {approx = true} : vector<5x1xf32> -> vector<5x1xf32>
    %17 = vector.broadcast %16 : vector<5x1xf32> to vector<5x5xf32>
    %18 = arith.mulf %13, %17 : vector<5x5xf32>
    %19 = arith.truncf %18 : vector<5x5xf32> to vector<5x5xbf16>
    %20 = vector.extract_strided_slice %5 {offsets = [0, 0], sizes = [5, 8], strides = [1, 1]} : vector<5x32xbf16> to vector<5x8xbf16>
    %cst_10 = arith.constant dense<0.000000e+00> : vector<5x8xf32>
    %21 = tpu.matmul %19, %20, %cst_10 {dimension_numbers = #tpu.dot_dimension_numbers<[1], [0], [0], [1], [0, 0, 1, 1], [], []>} : vector<5x5xbf16>, vector<5x8xbf16>, vector<5x8xf32> -> vector<5x8xf32>
    %c0_11 = arith.constant 0 : index
    %c0_12 = arith.constant 0 : index
    %c0_13 = arith.constant 0 : index
    %22 = vector.load %arg4[%c0_11, %c0_12, %c0_13] : memref<1x5x32xf32, #tpu.memory_space<vmem>>, vector<1x5x8xf32>
    %23 = vector.shape_cast %22 : vector<1x5x8xf32> to vector<5x8xf32>
    %24 = vector.shape_cast %21 : vector<5x8xf32> to vector<1x5x8xf32>
    tpu.vector_store %arg4[%c0_11, %c0_12, %c0_13], %24 {strides = array<i32>} : memref<1x5x32xf32, #tpu.memory_space<vmem>>, vector<1x5x8xf32>,
    %25 = vector.extract_strided_slice %18 {offsets = [0, 0], sizes = [1, 5], strides = [1, 1]} : vector<5x5xf32> to vector<1x5xf32>
    %26 = vector.extract_strided_slice %1 {offsets = [0, 8], sizes = [5, 8], strides = [1, 1]} : vector<5x32xbf16> to vector<5x8xbf16>
    %27 = vector.extract_strided_slice %3 {offsets = [0, 8], sizes = [5, 8], strides = [1, 1]} : vector<5x32xbf16> to vector<5x8xbf16>
    %cst_14 = arith.constant dense<0.000000e+00> : vector<5x5xf32>
    %28 = tpu.matmul %26, %27, %cst_14 {dimension_numbers = #tpu.dot_dimension_numbers<[1], [1], [0], [0], [0, 0, 1, 0], [], []>} : vector<5x8xbf16>, vector<5x8xbf16>, vector<5x5xf32> -> vector<5x5xf32>
    %cst_15 = arith.constant dense<0xFF800000> : vector<5xf32>
    %29 = vector.multi_reduction <maximumf>, %28, %cst_15 [1] : vector<5x5xf32> to vector<5xf32>
    %30 = vector.shape_cast %29 : vector<5xf32> to vector<5x1xf32>
    %31 = vector.broadcast %30 : vector<5x1xf32> to vector<5x5xf32>
    %32 = arith.subf %28, %31 : vector<5x5xf32>
    %33 = math.exp %32 : vector<5x5xf32>
    %cst_16 = arith.constant dense<0.000000e+00> : vector<5xf32>
    %34 = vector.multi_reduction <add>, %33, %cst_16 [1] : vector<5x5xf32> to vector<5xf32>
    %35 = vector.shape_cast %34 : vector<5xf32> to vector<5x1xf32>
    %36 = tpu.reciprocal %35 {approx = true} : vector<5x1xf32> -> vector<5x1xf32>
    %37 = vector.broadcast %36 : vector<5x1xf32> to vector<5x5xf32>
    %38 = arith.mulf %33, %37 : vector<5x5xf32>
    %39 = arith.truncf %38 : vector<5x5xf32> to vector<5x5xbf16>
    %40 = vector.extract_strided_slice %5 {offsets = [0, 8], sizes = [5, 8], strides = [1, 1]} : vector<5x32xbf16> to vector<5x8xbf16>
    %cst_17 = arith.constant dense<0.000000e+00> : vector<5x8xf32>
    %41 = tpu.matmul %39, %40, %cst_17 {dimension_numbers = #tpu.dot_dimension_numbers<[1], [0], [0], [1], [0, 0, 1, 1], [], []>} : vector<5x5xbf16>, vector<5x8xbf16>, vector<5x8xf32> -> vector<5x8xf32>
    %c0_18 = arith.constant 0 : index
    %c0_19 = arith.constant 0 : index
    %c8 = arith.constant 8 : index
    %42 = vector.load %arg4[%c0_18, %c0_19, %c8] : memref<1x5x32xf32, #tpu.memory_space<vmem>>, vector<1x5x8xf32>
    %43 = vector.shape_cast %42 : vector<1x5x8xf32> to vector<5x8xf32>
    %44 = vector.shape_cast %41 : vector<5x8xf32> to vector<1x5x8xf32>
    tpu.vector_store %arg4[%c0_18, %c0_19, %c8], %44 {strides = array<i32>} : memref<1x5x32xf32, #tpu.memory_space<vmem>>, vector<1x5x8xf32>,
    %45 = vector.extract_strided_slice %38 {offsets = [0, 0], sizes = [1, 5], strides = [1, 1]} : vector<5x5xf32> to vector<1x5xf32>
    %46 = arith.addf %25, %45 : vector<1x5xf32>
    %47 = vector.extract_strided_slice %1 {offsets = [0, 16], sizes = [5, 8], strides = [1, 1]} : vector<5x32xbf16> to vector<5x8xbf16>
    %48 = vector.extract_strided_slice %3 {offsets = [0, 16], sizes = [5, 8], strides = [1, 1]} : vector<5x32xbf16> to vector<5x8xbf16>
    %cst_20 = arith.constant dense<0.000000e+00> : vector<5x5xf32>
    %49 = tpu.matmul %47, %48, %cst_20 {dimension_numbers = #tpu.dot_dimension_numbers<[1], [1], [0], [0], [0, 0, 1, 0], [], []>} : vector<5x8xbf16>, vector<5x8xbf16>, vector<5x5xf32> -> vector<5x5xf32>
    %cst_21 = arith.constant dense<0xFF800000> : vector<5xf32>
    %50 = vector.multi_reduction <maximumf>, %49, %cst_21 [1] : vector<5x5xf32> to vector<5xf32>
    %51 = vector.shape_cast %50 : vector<5xf32> to vector<5x1xf32>
    %52 = vector.broadcast %51 : vector<5x1xf32> to vector<5x5xf32>
    %53 = arith.subf %49, %52 : vector<5x5xf32>
    %54 = math.exp %53 : vector<5x5xf32>
    %cst_22 = arith.constant dense<0.000000e+00> : vector<5xf32>
    %55 = vector.multi_reduction <add>, %54, %cst_22 [1] : vector<5x5xf32> to vector<5xf32>
    %56 = vector.shape_cast %55 : vector<5xf32> to vector<5x1xf32>
    %57 = tpu.reciprocal %56 {approx = true} : vector<5x1xf32> -> vector<5x1xf32>
    %58 = vector.broadcast %57 : vector<5x1xf32> to vector<5x5xf32>
    %59 = arith.mulf %54, %58 : vector<5x5xf32>
    %60 = arith.truncf %59 : vector<5x5xf32> to vector<5x5xbf16>
    %61 = vector.extract_strided_slice %5 {offsets = [0, 16], sizes = [5, 8], strides = [1, 1]} : vector<5x32xbf16> to vector<5x8xbf16>
    %cst_23 = arith.constant dense<0.000000e+00> : vector<5x8xf32>
    %62 = tpu.matmul %60, %61, %cst_23 {dimension_numbers = #tpu.dot_dimension_numbers<[1], [0], [0], [1], [0, 0, 1, 1], [], []>} : vector<5x5xbf16>, vector<5x8xbf16>, vector<5x8xf32> -> vector<5x8xf32>
    %c0_24 = arith.constant 0 : index
    %c0_25 = arith.constant 0 : index
    %c16 = arith.constant 16 : index
    %63 = vector.load %arg4[%c0_24, %c0_25, %c16] : memref<1x5x32xf32, #tpu.memory_space<vmem>>, vector<1x5x8xf32>
    %64 = vector.shape_cast %63 : vector<1x5x8xf32> to vector<5x8xf32>
    %65 = vector.shape_cast %62 : vector<5x8xf32> to vector<1x5x8xf32>
    tpu.vector_store %arg4[%c0_24, %c0_25, %c16], %65 {strides = array<i32>} : memref<1x5x32xf32, #tpu.memory_space<vmem>>, vector<1x5x8xf32>,
    %66 = vector.extract_strided_slice %59 {offsets = [0, 0], sizes = [1, 5], strides = [1, 1]} : vector<5x5xf32> to vector<1x5xf32>
    %67 = arith.addf %46, %66 : vector<1x5xf32>
    %68 = vector.extract_strided_slice %1 {offsets = [0, 24], sizes = [5, 8], strides = [1, 1]} : vector<5x32xbf16> to vector<5x8xbf16>
    %69 = vector.extract_strided_slice %3 {offsets = [0, 24], sizes = [5, 8], strides = [1, 1]} : vector<5x32xbf16> to vector<5x8xbf16>
    %cst_26 = arith.constant dense<0.000000e+00> : vector<5x5xf32>
    %70 = tpu.matmul %68, %69, %cst_26 {dimension_numbers = #tpu.dot_dimension_numbers<[1], [1], [0], [0], [0, 0, 1, 0], [], []>} : vector<5x8xbf16>, vector<5x8xbf16>, vector<5x5xf32> -> vector<5x5xf32>
    %cst_27 = arith.constant dense<0xFF800000> : vector<5xf32>
    %71 = vector.multi_reduction <maximumf>, %70, %cst_27 [1] : vector<5x5xf32> to vector<5xf32>
    %72 = vector.shape_cast %71 : vector<5xf32> to vector<5x1xf32>
    %73 = vector.broadcast %72 : vector<5x1xf32> to vector<5x5xf32>
    %74 = arith.subf %70, %73 : vector<5x5xf32>
    %75 = math.exp %74 : vector<5x5xf32>
    %cst_28 = arith.constant dense<0.000000e+00> : vector<5xf32>
    %76 = vector.multi_reduction <add>, %75, %cst_28 [1] : vector<5x5xf32> to vector<5xf32>
    %77 = vector.shape_cast %76 : vector<5xf32> to vector<5x1xf32>
    %78 = tpu.reciprocal %77 {approx = true} : vector<5x1xf32> -> vector<5x1xf32>
    %79 = vector.broadcast %78 : vector<5x1xf32> to vector<5x5xf32>
    %80 = arith.mulf %75, %79 : vector<5x5xf32>
    %81 = arith.truncf %80 : vector<5x5xf32> to vector<5x5xbf16>
    %82 = vector.extract_strided_slice %5 {offsets = [0, 24], sizes = [5, 8], strides = [1, 1]} : vector<5x32xbf16> to vector<5x8xbf16>
    %cst_29 = arith.constant dense<0.000000e+00> : vector<5x8xf32>
    %83 = tpu.matmul %81, %82, %cst_29 {dimension_numbers = #tpu.dot_dimension_numbers<[1], [0], [0], [1], [0, 0, 1, 1], [], []>} : vector<5x5xbf16>, vector<5x8xbf16>, vector<5x8xf32> -> vector<5x8xf32>
    %c0_30 = arith.constant 0 : index
    %c0_31 = arith.constant 0 : index
    %c24 = arith.constant 24 : index
    %84 = vector.load %arg4[%c0_30, %c0_31, %c24] : memref<1x5x32xf32, #tpu.memory_space<vmem>>, vector<1x5x8xf32>
    %85 = vector.shape_cast %84 : vector<1x5x8xf32> to vector<5x8xf32>
    %86 = vector.shape_cast %83 : vector<5x8xf32> to vector<1x5x8xf32>
    tpu.vector_store %arg4[%c0_30, %c0_31, %c24], %86 {strides = array<i32>} : memref<1x5x32xf32, #tpu.memory_space<vmem>>, vector<1x5x8xf32>,
    %87 = vector.extract_strided_slice %80 {offsets = [0, 0], sizes = [1, 5], strides = [1, 1]} : vector<5x5xf32> to vector<1x5xf32>
    %88 = arith.addf %67, %87 : vector<1x5xf32>
    %cst_32 = arith.constant 2.500000e-01 : f32
    %89 = vector.broadcast %cst_32 : f32 to vector<1x5xf32>
    %90 = arith.mulf %88, %89 : vector<1x5xf32>
    %c0_33 = arith.constant 0 : index
    %c0_34 = arith.constant 0 : index
    %c0_35 = arith.constant 0 : index
    %91 = vector.load %arg5[%c0_33, %c0_34, %c0_35] : memref<1x1x5xf32, #tpu.memory_space<vmem>>, vector<1x1x5xf32>
    %92 = vector.shape_cast %91 : vector<1x1x5xf32> to vector<1x5xf32>
    %93 = vector.shape_cast %90 : vector<1x5xf32> to vector<1x1x5xf32>
    tpu.vector_store %arg5[%c0_33, %c0_34, %c0_35], %93 {strides = array<i32>} : memref<1x1x5xf32, #tpu.memory_space<vmem>>, vector<1x1x5xf32>,
    return
  }
  func.func @transform_0(%arg0: i32) -> (i32, i32, i32) {
    %c0_i32 = arith.constant 0 : i32
    %c0_i32_0 = arith.constant 0 : i32
    %c0_i32_1 = arith.constant 0 : i32
    return %arg0, %c0_i32, %c0_i32_0 : i32, i32, i32
  }
  func.func @transform_1(%arg0: i32) -> (i32, i32, i32) {
    %c0_i32 = arith.constant 0 : i32
    %c0_i32_0 = arith.constant 0 : i32
    %c0_i32_1 = arith.constant 0 : i32
    return %arg0, %c0_i32, %c0_i32_0 : i32, i32, i32
  }
  func.func @transform_2(%arg0: i32) -> (i32, i32, i32) {
    %c0_i32 = arith.constant 0 : i32
    %c0_i32_0 = arith.constant 0 : i32
    %c0_i32_1 = arith.constant 0 : i32
    return %arg0, %c0_i32, %c0_i32_0 : i32, i32, i32
  }
  func.func @transform_3(%arg0: i32) -> (i32, i32, i32) {
    %c0_i32 = arith.constant 0 : i32
    %c0_i32_0 = arith.constant 0 : i32
    %c0_i32_1 = arith.constant 0 : i32
    return %arg0, %c0_i32, %c0_i32_0 : i32, i32, i32
  }
  func.func @transform_4(%arg0: i32) -> (i32, i32, i32) {
    %c0_i32 = arith.constant 0 : i32
    %c0_i32_0 = arith.constant 0 : i32
    %c0_i32_1 = arith.constant 0 : i32
    return %arg0, %c0_i32, %c0_i32_0 : i32, i32, i32
  }
}

module attributes {stable_mosaic.version = 11 : i64} {
  func.func @_ln_qkv_kernel(%arg0: i32, %arg1: memref<4x32xf32, #tpu.memory_space<vmem>>, %arg2: memref<1x32xf32, #tpu.memory_space<vmem>>, %arg3: memref<1x32xf32, #tpu.memory_space<vmem>>, %arg4: memref<32x96xbf16, #tpu.memory_space<vmem>>, %arg5: memref<1x96xf32, #tpu.memory_space<vmem>>, %arg6: memref<4x32xbf16, #tpu.memory_space<vmem>>, %arg7: memref<4x32xbf16, #tpu.memory_space<vmem>>, %arg8: memref<4x32xbf16, #tpu.memory_space<vmem>>) attributes {dimension_semantics = [#tpu.dimension_semantics<parallel>], iteration_bounds = array<i64: 1>, scalar_prefetch = 0 : i64, scratch_operands = 0 : i64, tpu.core_type = #tpu.core_type<tc>, window_params = [{transform_indices = @transform_0, window_bounds = array<i64: 4, 32>}, {pipeline_mode = #tpu.pipeline_mode<synchronous>, transform_indices = @transform_1, window_bounds = array<i64: 1, 32>}, {pipeline_mode = #tpu.pipeline_mode<synchronous>, transform_indices = @transform_2, window_bounds = array<i64: 1, 32>}, {pipeline_mode = #tpu.pipeline_mode<synchronous>, transform_indices = @transform_3, window_bounds = array<i64: 32, 96>}, {pipeline_mode = #tpu.pipeline_mode<synchronous>, transform_indices = @transform_4, window_bounds = array<i64: 1, 96>}, {transform_indices = @transform_5, window_bounds = array<i64: 4, 32>}, {transform_indices = @transform_6, window_bounds = array<i64: 4, 32>}, {transform_indices = @transform_7, window_bounds = array<i64: 4, 32>}]} {
    %c0 = arith.constant 0 : index
    %c0_0 = arith.constant 0 : index
    %0 = vector.load %arg1[%c0, %c0_0] : memref<4x32xf32, #tpu.memory_space<vmem>>, vector<4x32xf32>
    %cst = arith.constant dense<0.000000e+00> : vector<4xf32>
    %1 = vector.multi_reduction <add>, %0, %cst [1] : vector<4x32xf32> to vector<4xf32>
    %2 = vector.shape_cast %1 : vector<4xf32> to vector<4x1xf32>
    %cst_1 = arith.constant 3.200000e+01 : f32
    %3 = vector.broadcast %cst_1 : f32 to vector<4x1xf32>
    %4 = arith.divf %2, %3 : vector<4x1xf32>
    %5 = vector.broadcast %4 : vector<4x1xf32> to vector<4x32xf32>
    %6 = arith.subf %0, %5 : vector<4x32xf32>
    %7 = arith.mulf %6, %6 : vector<4x32xf32>
    %cst_2 = arith.constant dense<0.000000e+00> : vector<4xf32>
    %8 = vector.multi_reduction <add>, %7, %cst_2 [1] : vector<4x32xf32> to vector<4xf32>
    %9 = vector.shape_cast %8 : vector<4xf32> to vector<4x1xf32>
    %cst_3 = arith.constant 3.200000e+01 : f32
    %10 = vector.broadcast %cst_3 : f32 to vector<4x1xf32>
    %11 = arith.divf %9, %10 : vector<4x1xf32>
    %12 = vector.broadcast %4 : vector<4x1xf32> to vector<4x32xf32>
    %13 = arith.subf %0, %12 : vector<4x32xf32>
    %cst_4 = arith.constant 9.99999974E-6 : f32
    %14 = vector.broadcast %cst_4 : f32 to vector<4x1xf32>
    %15 = arith.addf %11, %14 : vector<4x1xf32>
    %16 = math.rsqrt %15 : vector<4x1xf32>
    %17 = vector.broadcast %16 : vector<4x1xf32> to vector<4x32xf32>
    %18 = arith.mulf %13, %17 : vector<4x32xf32>
    %c0_5 = arith.constant 0 : index
    %c0_6 = arith.constant 0 : index
    %19 = vector.load %arg2[%c0_5, %c0_6] : memref<1x32xf32, #tpu.memory_space<vmem>>, vector<1x32xf32>
    %20 = vector.broadcast %19 : vector<1x32xf32> to vector<4x32xf32>
    %21 = arith.mulf %18, %20 : vector<4x32xf32>
    %c0_7 = arith.constant 0 : index
    %c0_8 = arith.constant 0 : index
    %22 = vector.load %arg3[%c0_7, %c0_8] : memref<1x32xf32, #tpu.memory_space<vmem>>, vector<1x32xf32>
    %23 = vector.broadcast %22 : vector<1x32xf32> to vector<4x32xf32>
    %24 = arith.addf %21, %23 : vector<4x32xf32>
    %25 = arith.truncf %24 : vector<4x32xf32> to vector<4x32xbf16>
    %c0_9 = arith.constant 0 : index
    %c0_10 = arith.constant 0 : index
    %26 = vector.load %arg4[%c0_9, %c0_10] : memref<32x96xbf16, #tpu.memory_space<vmem>>, vector<32x96xbf16>
    %cst_11 = arith.constant dense<0.000000e+00> : vector<4x96xf32>
    %27 = tpu.matmul %25, %26, %cst_11 {dimension_numbers = #tpu.dot_dimension_numbers<[1], [0], [0], [1], [0, 0, 1, 1], [], []>} : vector<4x32xbf16>, vector<32x96xbf16>, vector<4x96xf32> -> vector<4x96xf32>
    %c0_12 = arith.constant 0 : index
    %c0_13 = arith.constant 0 : index
    %28 = vector.load %arg5[%c0_12, %c0_13] : memref<1x96xf32, #tpu.memory_space<vmem>>, vector<1x96xf32>
    %29 = vector.broadcast %28 : vector<1x96xf32> to vector<4x96xf32>
    %30 = arith.addf %27, %29 : vector<4x96xf32>
    %31 = vector.extract_strided_slice %30 {offsets = [0, 0], sizes = [4, 32], strides = [1, 1]} : vector<4x96xf32> to vector<4x32xf32>
    %cst_14 = arith.constant 0.353553385 : f32
    %32 = vector.broadcast %cst_14 : f32 to vector<4x32xf32>
    %33 = arith.mulf %31, %32 : vector<4x32xf32>
    %34 = arith.truncf %33 : vector<4x32xf32> to vector<4x32xbf16>
    %c0_15 = arith.constant 0 : index
    %c0_16 = arith.constant 0 : index
    %35 = vector.load %arg6[%c0_15, %c0_16] : memref<4x32xbf16, #tpu.memory_space<vmem>>, vector<4x32xbf16>
    tpu.vector_store %arg6[%c0_15, %c0_16], %34 {strides = array<i32>} : memref<4x32xbf16, #tpu.memory_space<vmem>>, vector<4x32xbf16>,
    %36 = vector.extract_strided_slice %30 {offsets = [0, 32], sizes = [4, 32], strides = [1, 1]} : vector<4x96xf32> to vector<4x32xf32>
    %37 = arith.truncf %36 : vector<4x32xf32> to vector<4x32xbf16>
    %c0_17 = arith.constant 0 : index
    %c0_18 = arith.constant 0 : index
    %38 = vector.load %arg7[%c0_17, %c0_18] : memref<4x32xbf16, #tpu.memory_space<vmem>>, vector<4x32xbf16>
    tpu.vector_store %arg7[%c0_17, %c0_18], %37 {strides = array<i32>} : memref<4x32xbf16, #tpu.memory_space<vmem>>, vector<4x32xbf16>,
    %39 = vector.extract_strided_slice %30 {offsets = [0, 64], sizes = [4, 32], strides = [1, 1]} : vector<4x96xf32> to vector<4x32xf32>
    %40 = arith.truncf %39 : vector<4x32xf32> to vector<4x32xbf16>
    %c0_19 = arith.constant 0 : index
    %c0_20 = arith.constant 0 : index
    %41 = vector.load %arg8[%c0_19, %c0_20] : memref<4x32xbf16, #tpu.memory_space<vmem>>, vector<4x32xbf16>
    tpu.vector_store %arg8[%c0_19, %c0_20], %40 {strides = array<i32>} : memref<4x32xbf16, #tpu.memory_space<vmem>>, vector<4x32xbf16>,
    return
  }
  func.func @transform_0(%arg0: i32) -> (i32, i32) {
    %c0_i32 = arith.constant 0 : i32
    %c0_i32_0 = arith.constant 0 : i32
    return %arg0, %c0_i32 : i32, i32
  }
  func.func @transform_1(%arg0: i32) -> (i32, i32) {
    %c0_i32 = arith.constant 0 : i32
    %c0_i32_0 = arith.constant 0 : i32
    %c0_i32_1 = arith.constant 0 : i32
    return %c0_i32, %c0_i32_0 : i32, i32
  }
  func.func @transform_2(%arg0: i32) -> (i32, i32) {
    %c0_i32 = arith.constant 0 : i32
    %c0_i32_0 = arith.constant 0 : i32
    %c0_i32_1 = arith.constant 0 : i32
    return %c0_i32, %c0_i32_0 : i32, i32
  }
  func.func @transform_3(%arg0: i32) -> (i32, i32) {
    %c0_i32 = arith.constant 0 : i32
    %c0_i32_0 = arith.constant 0 : i32
    %c0_i32_1 = arith.constant 0 : i32
    return %c0_i32, %c0_i32_0 : i32, i32
  }
  func.func @transform_4(%arg0: i32) -> (i32, i32) {
    %c0_i32 = arith.constant 0 : i32
    %c0_i32_0 = arith.constant 0 : i32
    %c0_i32_1 = arith.constant 0 : i32
    return %c0_i32, %c0_i32_0 : i32, i32
  }
  func.func @transform_5(%arg0: i32) -> (i32, i32) {
    %c0_i32 = arith.constant 0 : i32
    %c0_i32_0 = arith.constant 0 : i32
    return %arg0, %c0_i32 : i32, i32
  }
  func.func @transform_6(%arg0: i32) -> (i32, i32) {
    %c0_i32 = arith.constant 0 : i32
    %c0_i32_0 = arith.constant 0 : i32
    return %arg0, %c0_i32 : i32, i32
  }
  func.func @transform_7(%arg0: i32) -> (i32, i32) {
    %c0_i32 = arith.constant 0 : i32
    %c0_i32_0 = arith.constant 0 : i32
    return %arg0, %c0_i32 : i32, i32
  }
}

module attributes {stable_mosaic.version = 11 : i64} {
  func.func @_attn_kernel(%arg0: i32, %arg1: memref<1x2x32xbf16, #tpu.memory_space<vmem>>, %arg2: memref<1x5x32xbf16, #tpu.memory_space<vmem>>, %arg3: memref<1x5x32xbf16, #tpu.memory_space<vmem>>, %arg4: memref<1x2x32xf32, #tpu.memory_space<vmem>>, %arg5: memref<1x1x5xf32, #tpu.memory_space<vmem>>) attributes {dimension_semantics = [#tpu.dimension_semantics<parallel>], iteration_bounds = array<i64: 2>, scalar_prefetch = 0 : i64, scratch_operands = 0 : i64, tpu.core_type = #tpu.core_type<tc>, window_params = [{transform_indices = @transform_0, window_bounds = array<i64: 1, 2, 32>}, {transform_indices = @transform_1, window_bounds = array<i64: 1, 5, 32>}, {transform_indices = @transform_2, window_bounds = array<i64: 1, 5, 32>}, {transform_indices = @transform_3, window_bounds = array<i64: 1, 2, 32>}, {transform_indices = @transform_4, window_bounds = array<i64: 1, 1, 5>}]} {
    %c0 = arith.constant 0 : index
    %c0_0 = arith.constant 0 : index
    %c0_1 = arith.constant 0 : index
    %0 = vector.load %arg1[%c0, %c0_0, %c0_1] : memref<1x2x32xbf16, #tpu.memory_space<vmem>>, vector<1x2x32xbf16>
    %1 = vector.shape_cast %0 : vector<1x2x32xbf16> to vector<2x32xbf16>
    %c0_2 = arith.constant 0 : index
    %c0_3 = arith.constant 0 : index
    %c0_4 = arith.constant 0 : index
    %2 = vector.load %arg2[%c0_2, %c0_3, %c0_4] : memref<1x5x32xbf16, #tpu.memory_space<vmem>>, vector<1x5x32xbf16>
    %3 = vector.shape_cast %2 : vector<1x5x32xbf16> to vector<5x32xbf16>
    %c0_5 = arith.constant 0 : index
    %c0_6 = arith.constant 0 : index
    %c0_7 = arith.constant 0 : index
    %4 = vector.load %arg3[%c0_5, %c0_6, %c0_7] : memref<1x5x32xbf16, #tpu.memory_space<vmem>>, vector<1x5x32xbf16>
    %5 = vector.shape_cast %4 : vector<1x5x32xbf16> to vector<5x32xbf16>
    %6 = vector.extract_strided_slice %1 {offsets = [0, 0], sizes = [2, 8], strides = [1, 1]} : vector<2x32xbf16> to vector<2x8xbf16>
    %7 = vector.extract_strided_slice %3 {offsets = [0, 0], sizes = [5, 8], strides = [1, 1]} : vector<5x32xbf16> to vector<5x8xbf16>
    %cst = arith.constant dense<0.000000e+00> : vector<2x5xf32>
    %8 = tpu.matmul %6, %7, %cst {dimension_numbers = #tpu.dot_dimension_numbers<[1], [1], [0], [0], [0, 0, 1, 0], [], []>} : vector<2x8xbf16>, vector<5x8xbf16>, vector<2x5xf32> -> vector<2x5xf32>
    %cst_8 = arith.constant dense<0xFF800000> : vector<2xf32>
    %9 = vector.multi_reduction <maximumf>, %8, %cst_8 [1] : vector<2x5xf32> to vector<2xf32>
    %10 = vector.shape_cast %9 : vector<2xf32> to vector<2x1xf32>
    %11 = vector.broadcast %10 : vector<2x1xf32> to vector<2x5xf32>
    %12 = arith.subf %8, %11 : vector<2x5xf32>
    %13 = math.exp %12 : vector<2x5xf32>
    %cst_9 = arith.constant dense<0.000000e+00> : vector<2xf32>
    %14 = vector.multi_reduction <add>, %13, %cst_9 [1] : vector<2x5xf32> to vector<2xf32>
    %15 = vector.shape_cast %14 : vector<2xf32> to vector<2x1xf32>
    %16 = tpu.reciprocal %15 {approx = true} : vector<2x1xf32> -> vector<2x1xf32>
    %17 = vector.broadcast %16 : vector<2x1xf32> to vector<2x5xf32>
    %18 = arith.mulf %13, %17 : vector<2x5xf32>
    %19 = arith.truncf %18 : vector<2x5xf32> to vector<2x5xbf16>
    %20 = vector.extract_strided_slice %5 {offsets = [0, 0], sizes = [5, 8], strides = [1, 1]} : vector<5x32xbf16> to vector<5x8xbf16>
    %cst_10 = arith.constant dense<0.000000e+00> : vector<2x8xf32>
    %21 = tpu.matmul %19, %20, %cst_10 {dimension_numbers = #tpu.dot_dimension_numbers<[1], [0], [0], [1], [0, 0, 1, 1], [], []>} : vector<2x5xbf16>, vector<5x8xbf16>, vector<2x8xf32> -> vector<2x8xf32>
    %c0_11 = arith.constant 0 : index
    %c0_12 = arith.constant 0 : index
    %c0_13 = arith.constant 0 : index
    %22 = vector.load %arg4[%c0_11, %c0_12, %c0_13] : memref<1x2x32xf32, #tpu.memory_space<vmem>>, vector<1x2x8xf32>
    %23 = vector.shape_cast %22 : vector<1x2x8xf32> to vector<2x8xf32>
    %24 = vector.shape_cast %21 : vector<2x8xf32> to vector<1x2x8xf32>
    tpu.vector_store %arg4[%c0_11, %c0_12, %c0_13], %24 {strides = array<i32>} : memref<1x2x32xf32, #tpu.memory_space<vmem>>, vector<1x2x8xf32>,
    %25 = vector.extract_strided_slice %18 {offsets = [0, 0], sizes = [1, 5], strides = [1, 1]} : vector<2x5xf32> to vector<1x5xf32>
    %26 = vector.extract_strided_slice %1 {offsets = [0, 8], sizes = [2, 8], strides = [1, 1]} : vector<2x32xbf16> to vector<2x8xbf16>
    %27 = vector.extract_strided_slice %3 {offsets = [0, 8], sizes = [5, 8], strides = [1, 1]} : vector<5x32xbf16> to vector<5x8xbf16>
    %cst_14 = arith.constant dense<0.000000e+00> : vector<2x5xf32>
    %28 = tpu.matmul %26, %27, %cst_14 {dimension_numbers = #tpu.dot_dimension_numbers<[1], [1], [0], [0], [0, 0, 1, 0], [], []>} : vector<2x8xbf16>, vector<5x8xbf16>, vector<2x5xf32> -> vector<2x5xf32>
    %cst_15 = arith.constant dense<0xFF800000> : vector<2xf32>
    %29 = vector.multi_reduction <maximumf>, %28, %cst_15 [1] : vector<2x5xf32> to vector<2xf32>
    %30 = vector.shape_cast %29 : vector<2xf32> to vector<2x1xf32>
    %31 = vector.broadcast %30 : vector<2x1xf32> to vector<2x5xf32>
    %32 = arith.subf %28, %31 : vector<2x5xf32>
    %33 = math.exp %32 : vector<2x5xf32>
    %cst_16 = arith.constant dense<0.000000e+00> : vector<2xf32>
    %34 = vector.multi_reduction <add>, %33, %cst_16 [1] : vector<2x5xf32> to vector<2xf32>
    %35 = vector.shape_cast %34 : vector<2xf32> to vector<2x1xf32>
    %36 = tpu.reciprocal %35 {approx = true} : vector<2x1xf32> -> vector<2x1xf32>
    %37 = vector.broadcast %36 : vector<2x1xf32> to vector<2x5xf32>
    %38 = arith.mulf %33, %37 : vector<2x5xf32>
    %39 = arith.truncf %38 : vector<2x5xf32> to vector<2x5xbf16>
    %40 = vector.extract_strided_slice %5 {offsets = [0, 8], sizes = [5, 8], strides = [1, 1]} : vector<5x32xbf16> to vector<5x8xbf16>
    %cst_17 = arith.constant dense<0.000000e+00> : vector<2x8xf32>
    %41 = tpu.matmul %39, %40, %cst_17 {dimension_numbers = #tpu.dot_dimension_numbers<[1], [0], [0], [1], [0, 0, 1, 1], [], []>} : vector<2x5xbf16>, vector<5x8xbf16>, vector<2x8xf32> -> vector<2x8xf32>
    %c0_18 = arith.constant 0 : index
    %c0_19 = arith.constant 0 : index
    %c8 = arith.constant 8 : index
    %42 = vector.load %arg4[%c0_18, %c0_19, %c8] : memref<1x2x32xf32, #tpu.memory_space<vmem>>, vector<1x2x8xf32>
    %43 = vector.shape_cast %42 : vector<1x2x8xf32> to vector<2x8xf32>
    %44 = vector.shape_cast %41 : vector<2x8xf32> to vector<1x2x8xf32>
    tpu.vector_store %arg4[%c0_18, %c0_19, %c8], %44 {strides = array<i32>} : memref<1x2x32xf32, #tpu.memory_space<vmem>>, vector<1x2x8xf32>,
    %45 = vector.extract_strided_slice %38 {offsets = [0, 0], sizes = [1, 5], strides = [1, 1]} : vector<2x5xf32> to vector<1x5xf32>
    %46 = arith.addf %25, %45 : vector<1x5xf32>
    %47 = vector.extract_strided_slice %1 {offsets = [0, 16], sizes = [2, 8], strides = [1, 1]} : vector<2x32xbf16> to vector<2x8xbf16>
    %48 = vector.extract_strided_slice %3 {offsets = [0, 16], sizes = [5, 8], strides = [1, 1]} : vector<5x32xbf16> to vector<5x8xbf16>
    %cst_20 = arith.constant dense<0.000000e+00> : vector<2x5xf32>
    %49 = tpu.matmul %47, %48, %cst_20 {dimension_numbers = #tpu.dot_dimension_numbers<[1], [1], [0], [0], [0, 0, 1, 0], [], []>} : vector<2x8xbf16>, vector<5x8xbf16>, vector<2x5xf32> -> vector<2x5xf32>
    %cst_21 = arith.constant dense<0xFF800000> : vector<2xf32>
    %50 = vector.multi_reduction <maximumf>, %49, %cst_21 [1] : vector<2x5xf32> to vector<2xf32>
    %51 = vector.shape_cast %50 : vector<2xf32> to vector<2x1xf32>
    %52 = vector.broadcast %51 : vector<2x1xf32> to vector<2x5xf32>
    %53 = arith.subf %49, %52 : vector<2x5xf32>
    %54 = math.exp %53 : vector<2x5xf32>
    %cst_22 = arith.constant dense<0.000000e+00> : vector<2xf32>
    %55 = vector.multi_reduction <add>, %54, %cst_22 [1] : vector<2x5xf32> to vector<2xf32>
    %56 = vector.shape_cast %55 : vector<2xf32> to vector<2x1xf32>
    %57 = tpu.reciprocal %56 {approx = true} : vector<2x1xf32> -> vector<2x1xf32>
    %58 = vector.broadcast %57 : vector<2x1xf32> to vector<2x5xf32>
    %59 = arith.mulf %54, %58 : vector<2x5xf32>
    %60 = arith.truncf %59 : vector<2x5xf32> to vector<2x5xbf16>
    %61 = vector.extract_strided_slice %5 {offsets = [0, 16], sizes = [5, 8], strides = [1, 1]} : vector<5x32xbf16> to vector<5x8xbf16>
    %cst_23 = arith.constant dense<0.000000e+00> : vector<2x8xf32>
    %62 = tpu.matmul %60, %61, %cst_23 {dimension_numbers = #tpu.dot_dimension_numbers<[1], [0], [0], [1], [0, 0, 1, 1], [], []>} : vector<2x5xbf16>, vector<5x8xbf16>, vector<2x8xf32> -> vector<2x8xf32>
    %c0_24 = arith.constant 0 : index
    %c0_25 = arith.constant 0 : index
    %c16 = arith.constant 16 : index
    %63 = vector.load %arg4[%c0_24, %c0_25, %c16] : memref<1x2x32xf32, #tpu.memory_space<vmem>>, vector<1x2x8xf32>
    %64 = vector.shape_cast %63 : vector<1x2x8xf32> to vector<2x8xf32>
    %65 = vector.shape_cast %62 : vector<2x8xf32> to vector<1x2x8xf32>
    tpu.vector_store %arg4[%c0_24, %c0_25, %c16], %65 {strides = array<i32>} : memref<1x2x32xf32, #tpu.memory_space<vmem>>, vector<1x2x8xf32>,
    %66 = vector.extract_strided_slice %59 {offsets = [0, 0], sizes = [1, 5], strides = [1, 1]} : vector<2x5xf32> to vector<1x5xf32>
    %67 = arith.addf %46, %66 : vector<1x5xf32>
    %68 = vector.extract_strided_slice %1 {offsets = [0, 24], sizes = [2, 8], strides = [1, 1]} : vector<2x32xbf16> to vector<2x8xbf16>
    %69 = vector.extract_strided_slice %3 {offsets = [0, 24], sizes = [5, 8], strides = [1, 1]} : vector<5x32xbf16> to vector<5x8xbf16>
    %cst_26 = arith.constant dense<0.000000e+00> : vector<2x5xf32>
    %70 = tpu.matmul %68, %69, %cst_26 {dimension_numbers = #tpu.dot_dimension_numbers<[1], [1], [0], [0], [0, 0, 1, 0], [], []>} : vector<2x8xbf16>, vector<5x8xbf16>, vector<2x5xf32> -> vector<2x5xf32>
    %cst_27 = arith.constant dense<0xFF800000> : vector<2xf32>
    %71 = vector.multi_reduction <maximumf>, %70, %cst_27 [1] : vector<2x5xf32> to vector<2xf32>
    %72 = vector.shape_cast %71 : vector<2xf32> to vector<2x1xf32>
    %73 = vector.broadcast %72 : vector<2x1xf32> to vector<2x5xf32>
    %74 = arith.subf %70, %73 : vector<2x5xf32>
    %75 = math.exp %74 : vector<2x5xf32>
    %cst_28 = arith.constant dense<0.000000e+00> : vector<2xf32>
    %76 = vector.multi_reduction <add>, %75, %cst_28 [1] : vector<2x5xf32> to vector<2xf32>
    %77 = vector.shape_cast %76 : vector<2xf32> to vector<2x1xf32>
    %78 = tpu.reciprocal %77 {approx = true} : vector<2x1xf32> -> vector<2x1xf32>
    %79 = vector.broadcast %78 : vector<2x1xf32> to vector<2x5xf32>
    %80 = arith.mulf %75, %79 : vector<2x5xf32>
    %81 = arith.truncf %80 : vector<2x5xf32> to vector<2x5xbf16>
    %82 = vector.extract_strided_slice %5 {offsets = [0, 24], sizes = [5, 8], strides = [1, 1]} : vector<5x32xbf16> to vector<5x8xbf16>
    %cst_29 = arith.constant dense<0.000000e+00> : vector<2x8xf32>
    %83 = tpu.matmul %81, %82, %cst_29 {dimension_numbers = #tpu.dot_dimension_numbers<[1], [0], [0], [1], [0, 0, 1, 1], [], []>} : vector<2x5xbf16>, vector<5x8xbf16>, vector<2x8xf32> -> vector<2x8xf32>
    %c0_30 = arith.constant 0 : index
    %c0_31 = arith.constant 0 : index
    %c24 = arith.constant 24 : index
    %84 = vector.load %arg4[%c0_30, %c0_31, %c24] : memref<1x2x32xf32, #tpu.memory_space<vmem>>, vector<1x2x8xf32>
    %85 = vector.shape_cast %84 : vector<1x2x8xf32> to vector<2x8xf32>
    %86 = vector.shape_cast %83 : vector<2x8xf32> to vector<1x2x8xf32>
    tpu.vector_store %arg4[%c0_30, %c0_31, %c24], %86 {strides = array<i32>} : memref<1x2x32xf32, #tpu.memory_space<vmem>>, vector<1x2x8xf32>,
    %87 = vector.extract_strided_slice %80 {offsets = [0, 0], sizes = [1, 5], strides = [1, 1]} : vector<2x5xf32> to vector<1x5xf32>
    %88 = arith.addf %67, %87 : vector<1x5xf32>
    %cst_32 = arith.constant 2.500000e-01 : f32
    %89 = vector.broadcast %cst_32 : f32 to vector<1x5xf32>
    %90 = arith.mulf %88, %89 : vector<1x5xf32>
    %c0_33 = arith.constant 0 : index
    %c0_34 = arith.constant 0 : index
    %c0_35 = arith.constant 0 : index
    %91 = vector.load %arg5[%c0_33, %c0_34, %c0_35] : memref<1x1x5xf32, #tpu.memory_space<vmem>>, vector<1x1x5xf32>
    %92 = vector.shape_cast %91 : vector<1x1x5xf32> to vector<1x5xf32>
    %93 = vector.shape_cast %90 : vector<1x5xf32> to vector<1x1x5xf32>
    tpu.vector_store %arg5[%c0_33, %c0_34, %c0_35], %93 {strides = array<i32>} : memref<1x1x5xf32, #tpu.memory_space<vmem>>, vector<1x1x5xf32>,
    return
  }
  func.func @transform_0(%arg0: i32) -> (i32, i32, i32) {
    %c0_i32 = arith.constant 0 : i32
    %c0_i32_0 = arith.constant 0 : i32
    %c0_i32_1 = arith.constant 0 : i32
    return %arg0, %c0_i32, %c0_i32_0 : i32, i32, i32
  }
  func.func @transform_1(%arg0: i32) -> (i32, i32, i32) {
    %c0_i32 = arith.constant 0 : i32
    %c0_i32_0 = arith.constant 0 : i32
    %c0_i32_1 = arith.constant 0 : i32
    return %arg0, %c0_i32, %c0_i32_0 : i32, i32, i32
  }
  func.func @transform_2(%arg0: i32) -> (i32, i32, i32) {
    %c0_i32 = arith.constant 0 : i32
    %c0_i32_0 = arith.constant 0 : i32
    %c0_i32_1 = arith.constant 0 : i32
    return %arg0, %c0_i32, %c0_i32_0 : i32, i32, i32
  }
  func.func @transform_3(%arg0: i32) -> (i32, i32, i32) {
    %c0_i32 = arith.constant 0 : i32
    %c0_i32_0 = arith.constant 0 : i32
    %c0_i32_1 = arith.constant 0 : i32
    return %arg0, %c0_i32, %c0_i32_0 : i32, i32, i32
  }
  func.func @transform_4(%arg0: i32) -> (i32, i32, i32) {
    %c0_i32 = arith.constant 0 : i32
    %c0_i32_0 = arith.constant 0 : i32
    %c0_i32_1 = arith.constant 0 : i32
    return %arg0, %c0_i32, %c0_i32_0 : i32, i32, i32
  }
}

module attributes {stable_mosaic.version = 11 : i64} {
  func.func @_post_kernel(%arg0: i32, %arg1: memref<4x32xf32, #tpu.memory_space<vmem>>, %arg2: memref<4x32xf32, #tpu.memory_space<vmem>>, %arg3: memref<32x32xbf16, #tpu.memory_space<vmem>>, %arg4: memref<1x32xf32, #tpu.memory_space<vmem>>, %arg5: memref<1x32xf32, #tpu.memory_space<vmem>>, %arg6: memref<1x32xf32, #tpu.memory_space<vmem>>, %arg7: memref<32x128xbf16, #tpu.memory_space<vmem>>, %arg8: memref<1x128xf32, #tpu.memory_space<vmem>>, %arg9: memref<128x32xbf16, #tpu.memory_space<vmem>>, %arg10: memref<1x32xf32, #tpu.memory_space<vmem>>, %arg11: memref<4x32xf32, #tpu.memory_space<vmem>>) attributes {dimension_semantics = [#tpu.dimension_semantics<parallel>], iteration_bounds = array<i64: 1>, scalar_prefetch = 0 : i64, scratch_operands = 0 : i64, tpu.core_type = #tpu.core_type<tc>, window_params = [{transform_indices = @transform_0, window_bounds = array<i64: 4, 32>}, {transform_indices = @transform_1, window_bounds = array<i64: 4, 32>}, {pipeline_mode = #tpu.pipeline_mode<synchronous>, transform_indices = @transform_2, window_bounds = array<i64: 32, 32>}, {pipeline_mode = #tpu.pipeline_mode<synchronous>, transform_indices = @transform_3, window_bounds = array<i64: 1, 32>}, {pipeline_mode = #tpu.pipeline_mode<synchronous>, transform_indices = @transform_4, window_bounds = array<i64: 1, 32>}, {pipeline_mode = #tpu.pipeline_mode<synchronous>, transform_indices = @transform_5, window_bounds = array<i64: 1, 32>}, {pipeline_mode = #tpu.pipeline_mode<synchronous>, transform_indices = @transform_6, window_bounds = array<i64: 32, 128>}, {pipeline_mode = #tpu.pipeline_mode<synchronous>, transform_indices = @transform_7, window_bounds = array<i64: 1, 128>}, {pipeline_mode = #tpu.pipeline_mode<synchronous>, transform_indices = @transform_8, window_bounds = array<i64: 128, 32>}, {pipeline_mode = #tpu.pipeline_mode<synchronous>, transform_indices = @transform_9, window_bounds = array<i64: 1, 32>}, {transform_indices = @transform_10, window_bounds = array<i64: 4, 32>}]} {
    %c0 = arith.constant 0 : index
    %c0_0 = arith.constant 0 : index
    %0 = vector.load %arg1[%c0, %c0_0] : memref<4x32xf32, #tpu.memory_space<vmem>>, vector<4x32xf32>
    %1 = arith.truncf %0 : vector<4x32xf32> to vector<4x32xbf16>
    %c0_1 = arith.constant 0 : index
    %c0_2 = arith.constant 0 : index
    %2 = vector.load %arg3[%c0_1, %c0_2] : memref<32x32xbf16, #tpu.memory_space<vmem>>, vector<32x32xbf16>
    %cst = arith.constant dense<0.000000e+00> : vector<4x32xf32>
    %3 = tpu.matmul %1, %2, %cst {dimension_numbers = #tpu.dot_dimension_numbers<[1], [0], [0], [1], [0, 0, 1, 1], [], []>} : vector<4x32xbf16>, vector<32x32xbf16>, vector<4x32xf32> -> vector<4x32xf32>
    %c0_3 = arith.constant 0 : index
    %c0_4 = arith.constant 0 : index
    %4 = vector.load %arg4[%c0_3, %c0_4] : memref<1x32xf32, #tpu.memory_space<vmem>>, vector<1x32xf32>
    %5 = vector.broadcast %4 : vector<1x32xf32> to vector<4x32xf32>
    %6 = arith.addf %3, %5 : vector<4x32xf32>
    %c0_5 = arith.constant 0 : index
    %c0_6 = arith.constant 0 : index
    %7 = vector.load %arg2[%c0_5, %c0_6] : memref<4x32xf32, #tpu.memory_space<vmem>>, vector<4x32xf32>
    %8 = arith.addf %7, %6 : vector<4x32xf32>
    %cst_7 = arith.constant dense<0.000000e+00> : vector<4xf32>
    %9 = vector.multi_reduction <add>, %8, %cst_7 [1] : vector<4x32xf32> to vector<4xf32>
    %10 = vector.shape_cast %9 : vector<4xf32> to vector<4x1xf32>
    %cst_8 = arith.constant 3.200000e+01 : f32
    %11 = vector.broadcast %cst_8 : f32 to vector<4x1xf32>
    %12 = arith.divf %10, %11 : vector<4x1xf32>
    %13 = vector.broadcast %12 : vector<4x1xf32> to vector<4x32xf32>
    %14 = arith.subf %8, %13 : vector<4x32xf32>
    %15 = arith.mulf %14, %14 : vector<4x32xf32>
    %cst_9 = arith.constant dense<0.000000e+00> : vector<4xf32>
    %16 = vector.multi_reduction <add>, %15, %cst_9 [1] : vector<4x32xf32> to vector<4xf32>
    %17 = vector.shape_cast %16 : vector<4xf32> to vector<4x1xf32>
    %cst_10 = arith.constant 3.200000e+01 : f32
    %18 = vector.broadcast %cst_10 : f32 to vector<4x1xf32>
    %19 = arith.divf %17, %18 : vector<4x1xf32>
    %20 = vector.broadcast %12 : vector<4x1xf32> to vector<4x32xf32>
    %21 = arith.subf %8, %20 : vector<4x32xf32>
    %cst_11 = arith.constant 9.99999974E-6 : f32
    %22 = vector.broadcast %cst_11 : f32 to vector<4x1xf32>
    %23 = arith.addf %19, %22 : vector<4x1xf32>
    %24 = math.rsqrt %23 : vector<4x1xf32>
    %25 = vector.broadcast %24 : vector<4x1xf32> to vector<4x32xf32>
    %26 = arith.mulf %21, %25 : vector<4x32xf32>
    %c0_12 = arith.constant 0 : index
    %c0_13 = arith.constant 0 : index
    %27 = vector.load %arg5[%c0_12, %c0_13] : memref<1x32xf32, #tpu.memory_space<vmem>>, vector<1x32xf32>
    %28 = vector.broadcast %27 : vector<1x32xf32> to vector<4x32xf32>
    %29 = arith.mulf %26, %28 : vector<4x32xf32>
    %c0_14 = arith.constant 0 : index
    %c0_15 = arith.constant 0 : index
    %30 = vector.load %arg6[%c0_14, %c0_15] : memref<1x32xf32, #tpu.memory_space<vmem>>, vector<1x32xf32>
    %31 = vector.broadcast %30 : vector<1x32xf32> to vector<4x32xf32>
    %32 = arith.addf %29, %31 : vector<4x32xf32>
    %33 = arith.truncf %32 : vector<4x32xf32> to vector<4x32xbf16>
    %c0_16 = arith.constant 0 : index
    %c0_17 = arith.constant 0 : index
    %34 = vector.load %arg7[%c0_16, %c0_17] : memref<32x128xbf16, #tpu.memory_space<vmem>>, vector<32x128xbf16>
    %cst_18 = arith.constant dense<0.000000e+00> : vector<4x128xf32>
    %35 = tpu.matmul %33, %34, %cst_18 {dimension_numbers = #tpu.dot_dimension_numbers<[1], [0], [0], [1], [0, 0, 1, 1], [], []>} : vector<4x32xbf16>, vector<32x128xbf16>, vector<4x128xf32> -> vector<4x128xf32>
    %c0_19 = arith.constant 0 : index
    %c0_20 = arith.constant 0 : index
    %36 = vector.load %arg8[%c0_19, %c0_20] : memref<1x128xf32, #tpu.memory_space<vmem>>, vector<1x128xf32>
    %37 = vector.broadcast %36 : vector<1x128xf32> to vector<4x128xf32>
    %38 = arith.addf %35, %37 : vector<4x128xf32>
    %39 = arith.mulf %38, %38 : vector<4x128xf32>
    %40 = arith.mulf %38, %39 : vector<4x128xf32>
    %cst_21 = arith.constant 4.471500e-02 : f32
    %41 = vector.broadcast %cst_21 : f32 to vector<4x128xf32>
    %42 = arith.mulf %41, %40 : vector<4x128xf32>
    %43 = arith.addf %38, %42 : vector<4x128xf32>
    %cst_22 = arith.constant 0.797884583 : f32
    %44 = vector.broadcast %cst_22 : f32 to vector<4x128xf32>
    %45 = arith.mulf %44, %43 : vector<4x128xf32>
    %46 = math.tanh %45 : vector<4x128xf32>
    %cst_23 = arith.constant 1.000000e+00 : f32
    %47 = vector.broadcast %cst_23 : f32 to vector<4x128xf32>
    %48 = arith.addf %47, %46 : vector<4x128xf32>
    %cst_24 = arith.constant 5.000000e-01 : f32
    %49 = vector.broadcast %cst_24 : f32 to vector<4x128xf32>
    %50 = arith.mulf %49, %48 : vector<4x128xf32>
    %51 = arith.mulf %38, %50 : vector<4x128xf32>
    %52 = arith.truncf %51 : vector<4x128xf32> to vector<4x128xbf16>
    %c0_25 = arith.constant 0 : index
    %c0_26 = arith.constant 0 : index
    %53 = vector.load %arg9[%c0_25, %c0_26] : memref<128x32xbf16, #tpu.memory_space<vmem>>, vector<128x32xbf16>
    %cst_27 = arith.constant dense<0.000000e+00> : vector<4x32xf32>
    %54 = tpu.matmul %52, %53, %cst_27 {dimension_numbers = #tpu.dot_dimension_numbers<[1], [0], [0], [1], [0, 0, 1, 1], [], []>} : vector<4x128xbf16>, vector<128x32xbf16>, vector<4x32xf32> -> vector<4x32xf32>
    %c0_28 = arith.constant 0 : index
    %c0_29 = arith.constant 0 : index
    %55 = vector.load %arg10[%c0_28, %c0_29] : memref<1x32xf32, #tpu.memory_space<vmem>>, vector<1x32xf32>
    %56 = vector.broadcast %55 : vector<1x32xf32> to vector<4x32xf32>
    %57 = arith.addf %54, %56 : vector<4x32xf32>
    %58 = arith.addf %8, %57 : vector<4x32xf32>
    %c0_30 = arith.constant 0 : index
    %c0_31 = arith.constant 0 : index
    %59 = vector.load %arg11[%c0_30, %c0_31] : memref<4x32xf32, #tpu.memory_space<vmem>>, vector<4x32xf32>
    tpu.vector_store %arg11[%c0_30, %c0_31], %58 {strides = array<i32>} : memref<4x32xf32, #tpu.memory_space<vmem>>, vector<4x32xf32>,
    return
  }
  func.func @transform_0(%arg0: i32) -> (i32, i32) {
    %c0_i32 = arith.constant 0 : i32
    %c0_i32_0 = arith.constant 0 : i32
    return %arg0, %c0_i32 : i32, i32
  }
  func.func @transform_1(%arg0: i32) -> (i32, i32) {
    %c0_i32 = arith.constant 0 : i32
    %c0_i32_0 = arith.constant 0 : i32
    return %arg0, %c0_i32 : i32, i32
  }
  func.func @transform_2(%arg0: i32) -> (i32, i32) {
    %c0_i32 = arith.constant 0 : i32
    %c0_i32_0 = arith.constant 0 : i32
    %c0_i32_1 = arith.constant 0 : i32
    return %c0_i32, %c0_i32_0 : i32, i32
  }
  func.func @transform_3(%arg0: i32) -> (i32, i32) {
    %c0_i32 = arith.constant 0 : i32
    %c0_i32_0 = arith.constant 0 : i32
    %c0_i32_1 = arith.constant 0 : i32
    return %c0_i32, %c0_i32_0 : i32, i32
  }
  func.func @transform_4(%arg0: i32) -> (i32, i32) {
    %c0_i32 = arith.constant 0 : i32
    %c0_i32_0 = arith.constant 0 : i32
    %c0_i32_1 = arith.constant 0 : i32
    return %c0_i32, %c0_i32_0 : i32, i32
  }
  func.func @transform_5(%arg0: i32) -> (i32, i32) {
    %c0_i32 = arith.constant 0 : i32
    %c0_i32_0 = arith.constant 0 : i32
    %c0_i32_1 = arith.constant 0 : i32
    return %c0_i32, %c0_i32_0 : i32, i32
  }
  func.func @transform_6(%arg0: i32) -> (i32, i32) {
    %c0_i32 = arith.constant 0 : i32
    %c0_i32_0 = arith.constant 0 : i32
    %c0_i32_1 = arith.constant 0 : i32
    return %c0_i32, %c0_i32_0 : i32, i32
  }
  func.func @transform_7(%arg0: i32) -> (i32, i32) {
    %c0_i32 = arith.constant 0 : i32
    %c0_i32_0 = arith.constant 0 : i32
    %c0_i32_1 = arith.constant 0 : i32
    return %c0_i32, %c0_i32_0 : i32, i32
  }
  func.func @transform_8(%arg0: i32) -> (i32, i32) {
    %c0_i32 = arith.constant 0 : i32
    %c0_i32_0 = arith.constant 0 : i32
    %c0_i32_1 = arith.constant 0 : i32
    return %c0_i32, %c0_i32_0 : i32, i32
  }
  func.func @transform_9(%arg0: i32) -> (i32, i32) {
    %c0_i32 = arith.constant 0 : i32
    %c0_i32_0 = arith.constant 0 : i32
    %c0_i32_1 = arith.constant 0 : i32
    return %c0_i32, %c0_i32_0 : i32, i32
  }
  func.func @transform_10(%arg0: i32) -> (i32, i32) {
    %c0_i32 = arith.constant 0 : i32
    %c0_i32_0 = arith.constant 0 : i32
    return %arg0, %c0_i32 : i32, i32
  }
}

</mosaic_0001>

<bundles_post_ra>
// kernel: tpu_custom_call.1
= control target key start
LH: loop header
LB: loop body
LE: loop exit
PB: predicated region body
PF: predicated region fallthrough
CT: control target
= control target key end

     0   :  { %6 = vsyncpa [#allocation3], 0  ;;  %s114_s0 = inlined_call_operand.hbm [shape: f32[8,128], index: 0, kind: input, shape index: {}]   ;;  %s115_s1 = inlined_call_operand.hbm [shape: f32[8,128], index: 1, kind: output, shape index: {}]  }
   0x1   :  { %7 = vsyncpa [#allocation4], 0  ;;  %s13_s8 = sshll.u32 %s114_s0, 4  ;;  %s96_s9 = smov [#allocation2]   ;;  %s14_s8 = int_to_ptr.hbm [resolvable:$true] %s13_s8 }
   0x2   :  { %s15_s10 = sshll.u32 %s96_s9, 4  ;;  %s16_s10 = int_to_ptr.vmem [resolvable:$true] %s15_s10 }
   0x3   :  { %18 = dma.hbm_to_vmem [thread:$0]  %s14_s8, 128, %s16_s10, [#allocation3]  }
   0x4   :  { %92 = dma.done.wait [#allocation3], 128  }
   0x5   :  { %93 = vsyncadd [#allocation3], 4294967168  ;;  %s97_s11 = smov [#allocation5]   ;;  %s32_s15 = sshll.u32 %s115_s1, 4  ;;  %v23_v0 = vld [vmem:[#allocation2] sm:$0xff]  ;;  %s33_s15 = int_to_ptr.hbm [resolvable:$true] %s32_s15 }
   0x6   :  { %s30_s12 = sshll.u32 %s97_s11, 4  ;;  %24 = vst [vmem:[#allocation5] sm:$0xff] %v23_v0  ;;  %s31_s12 = int_to_ptr.vmem [resolvable:$true] %s30_s12 }
   0x7   :  { %35 = dma.vmem_to_hbm [thread:$0]  %s31_s12, 128, %s33_s15, [#allocation4]  }
   0x8   :  { %94 = dma.done.wait [#allocation4], 128  }
   0x9   :  { %95 = vsyncadd [#allocation4], 4294967168 }
   0xa   :  { %40 = vsyncpa [#allocation3], 1 }
   0xb   :  { %41 = vsyncpa [#allocation4], 1 }

// kernel: _lambda_.15
= control target key start
LH: loop header
LB: loop body
LE: loop exit
PB: predicated region body
PF: predicated region fallthrough
CT: control target
= control target key end

     0   :  { %vm176_vm0 = vcmask 261120   ;;  %s343_s1 = inlined_call_operand.vmem [shape: bf16[256,32], index: 1, kind: input, shape index: {}]   ;;  %s344_s2 = inlined_call_operand.vmem [shape: f32[1,32], index: 2, kind: input, shape index: {}]   ;;  %s345_s0 = inlined_call_operand.vmem [shape: f32[8,256], index: 0, kind: input, shape index: {}]   ;;  %s346_s3 = inlined_call_operand.vmem [shape: f32[8,32], index: 3, kind: output, shape index: {}]  }
   0x1   :  { %v253_v0 = vld [vmem:[%s343_s1 + $0x38] sm:$0xff]  ;;  %v252_v2 = vld [vmem:[%s343_s1 + $0x30] sm:$0xff]  ;;  %v251_v4 = vld [vmem:[%s343_s1 + $0x28] sm:$0xff] }
   0x2   :  { %v261_v1 = vld [vmem:[%s343_s1 + $0x78] sm:$0xff]  ;;  %150 = vmatpush.bf16.msra.mxu0 %v253_v0  ;;  %v260_v3 = vld [vmem:[%s343_s1 + $0x70] sm:$0xff]  ;;  %v259_v5 = vld [vmem:[%s343_s1 + $0x68] sm:$0xff] }
   0x3   :  { %163 = vmatpush.bf16.msra.mxu1 %v261_v1  ;;  %v250_v6 = vld [vmem:[%s343_s1 + $0x20] sm:$0xff]  ;;  %v249_v8 = vld [vmem:[%s343_s1 + $0x18] sm:$0xff]  ;;  %v248_v10 = vld [vmem:[%s343_s1 + $0x10] sm:$0xff] }
   0x4   :  { %v258_v7 = vld [vmem:[%s343_s1 + $0x60] sm:$0xff]  ;;  %v257_v9 = vld [vmem:[%s343_s1 + $0x58] sm:$0xff]  ;;  %v256_v11 = vld [vmem:[%s343_s1 + $0x50] sm:$0xff] }
   0x5   :  { %v247_v12 = vld [vmem:[%s343_s1 + $0x8] sm:$0xff]  ;;  %v246_v14 = vld [vmem:[%s343_s1] sm:$0xff] }
   0x6   :  { %151 = vmatpush.bf16.msra.mxu0 %v252_v2  ;;  %v255_v13 = vld [vmem:[%s343_s1 + $0x48] sm:$0xff]  ;;  %v254_v15 = vld [vmem:[%s343_s1 + $0x40] sm:$0xff] }
   0x7   :  { %164 = vmatpush.bf16.msra.mxu1 %v260_v3  ;;  %v14_v16 = vld [vmem:[%s345_s0] sm:$0xff]  ;;  %v15_v17 = vld [vmem:[%s345_s0 + $0x8] sm:$0xff] }
   0x8   :  { %v16_v18 = vpack.c.bf16 %v14_v16, %v14_v16  ;;  %v17_v19 = vpack.c.bf16 %v15_v17, %v15_v17  ;;  %v262_v20 = vld [vmem:[%s344_s2] ss:$0 sm:$0xff] }
   0xa   :  { %152 = vmatpush.bf16.msra.mxu0 %v251_v4 }
   0xb   :  { %165 = vmatpush.bf16.msra.mxu1 %v259_v5 }
   0xe   :  { %153 = vmatpush.bf16.msra.mxu0 %v250_v6 }
   0xf   :  { %166 = vmatpush.bf16.msra.mxu1 %v258_v7 }
  0x12   :  { %154 = vmatpush.bf16.msra.mxu0 %v249_v8 }
  0x13   :  { %167 = vmatpush.bf16.msra.mxu1 %v257_v9 }
  0x16   :  { %155 = vmatpush.bf16.msra.mxu0 %v248_v10 }
  0x17   :  { %168 = vmatpush.bf16.msra.mxu1 %v256_v11 }
  0x1a   :  { %156 = vmatpush.bf16.msra.mxu0 %v247_v12 }
  0x1b   :  { %169 = vmatpush.bf16.msra.mxu1 %v255_v13 }
  0x1e   :  { %157 = vmatpush.bf16.msra.mxu0 %v246_v14 }
  0x1f   :  { %170 = vmatpush.bf16.msra.mxu1 %v254_v15 }
  0x21   :  { %158 = vmatmul.bf16.vlgmr.msra.gmra.mxu0 %v16_v18 }
  0x22   :  { %171 = vmatmul.bf16.vlgmr.msra.gmra.mxu1 %v17_v19 }
  0x9e   :  { %v159_v21 = vpop.f32.mrf.mxu0 }
  0x9f   :  { %v172_v22 = vpop.f32.mrf.mxu1  ;;  %v160_v23 = vadd.f32 %v262_v20, %v159_v21 }
  0xa1   :  { %v173_v24 = vadd.f32 %v172_v22, %v160_v23 }
  0xa3   :  { %177 = vst.msk [vmem:[%s346_s3] sm:$0xff] %vm176_vm0, %v173_v24 }
  0xa6   :  { %v161_v25 = vpop.f32.mrf.mxu0 }
  0xa7   :  { %v174_v26 = vpop.f32.mrf.mxu1 }

// kernel: _lambda_.19
= control target key start
LH: loop header
LB: loop body
LE: loop exit
PB: predicated region body
PF: predicated region fallthrough
CT: control target
= control target key end

     0   :  { %vm59_vm0 = vcmask 261120   ;;  %vm84_vm1 = vcmask 254976   ;;  %v370_v16 = vmov 32.0   ;;  %s513_s2 = inlined_call_operand.vmem [shape: bf16[32,32], index: 2, kind: input, shape index: {}]   ;;  %s514_s0 = inlined_call_operand.vmem [shape: f32[10,32], index: 0, kind: input, shape index: {}]   ;;  %s515_s3 = inlined_call_operand.vmem [shape: f32[1,32], index: 3, kind: input, shape index: {}, may-alias: {3,5,9}]   ;;  %s516_s1 = inlined_call_operand.vmem [shape: f32[10,32], index: 1, kind: input, shape index: {}]   ;;  %s517_s4 = inlined_call_operand.vmem [shape: f32[1,32], index: 4, kind: input, shape index: {}]   ;;  %s518_s5 = inlined_call_operand.vmem [shape: f32[1,32], index: 5, kind: input, shape index: {}, may-alias: {3,5,9}]   ;;  %s519_s7 = inlined_call_operand.vmem [shape: f32[1,128], index: 7, kind: input, shape index: {}]   ;;  %s520_s6 = inlined_call_operand.vmem [shape: bf16[32,128], index: 6, kind: input, shape index: {}]   ;;  %s521_s9 = inlined_call_operand.vmem [shape: f32[1,32], index: 9, kind: input, shape index: {}, may-alias: {3,5,9}]   ;;  %s522_s8 = inlined_call_operand.vmem [shape: bf16[128,32], index: 8, kind: input, shape index: {}]   ;;  %s523_s10 = inlined_call_operand.vmem [shape: f32[10,32], index: 10, kind: output, shape index: {}]  }
   0x1   :  { %v343_v0 = vld [vmem:[%s513_s2 + $0x8] sm:$0xff]  ;;  %v342_v1 = vld [vmem:[%s513_s2] sm:$0xff]  ;;  %360 = vrcp.f32 %v370_v16 }
   0x2   :  { %69 = vmatpush.bf16.msra.mxu0 %v343_v0  ;;  %v36_v2 = vld [vmem:[%s514_s0] sm:$0xff]  ;;  %v37_v3 = vld [vmem:[%s514_s0 + $0x8] sm:$0x3]  ;;  %v353_v0 = vld [vmem:[%s522_s8 + $0x38] sm:$0xff] }
   0x3   :  { %v38_v4 = vpack.c.bf16 %v37_v3, %v36_v2  ;;  %v355_v5 = vld [vmem:[%s515_s3] ss:$0 sm:$0xff]  ;;  %v78_v12 = vld [vmem:[%s516_s1 + $0x8] sm:$0x3]  ;;  %270 = vmatpush.bf16.msra.mxu2 %v353_v0 }
   0x4   :  { %v77_v7 = vld [vmem:[%s516_s1] sm:$0xff]  ;;  %v345_v33 = vld [vmem:[%s520_s6 + $0x8] sm:$0xff] }
   0x5   :  { %175 = vmatpush.bf16.msra.mxu1 %v345_v33  ;;  %v344_v35 = vld [vmem:[%s520_s6] sm:$0xff]  ;;  %v351_v2 = vld [vmem:[%s522_s8 + $0x28] sm:$0xff] }
   0x6   :  { %70 = vmatpush.bf16.msra.mxu0 %v342_v1  ;;  %v356_v54 = vld [vmem:[%s517_s4] ss:$0 sm:$0xff]  ;;  %v352_v1 = vld [vmem:[%s522_s8 + $0x30] sm:$0xff] }
   0x7   :  { %v361_v17 = vpop.eup %360  ;;  %v357_v59 = vld [vmem:[%s518_s5] ss:$0 sm:$0xff]  ;;  %271 = vmatpush.bf16.msra.mxu2 %v352_v1 }
   0x8   :  { %v89_v18 = vmul.f32 32.0, %v361_v17  ;;  %vm93_vm2 = vweird.f32 %v361_v17  ;;  %v350_v3 = vld [vmem:[%s522_s8 + $0x20] sm:$0xff] }
   0x9   :  { %300 = vmatmul.msk.bf16.vlgmr.msra.gmra.mxu0 %vm59_vm0, %v38_v4  ;;  %176 = vmatpush.bf16.msra.mxu1 %v344_v35  ;;  %v349_v4 = vld [vmem:[%s522_s8 + $0x18] sm:$0xff] }
   0xa   :  { %v90_v19 = vsub.f32 1.0, %v89_v18 }
   0xb   :  { %272 = vmatpush.bf16.msra.mxu2 %v351_v2 }
   0xc   :  { %v91_v20 = vmul.f32 %v361_v17, %v90_v19 }
   0xe   :  { %v92_v21 = vadd.f32 %v361_v17, %v91_v20 }
   0xf   :  { %273 = vmatpush.bf16.msra.mxu2 %v350_v3 }
  0x10   :  { %v94_v22 = vsel %vm93_vm2, %v361_v17, %v92_v21 }
  0x13   :  { %274 = vmatpush.bf16.msra.mxu2 %v349_v4 }
  0x86   :  { %v72_v6 = vpop.f32.mrf.mxu0 }
  0x87   :  { %v73_v8 = vadd.f32 %v355_v5, %v72_v6  ;;  %v347_v6 = vld [vmem:[%s522_s8 + $0x8] sm:$0xff] }
  0x89   :  { %v445_v9 = vadd.f32 %v77_v7, %v73_v8  ;;  %v358_v7 = vld [vmem:[%s519_s7] ss:$0 sm:$0xff] }
  0x8a   :  { %v346_v8 = vld [vmem:[%s522_s8] sm:$0xff] }
  0x8b   :  { %v81_v10 = vsel %vm59_vm0, %v445_v9, 0.0 }
  0x8c   :  { %82 = vadd.xlane.f32.xlu0 %v81_v10 }
  0x8e   :  { %v74_v11 = vpop.f32.mrf.mxu0 }
  0x8f   :  { %v75_v13 = vadd.f32 %v355_v5, %v74_v11  ;;  %v348_v5 = vld [vmem:[%s522_s8 + $0x10] sm:$0xff] }
  0x90   :  { %275 = vmatpush.bf16.msra.mxu2 %v348_v5 }
  0x91   :  { %v452_v14 = vadd.f32 %v78_v12, %v75_v13 }
  0x93   :  { %v85_v15 = vsel %vm84_vm1, %v452_v14, 0.0 }
  0x94   :  { %86 = vadd.xlane.f32.xlu0 %v85_v15  ;;  %276 = vmatpush.bf16.msra.mxu2 %v347_v6 }
  0x98   :  { %277 = vmatpush.bf16.msra.mxu2 %v346_v8 }
  0xff   :  { %v83_v23 = vpop.xlane.xlu0 %82 }
 0x100   :  { %v95_v24 = vmul.f32 %v94_v22, %v83_v23 }
 0x102   :  { %v97_v25 = vsub.f32 %v445_v9, %v95_v24 }
 0x104   :  { %v99_v26 = vmul.f32 %v97_v25, %v97_v25 }
 0x106   :  { %v101_v27 = vsel %vm59_vm0, %v99_v26, 0.0 }
 0x107   :  { %102 = vadd.xlane.f32.xlu1 %v101_v27  ;;  %v87_v28 = vpop.xlane.xlu0 %86 }
 0x108   :  { %v96_v29 = vmul.f32 %v94_v22, %v87_v28 }
 0x10a   :  { %v98_v30 = vsub.f32 %v452_v14, %v96_v29 }
 0x10c   :  { %v100_v31 = vmul.f32 %v98_v30, %v98_v30 }
 0x10e   :  { %v104_v32 = vsel %vm84_vm1, %v100_v31, 0.0 }
 0x10f   :  { %105 = vadd.xlane.f32.xlu1 %v104_v32 }
 0x17a   :  { %v103_v34 = vpop.xlane.xlu1 %102 }
 0x17b   :  { %v107_v36 = vmul.f32 %v103_v34, %v94_v22  ;;  %v359_v34 = vld [vmem:[%s521_s9] ss:$0 sm:$0xff] }
 0x17d   :  { %v109_v37 = vadd.f32 1e-05, %v107_v36 }
 0x17f   :  { %362 = vrsqrt.f32 %v109_v37  ;;  %vm117_vm4 = vweird.f32 %v109_v37 }
 0x182   :  { %v106_v38 = vpop.xlane.xlu1 %105 }
 0x183   :  { %v108_v39 = vmul.f32 %v106_v38, %v94_v22 }
 0x185   :  { %v363_v40 = vpop.eup %362  ;;  %v110_v41 = vadd.f32 1e-05, %v108_v39 }
 0x186   :  { %v112_v42 = vmul.f32 %v363_v40, %v109_v37  ;;  %vm118_vm3 = vweird.f32 %v363_v40 }
 0x187   :  { %364 = vrsqrt.f32 %v110_v41  ;;  %vm119_vm5 = vmor %vm117_vm4, %vm118_vm3  ;;  %vm127_vm7 = vweird.f32 %v110_v41 }
 0x188   :  { %v113_v43 = vmul.f32 %v363_v40, %v112_v42 }
 0x18a   :  { %v114_v44 = vmul.f32 0.5, %v113_v43 }
 0x18c   :  { %v115_v45 = vsub.f32 1.5, %v114_v44 }
 0x18d   :  { %v365_v46 = vpop.eup %364 }
 0x18e   :  { %v116_v47 = vmul.f32 %v363_v40, %v115_v45  ;;  %v122_v48 = vmul.f32 %v365_v46, %v110_v41  ;;  %vm128_vm6 = vweird.f32 %v365_v46 }
 0x18f   :  { %vm129_vm8 = vmor %vm127_vm7, %vm128_vm6 }
 0x190   :  { %v123_v49 = vmul.f32 %v365_v46, %v122_v48  ;;  %v120_v50 = vsel %vm119_vm5, %v363_v40, %v116_v47 }
 0x191   :  { %v131_v53 = vmul.f32 %v120_v50, %v97_v25 }
 0x192   :  { %v124_v51 = vmul.f32 0.5, %v123_v49 }
 0x193   :  { %v137_v58 = vmul.f32 %v356_v54, %v131_v53 }
 0x194   :  { %v125_v52 = vsub.f32 1.5, %v124_v51 }
 0x195   :  { %v143_v61 = vadd.f32 %v357_v59, %v137_v58 }
 0x196   :  { %v126_v55 = vmul.f32 %v365_v46, %v125_v52 }
 0x198   :  { %v130_v56 = vsel %vm129_vm8, %v365_v46, %v126_v55 }
 0x199   :  { %v132_v57 = vmul.f32 %v130_v56, %v98_v30 }
 0x19b   :  { %v138_v60 = vmul.f32 %v356_v54, %v132_v57 }
 0x19d   :  { %v144_v62 = vadd.f32 %v357_v59, %v138_v60 }
 0x19f   :  { %v145_v63 = vpack.c.bf16 %v144_v62, %v143_v61 }
 0x1a1   :  { %309 = vmatmul.msk.bf16.vlgmr.msra.gmra.mxu1 %vm59_vm0, %v145_v63 }
 0x21e   :  { %v178_v10 = vpop.f32.mrf.mxu1 }
 0x21f   :  { %v179_v11 = vadd.f32 %v358_v7, %v178_v10 }
 0x221   :  { %v183_v12 = vmul.f32 %v179_v11, %v179_v11 }
 0x223   :  { %v185_v13 = vmul.f32 %v183_v12, %v179_v11 }
 0x225   :  { %v187_v15 = vmul.f32 0.044715, %v185_v13 }
 0x226   :  { %v180_v16 = vpop.f32.mrf.mxu1 }
 0x227   :  { %v189_v17 = vadd.f32 %v187_v15, %v179_v11  ;;  %v181_v18 = vadd.f32 %v358_v7, %v180_v16 }
 0x229   :  { %v184_v19 = vmul.f32 %v181_v18, %v181_v18  ;;  %v191_v20 = vmul.f32 0.7978846, %v189_v17 }
 0x22b   :  { %v186_v21 = vmul.f32 %v184_v19, %v181_v18  ;;  %366 = vtanh.f32 %v191_v20 }
 0x22d   :  { %v188_v22 = vmul.f32 0.044715, %v186_v21 }
 0x22f   :  { %v190_v23 = vadd.f32 %v188_v22, %v181_v18 }
 0x231   :  { %v192_v24 = vmul.f32 0.7978846, %v190_v23  ;;  %v367_v25 = vpop.eup %366 }
 0x232   :  { %v195_v26 = vadd.f32 1.0, %v367_v25 }
 0x233   :  { %368 = vtanh.f32 %v192_v24 }
 0x234   :  { %v197_v29 = vmul.f32 0.5, %v195_v26 }
 0x236   :  { %v199_v31 = vmul.f32 %v197_v29, %v179_v11 }
 0x239   :  { %v369_v27 = vpop.eup %368 }
 0x23a   :  { %v196_v28 = vadd.f32 1.0, %v369_v27 }
 0x23c   :  { %v198_v30 = vmul.f32 0.5, %v196_v28 }
 0x23e   :  { %v200_v32 = vmul.f32 %v198_v30, %v181_v18 }
 0x240   :  { %v201_v33 = vpack.c.bf16 %v200_v32, %v199_v31 }
 0x242   :  { %278 = vmatmul.bf16.vlgmr.msra.gmra.mxu2 %v201_v33 }
 0x2c5   :  { %v279_v35 = vpop.f32.mrf.mxu2 }
 0x2c6   :  { %v280_v36 = vadd.f32 %v359_v34, %v279_v35 }
 0x2c8   :  { %v284_v37 = vadd.f32 %v280_v36, %v445_v9 }
 0x2ca   :  { %286 = vst.msk [vmem:[%s523_s10] sm:$0xff] %vm59_vm0, %v284_v37 }
 0x2cd   :  { %v281_v38 = vpop.f32.mrf.mxu2 }
 0x2ce   :  { %v282_v39 = vadd.f32 %v359_v34, %v281_v38 }
 0x2d0   :  { %v285_v40 = vadd.f32 %v282_v39, %v452_v14 }
 0x2d2   :  { %287 = vst.msk [vmem:[%s523_s10 + $0x8] sm:$0x3] %vm84_vm1, %v285_v40 }

// kernel: _lambda_.17
= control target key start
LH: loop header
LB: loop body
LE: loop exit
PB: predicated region body
PF: predicated region fallthrough
CT: control target
= control target key end

     0   :  { %vm26_vm0 = vcmask 261120   ;;  %vm30_vm1 = vcmask 254976   ;;  %v192_v4 = vmov 32.0   ;;  %vm133_vm9 = vcmask 257024   ;;  %s194_s13 = smov 96   ;;  %s282_s0 = inlined_call_operand.vmem [shape: f32[10,32], index: 0, kind: input, shape index: {}]   ;;  %s283_s1 = inlined_call_operand.vmem [shape: f32[1,32], index: 1, kind: input, shape index: {}]   ;;  %s284_s2 = inlined_call_operand.vmem [shape: f32[1,32], index: 2, kind: input, shape index: {}]   ;;  %s285_s4 = inlined_call_operand.vmem [shape: f32[1,96], index: 4, kind: input, shape index: {}]   ;;  %s286_s3 = inlined_call_operand.vmem [shape: bf16[32,96], index: 3, kind: input, shape index: {}]   ;;  %s287_s5 = inlined_call_operand.vmem [shape: bf16[10,32], index: 5, kind: output, shape index: {0}]   ;;  %s288_s6 = inlined_call_operand.vmem [shape: bf16[10,32], index: 6, kind: output, shape index: {1}]   ;;  %s289_s7 = inlined_call_operand.vmem [shape: bf16[10,32], index: 7, kind: output, shape index: {2}]  }
   0x1   :  { %v24_v0 = vld [vmem:[%s282_s0] sm:$0xff]  ;;  %v25_v2 = vld [vmem:[%s282_s0 + $0x8] sm:$0x3]  ;;  %186 = vrcp.f32 %v192_v4  ;;  %vm135_vm10 = vcmask 253952  }
   0x2   :  { %v27_v1 = vsel %vm26_vm0, %v24_v0, 0.0  ;;  %v31_v3 = vsel %vm30_vm1, %v25_v2, 0.0  ;;  %v179_v21 = vld [vmem:[%s286_s3 + $0x8] sm:$0xff]  ;;  %v178_v23 = vld [vmem:[%s286_s3] sm:$0xff] }
   0x3   :  { %28 = vadd.xlane.f32.xlu0 %v27_v1  ;;  %121 = vmatpush.bf16.msra.mxu0 %v179_v21  ;;  %v183_v42 = vld [vmem:[%s283_s1] ss:$0 sm:$0xff]  ;;  %s193_s1 = smov 64  }
   0x4   :  { %v184_v47 = vld [vmem:[%s284_s2] ss:$0 sm:$0xff] }
   0x5   :  { %v185_v52 = vld [vmem:[%s285_s4] ss:$0 sm:$0xff] }
   0x7   :  { %v187_v5 = vpop.eup %186  ;;  %122 = vmatpush.bf16.msra.mxu0 %v178_v23 }
   0x8   :  { %v35_v6 = vmul.f32 32.0, %v187_v5  ;;  %vm39_vm2 = vweird.f32 %v187_v5 }
   0xa   :  { %v36_v7 = vsub.f32 1.0, %v35_v6 }
   0xb   :  { %32 = vadd.xlane.f32.xlu0 %v31_v3 }
   0xc   :  { %v37_v8 = vmul.f32 %v187_v5, %v36_v7 }
   0xe   :  { %v38_v9 = vadd.f32 %v187_v5, %v37_v8 }
  0x10   :  { %v40_v10 = vsel %vm39_vm2, %v187_v5, %v38_v9 }
  0x76   :  { %v29_v11 = vpop.xlane.xlu0 %28 }
  0x77   :  { %v41_v12 = vmul.f32 %v40_v10, %v29_v11 }
  0x79   :  { %v43_v13 = vsub.f32 %v24_v0, %v41_v12 }
  0x7b   :  { %v45_v14 = vmul.f32 %v43_v13, %v43_v13 }
  0x7d   :  { %v47_v15 = vsel %vm26_vm0, %v45_v14, 0.0 }
  0x7e   :  { %48 = vadd.xlane.f32.xlu1 %v47_v15  ;;  %v33_v16 = vpop.xlane.xlu0 %32 }
  0x7f   :  { %v42_v17 = vmul.f32 %v40_v10, %v33_v16 }
  0x81   :  { %v44_v18 = vsub.f32 %v25_v2, %v42_v17 }
  0x83   :  { %v46_v19 = vmul.f32 %v44_v18, %v44_v18 }
  0x85   :  { %v50_v20 = vsel %vm30_vm1, %v46_v19, 0.0 }
  0x86   :  { %51 = vadd.xlane.f32.xlu1 %v50_v20 }
  0xf1   :  { %v49_v22 = vpop.xlane.xlu1 %48 }
  0xf2   :  { %v53_v24 = vmul.f32 %v49_v22, %v40_v10 }
  0xf4   :  { %v55_v25 = vadd.f32 1e-05, %v53_v24 }
  0xf6   :  { %188 = vrsqrt.f32 %v55_v25  ;;  %vm63_vm4 = vweird.f32 %v55_v25 }
  0xf9   :  { %v52_v26 = vpop.xlane.xlu1 %51 }
  0xfa   :  { %v54_v27 = vmul.f32 %v52_v26, %v40_v10 }
  0xfc   :  { %v189_v28 = vpop.eup %188  ;;  %v56_v29 = vadd.f32 1e-05, %v54_v27 }
  0xfd   :  { %v58_v30 = vmul.f32 %v189_v28, %v55_v25  ;;  %vm64_vm3 = vweird.f32 %v189_v28 }
  0xfe   :  { %190 = vrsqrt.f32 %v56_v29  ;;  %vm65_vm5 = vmor %vm63_vm4, %vm64_vm3  ;;  %vm73_vm7 = vweird.f32 %v56_v29 }
  0xff   :  { %v59_v31 = vmul.f32 %v189_v28, %v58_v30 }
 0x101   :  { %v60_v32 = vmul.f32 0.5, %v59_v31 }
 0x103   :  { %v61_v33 = vsub.f32 1.5, %v60_v32 }
 0x104   :  { %v191_v34 = vpop.eup %190 }
 0x105   :  { %v62_v35 = vmul.f32 %v189_v28, %v61_v33  ;;  %v68_v36 = vmul.f32 %v191_v34, %v56_v29  ;;  %vm74_vm6 = vweird.f32 %v191_v34 }
 0x106   :  { %vm75_vm8 = vmor %vm73_vm7, %vm74_vm6 }
 0x107   :  { %v69_v37 = vmul.f32 %v191_v34, %v68_v36  ;;  %v66_v38 = vsel %vm65_vm5, %v189_v28, %v62_v35 }
 0x108   :  { %v77_v41 = vmul.f32 %v66_v38, %v43_v13 }
 0x109   :  { %v70_v39 = vmul.f32 0.5, %v69_v37 }
 0x10a   :  { %v83_v46 = vmul.f32 %v183_v42, %v77_v41 }
 0x10b   :  { %v71_v40 = vsub.f32 1.5, %v70_v39 }
 0x10c   :  { %v89_v49 = vadd.f32 %v184_v47, %v83_v46 }
 0x10d   :  { %v72_v43 = vmul.f32 %v191_v34, %v71_v40 }
 0x10f   :  { %v76_v44 = vsel %vm75_vm8, %v191_v34, %v72_v43 }
 0x110   :  { %v78_v45 = vmul.f32 %v76_v44, %v44_v18 }
 0x112   :  { %v84_v48 = vmul.f32 %v183_v42, %v78_v45 }
 0x114   :  { %v90_v50 = vadd.f32 %v184_v47, %v84_v48 }
 0x116   :  { %v91_v51 = vpack.c.bf16 %v90_v50, %v89_v49 }
 0x118   :  { %177 = vmatmul.msk.bf16.vlgmr.msra.gmra.mxu0 %vm26_vm0, %v91_v51 }
 0x195   :  { %v124_v53 = vpop.f32.mrf.mxu0 }
 0x196   :  { %v125_v54 = vadd.f32 %v185_v52, %v124_v53 }
 0x198   :  { %v129_v55 = vmul.f32 0.35355338, %v125_v54  ;;  %v137_v56 = vpack.c.bf16 %v125_v54, %v125_v54 }
 0x19a   :  { %v131_v57 = vpack.c.bf16 %v129_v55, %v129_v55  ;;  %149 = vrot.lane.b32.xlu0 %v137_v56, %s193_s1  ;;  %141 = vrot.lane.b32.xlu2 %v137_v56, %s194_s13 }
 0x19c   :  { %134 = vst.msk [vmem:[%s287_s5] sm:$0xf] %vm133_vm9, %v131_v57 }
 0x19d   :  { %v126_v58 = vpop.f32.mrf.mxu0 }
 0x19e   :  { %v127_v59 = vadd.f32 %v185_v52, %v126_v58 }
 0x1a0   :  { %v130_v60 = vmul.f32 0.35355338, %v127_v59  ;;  %v138_v61 = vpack.c.bf16 %v127_v59, %v127_v59 }
 0x1a2   :  { %v132_v62 = vpack.c.bf16 %v130_v60, %v130_v60  ;;  %151 = vrot.lane.b32.xlu1 %v138_v61, %s193_s1  ;;  %143 = vrot.lane.b32.xlu2 %v138_v61, %s194_s13 }
 0x1a4   :  { %136 = vst.msk [vmem:[%s287_s5 + $0x4] sm:$0x1] %vm135_vm10, %v132_v62 }
 0x1f4   :  { %v142_v63 = vpop.permute.xlu2 %141 }
 0x1f5   :  { %147 = vst.msk [vmem:[%s288_s6] sm:$0xf] %vm133_vm9, %v142_v63 }
 0x1fc   :  { %v144_v0 = vpop.permute.xlu2 %143 }
 0x1fd   :  { %148 = vst.msk [vmem:[%s288_s6 + $0x4] sm:$0x1] %vm135_vm10, %v144_v0 }
 0x20c   :  { %v150_v1 = vpop.permute.xlu0 %149 }
 0x20d   :  { %155 = vst.msk [vmem:[%s289_s7] sm:$0xf] %vm133_vm9, %v150_v1 }
 0x214   :  { %v152_v2 = vpop.permute.xlu1 %151 }
 0x215   :  { %156 = vst.msk [vmem:[%s289_s7 + $0x4] sm:$0x1] %vm135_vm10, %v152_v2 }

// kernel: _lambda_.18
= control target key start
LH: loop header
LB: loop body
LE: loop exit
PB: predicated region body
PF: predicated region fallthrough
CT: control target
= control target key end

     0   :  { %s692_s15 = smov 0   ;;  %s774_s0 = inlined_call_operand.vmem [shape: bf16[2,5,32], index: 0, kind: input, shape index: {}]   ;;  %s775_s1 = inlined_call_operand.vmem [shape: bf16[2,5,32], index: 1, kind: input, shape index: {}]   ;;  %s776_s2 = inlined_call_operand.vmem [shape: bf16[2,5,32], index: 2, kind: input, shape index: {}]   ;;  %s777_s3 = inlined_call_operand.vmem [shape: f32[2,5,32], index: 3, kind: output, shape index: {0}]   ;;  %s778_s4 = inlined_call_operand.vmem [shape: f32[2,1,5], index: 4, kind: output, shape index: {1}]  }
   0x1 LB: > { %s602_s16 = sadd.s32 4294967295, %s658_s15   ;;  %p606_p0 = scmp.ge.s32.totalorder %s658_s15, 1  ;;  %s658_s15 = sphi %s692_s15, %s15_s15  }
   0x2   : > { %p182_p1 = scmp.lt.s32.totalorder %s658_s15, 3 }
   0x4   : > { %p183_p2 = pnand %p606_p0, %p182_p1 }
   0x5   : > { %p217_p3 = scmp.lt.s32.totalorder (!%p183_p2), %s602_s16, 1  ;;  %s660_s24 = smov (!%p183_p2), 112  }
   0x6   : > { %186 = sbr.rel (%p183_p2) target bundleno = 1075 (0x433), region = 32  ;;  %s661_s25 = smov (!%p183_p2), 104  }
   0x7   : > { %s662_s26 = smov (!%p183_p2), 120   ;;  %s664_s11 = smov (!%p183_p2), 8  }
   0x8   : > { %s665_s12 = smov (!%p183_p2), 16   ;;  %s666_s13 = smov (!%p183_p2), 24  }
   0xb   : > { %s780_s16 = smov (!%p217_p3, %s602_s16), 1  ;;  %vm240_vm0 = vcmask 64512   ;;  %vm260_vm1 = vcmask 36864   ;;  %vm277_vm2 = vcmask 1041408   ;;  %vm278_vm3 = vcmask 1042432  }
   0xc   : > { %s703_s17 = sshll.u32 %s780_s16, 2  ;;  %v663_v21 = vmov 65535   ;;  %vm273_vm4 = vcmask 39936   ;;  %s610_s30 = sshll.u32 %s780_s16, 3  ;;  %vm297_vm5 = vcmask 61440   ;;  %vm498_vm6 = vcmask 32768  }
   0xd   : > { %s224_s20 = scalar_lea.vmem %s775_s1, %s703_s17  ;;  %s220_s23 = scalar_lea.vmem %s774_s0, %s703_s17  ;;  %v279_v22 = vsel %vm277_vm2, 4294967295, %v663_v21  ;;  %vm368_vm7 = vcmask 127040   ;;  %vm431_vm8 = vcmask 192640   ;;  %vm494_vm9 = vcmask 258240  }
   0xe   : > { %v238_v0 = vld [vmem:[%s224_s20] sm:$0x7]  ;;  %s228_s29 = scalar_lea.vmem %s776_s2, %s703_s17  ;;  %v729_v23 = vsel %vm278_vm3, %v279_v22, 0  ;;  %s746_s7 = scalar_lea.vmem %s777_s3, %s610_s30 }
   0xf   : > { %v245_v1 = vsel %vm240_vm0, %v238_v0, 0  ;;  %v237_v2 = vld [vmem:[%s220_s23] sm:$0x7]  ;;  %v305_v3 = vunpack.c.l.b16 %v238_v0  ;;  %s235_s10 = scalar_lea.vmem %s778_s4, %s780_s16 }
  0x10   : > { %254 = vmatpush.bf16.xpose.msra.mxu0 %v245_v1  ;;  %v300_v5 = vunpack.c.l.b16 %v237_v2  ;;  %v239_v20 = vld [vmem:[%s228_s29] sm:$0x7] }
  0x11   : > { %v306_v4 = vpack.c.b16 %v305_v3, %v305_v3  ;;  %v282_v24 = vand.u32 %v729_v23, %v239_v20  ;;  %v341_v44 = vunpack.c.l.b16 %v239_v20 }
  0x12   : > { %v301_v6 = vpack.c.b16 %v300_v5, %v300_v5 }
  0x13   : > { %373 = vrot.lane.b32.xlu2 %v306_v4, %s660_s24  ;;  %291 = vmatpush.bf16.msra.mxu1 %v282_v24  ;;  %v342_v45 = vpack.c.b16 %v341_v44, %v341_v44 }
  0x17   : > { %611 = vmatmul.msk.bf16.vlgmr.msra.gmra.mxu0 %vm240_vm0, %v237_v2 }
  0x1b   : > { %436 = vrot.lane.b32.xlu2 %v306_v4, %s661_s25 }
  0x23   : > { %371 = vrot.lane.b32.xlu2 %v301_v6, %s660_s24 }
  0x2b   : > { %434 = vrot.lane.b32.xlu2 %v301_v6, %s661_s25 }
  0x6d   : > { %v374_v10 = vpop.permute.xlu2 %373 }
  0x6e   : > { %v379_v25 = vsel %vm240_vm0, %v374_v10, 0 }
  0x6f   : > { %388 = vmatpush.bf16.xpose.msrb.mxu1 %v379_v25 }
  0x75   : > { %v437_v11 = vpop.permute.xlu2 %436 }
  0x76   : > { %v442_v16 = vsel %vm240_vm0, %v437_v11, 0 }
  0x77   : > { %451 = vmatpush.bf16.xpose.msrb.mxu0 %v442_v16 }
  0x7d   : > { %v372_v15 = vpop.permute.xlu2 %371 }
  0x85   : > { %v435_v19 = vpop.permute.xlu2 %434 }
  0x86   : > { %617 = vmatmul.msk.bf16.vlgmr.msrb.gmra.mxu0 %vm240_vm0, %v435_v19 }
  0x94   : > { %v256_v7 = vpop.f32.mrf.mxu0 }
  0x95   : > { %v261_v8 = vsel %vm260_vm1, %v256_v7, -inf }
  0x96   : > { %262 = vmax.xlane.f32.xlu0 %v261_v8 }
  0x9c   : > { %v258_v9 = vpop.f32.mrf.mxu0 }
  0xaa   : > { %307 = vrot.lane.b32.xlu0 %v306_v4, %s662_s26 }
 0x103   : > { %v453_v32 = vpop.f32.mrf.mxu0 }
 0x104   : > { %v457_v33 = vsel %vm260_vm1, %v453_v32, -inf }
 0x109   : > { %v263_v12 = vpop.xlane.xlu0 %262 }
 0x10a   : > { %v264_v13 = vsub.f32 %v256_v7, %v263_v12 }
 0x10b   : > { %v455_v34 = vpop.f32.mrf.mxu0 }
 0x10c   : > { %v265_v14 = vmul.f32 1.442695, %v264_v13 }
 0x10e   : > { %636 = vpow2.f32 %v265_v14 }
 0x114   : > { %v637_v17 = vpop.eup %636 }
 0x115   : > { %v267_v18 = vsel %vm260_vm1, %v637_v17, 0.0 }
 0x116   : > { %268 = vadd.xlane.f32.xlu1 %v267_v18 }
 0x11c   : > { %v308_v26 = vpop.permute.xlu0 %307 }
 0x11d   : > { %v313_v27 = vsel %vm240_vm0, %v308_v26, 0 }
 0x11e   : > { %322 = vmatpush.bf16.xpose.msra.mxu2 %v313_v27 }
 0x12f   : > { %302 = vrot.lane.b32.xlu1 %v301_v6, %s662_s26 }
 0x159   : > { %458 = vmax.xlane.f32.xlu1 %v457_v33 }
 0x189   : > { %v269_v28 = vpop.xlane.xlu1 %268 }
 0x18a   : > { %638 = vrcp.f32 %v269_v28 }
 0x190   : > { %v639_v29 = vpop.eup %638 }
 0x191   : > { %v734_v30 = vmul.f32 %v639_v29, %v637_v17 }
 0x193   : > { %v272_v31 = vpack.c.bf16 %v734_v30, %v734_v30 }
 0x195   : > { %612 = vmatmul.msk.bf16.vlgmr.msra.gmra.mxu1 %vm273_vm4, %v272_v31 }
 0x1a1   : > { %v303_v35 = vpop.permute.xlu1 %302 }
 0x1a2   : > { %613 = vmatmul.msk.bf16.vlgmr.msra.gmra.mxu2 %vm240_vm0, %v303_v35 }
 0x1a5   : > { %615 = vmatmul.msk.bf16.vlgmr.msrb.gmra.mxu1 %vm240_vm0, %v372_v15 }
 0x1cc   : > { %v459_v48 = vpop.xlane.xlu1 %458 }
 0x1cd   : > { %v460_v52 = vsub.f32 %v453_v32, %v459_v48 }
 0x1cf   : > { %v461_v54 = vmul.f32 1.442695, %v460_v52 }
 0x212   : > { %v293_v36 = vpop.f32.mrf.mxu1 }
 0x213   : > { %298 = vst.msk [vmem:[%s746_s7] sm:$0x1f] %vm297_vm5, %v293_v36 }
 0x21a   : > { %v295_v37 = vpop.f32.mrf.mxu1 }
 0x222   : > { %v390_v38 = vpop.f32.mrf.mxu1 }
 0x223   : > { %v394_v39 = vsel %vm260_vm1, %v390_v38, -inf }
 0x224   : > { %395 = vmax.xlane.f32.xlu2 %v394_v39 }
 0x225   : > { %v324_v40 = vpop.f32.mrf.mxu2 }
 0x226   : > { %v328_v41 = vsel %vm260_vm1, %v324_v40, -inf }
 0x227   : > { %329 = vmax.xlane.f32.xlu0 %v328_v41 }
 0x22a   : > { %v392_v42 = vpop.f32.mrf.mxu1 }
 0x22d   : > { %v326_v43 = vpop.f32.mrf.mxu2 }
 0x23c   : > { %343 = vrot.lane.b32.xlu2 %v342_v45, %s662_s26 }
 0x297   : > { %v396_v46 = vpop.xlane.xlu2 %395 }
 0x298   : > { %v397_v47 = vsub.f32 %v390_v38, %v396_v46 }
 0x29a   : > { %v398_v49 = vmul.f32 1.442695, %v397_v47  ;;  %v330_v50 = vpop.xlane.xlu0 %329 }
 0x29b   : > { %v331_v51 = vsub.f32 %v324_v40, %v330_v50 }
 0x29c   : > { %640 = vpow2.f32 %v398_v49 }
 0x29d   : > { %v332_v53 = vmul.f32 1.442695, %v331_v51 }
 0x29f   : > { %642 = vpow2.f32 %v332_v53  ;;  %v344_v61 = vpop.permute.xlu2 %343 }
 0x2a0   : > { %644 = vpow2.f32 %v461_v54  ;;  %v349_v62 = vand.u32 %v344_v61, %v729_v23 }
 0x2a2   : > { %v641_v55 = vpop.eup %640  ;;  %358 = vmatpush.bf16.msra.mxu3 %v349_v62 }
 0x2a3   : > { %v400_v56 = vsel %vm260_vm1, %v641_v55, 0.0 }
 0x2a4   : > { %401 = vadd.xlane.f32.xlu1 %v400_v56 }
 0x2a5   : > { %v643_v57 = vpop.eup %642 }
 0x2a6   : > { %v334_v58 = vsel %vm260_vm1, %v643_v57, 0.0  ;;  %v645_v59 = vpop.eup %644 }
 0x2a7   : > { %335 = vadd.xlane.f32.xlu0 %v334_v58  ;;  %v463_v60 = vsel %vm260_vm1, %v645_v59, 0.0 }
 0x2af   : > { %464 = vadd.xlane.f32.xlu0 %v463_v60 }
 0x2bd   : > { %406 = vrot.lane.b32.xlu1 %v342_v45, %s660_s24 }
 0x2c3   : > { %469 = vrot.lane.b32.xlu0 %v342_v45, %s661_s25 }
 0x317   : > { %v402_v0 = vpop.xlane.xlu1 %401 }
 0x31a   : > { %v336_v63 = vpop.xlane.xlu0 %335 }
 0x31b   : > { %646 = vrcp.f32 %v336_v63 }
 0x31c   : > { %648 = vrcp.f32 %v402_v0 }
 0x321   : > { %v647_v1 = vpop.eup %646 }
 0x322   : > { %v465_v2 = vpop.xlane.xlu0 %464  ;;  %v338_v3 = vmul.f32 %v647_v1, %v643_v57  ;;  %v649_v5 = vpop.eup %648 }
 0x323   : > { %650 = vrcp.f32 %v465_v2  ;;  %v404_v7 = vmul.f32 %v649_v5, %v641_v55 }
 0x324   : > { %v339_v4 = vpack.c.bf16 %v338_v3, %v338_v3  ;;  %v370_v6 = vadd.f32 %v338_v3, %v734_v30 }
 0x325   : > { %v405_v15 = vpack.c.bf16 %v404_v7, %v404_v7 }
 0x326   : > { %614 = vmatmul.msk.bf16.vlgmr.msra.gmra.mxu3 %vm273_vm4, %v339_v4  ;;  %v433_v10 = vadd.f32 %v404_v7, %v370_v6 }
 0x329   : > { %v651_v8 = vpop.eup %650 }
 0x32a   : > { %v467_v9 = vmul.f32 %v651_v8, %v645_v59 }
 0x32c   : > { %v496_v11 = vadd.f32 %v467_v9, %v433_v10  ;;  %v468_v18 = vpack.c.bf16 %v467_v9, %v467_v9 }
 0x32e   : > { %v497_v12 = vmul.f32 0.25, %v496_v11 }
 0x32f   : > { %v407_v13 = vpop.permute.xlu1 %406 }
 0x330   : > { %499 = vst.msk [vmem:[%s235_s10] sm:$0x1] %vm498_vm6, %v497_v12  ;;  %v412_v14 = vand.u32 %v407_v13, %v729_v23 }
 0x332   : > { %421 = vmatpush.bf16.msrb.mxu3 %v412_v14 }
 0x335   : > { %v470_v16 = vpop.permute.xlu0 %469 }
 0x336   : > { %v475_v17 = vand.u32 %v470_v16, %v729_v23  ;;  %616 = vmatmul.msk.bf16.vlgmr.msrb.gmra.mxu3 %vm273_vm4, %v405_v15 }
 0x338   : > { %484 = vmatpush.bf16.msrb.mxu2 %v475_v17 }
 0x33b   : > { %618 = vmatmul.msk.bf16.vlgmr.msrb.gmra.mxu2 %vm273_vm4, %v468_v18 }
 0x3a9   : > { %v360_v19 = vpop.f32.mrf.mxu3 }
 0x3aa   : > { %365 = vrot.lane.b32.xlu2 %v360_v19, %s664_s11 }
 0x3b1   : > { %v362_v20 = vpop.f32.mrf.mxu3 }
 0x3b9   : > { %v423_v21 = vpop.f32.mrf.mxu3 }
 0x3ba   : > { %428 = vrot.lane.b32.xlu2 %v423_v21, %s665_s12 }
 0x3be   : > { %v486_v22 = vpop.f32.mrf.mxu2 }
 0x3bf   : > { %491 = vrot.lane.b32.xlu0 %v486_v22, %s666_s13 }
 0x3c1   : > { %v425_v23 = vpop.f32.mrf.mxu3 }
 0x3c6   : > { %v488_v24 = vpop.f32.mrf.mxu2 }
 0x404   : > { %v366_v25 = vpop.permute.xlu2 %365 }
 0x405   : > { %369 = vst.msk [vmem:[%s746_s7] sm:$0x1f] %vm368_vm7, %v366_v25 }
 0x414   : > { %v429_v26 = vpop.permute.xlu2 %428 }
 0x415   : > { %432 = vst.msk [vmem:[%s746_s7] sm:$0x1f] %vm431_vm8, %v429_v26 }
 0x431   : > { %v492_v27 = vpop.permute.xlu0 %491 }
 0x432   : > { %495 = vst.msk [vmem:[%s746_s7] sm:$0x1f] %vm494_vm9, %v492_v27 }
 0x433 PF: > { %s15_s15 = sadd.s32 1, %s658_s15  }
 0x434   : > { %p12_p4 = scmp.ge.s32.totalorder %s15_s15, 4  }
 0x436   :  { %14 = sbr.rel (!%p12_p4) target bundleno = 1 (0x1), region = 80 }

// kernel: _lambda_.27
= control target key start
LH: loop header
LB: loop body
LE: loop exit
PB: predicated region body
PF: predicated region fallthrough
CT: control target
= control target key end

     0   :  { %vm27_vm0 = vcmask 261120   ;;  %s327_s0 = inlined_call_operand.vmem [shape: f32[10,32], index: 0, kind: input, shape index: {}]   ;;  %s328_s1 = inlined_call_operand.vmem [shape: f32[1,32], index: 1, kind: input, shape index: {}]   ;;  %s329_s2 = inlined_call_operand.vmem [shape: f32[1,32], index: 2, kind: input, shape index: {}]   ;;  %s330_s3 = inlined_call_operand.vmem [shape: bf16[32,96], index: 3, kind: input, shape index: {}]   ;;  %s331_s4 = inlined_call_operand.vmem [shape: f32[1,96], index: 4, kind: input, shape index: {}]   ;;  %s332_s5 = inlined_call_operand.hbm [shape: bf16[10,32], index: 5, kind: output, shape index: {0}]   ;;  %s333_s6 = inlined_call_operand.vmem [shape: bf16[10,32], index: 6, kind: output, shape index: {1}]   ;;  %s334_s7 = inlined_call_operand.vmem [shape: bf16[10,32], index: 7, kind: output, shape index: {2}]  }
   0x1   :  { %v25_v0 = vld [vmem:[%s327_s0] sm:$0xff] }
   0x2   :  { %v28_v1 = vsel %vm27_vm0, %v25_v0, 0.0 }
   0x3   :  { %29 = vadd.xlane.f32.xlu0 %v28_v1 }
   0x4   :  { %13 = vsyncpa [#allocation3], 0  ;;  %v26_v2 = vld [vmem:[%s327_s0 + $0x8] sm:$0x3]  ;;  %vm31_vm1 = vcmask 254976   ;;  %v235_v4 = vmov 32.0  }
   0x5   :  { %v32_v3 = vsel %vm31_vm1, %v26_v2, 0.0  ;;  %203 = vrcp.f32 %v235_v4  ;;  %v194_v21 = vld [vmem:[%s330_s3 + $0x8] sm:$0xff]  ;;  %v193_v23 = vld [vmem:[%s330_s3] sm:$0xff]  ;;  %vm134_vm9 = vcmask 257024   ;;  %s237_s13 = smov 96   ;;  %vm136_vm10 = vcmask 253952  }
   0x6   :  { %122 = vmatpush.bf16.msra.mxu0 %v194_v21  ;;  %v200_v42 = vld [vmem:[%s328_s1] ss:$0 sm:$0xff]  ;;  %s236_s1 = smov 64   ;;  %s239_s17 = smov 4  }
   0x7   :  { %v201_v47 = vld [vmem:[%s329_s2] ss:$0 sm:$0xff]  ;;  %s238_s2 = smov [#allocation2]  }
   0x8   :  { %v202_v52 = vld [vmem:[%s331_s4] ss:$0 sm:$0xff]  ;;  %s162_s14 = sshll.u32 %s238_s2, 4  ;;  %s164_s4 = sshll.u32 %s332_s5, 4  ;;  %s163_s14 = int_to_ptr.vmem [resolvable:$true] %s162_s14  ;;  %s165_s4 = int_to_ptr.hbm [resolvable:$true] %s164_s4 }
   0xa   :  { %123 = vmatpush.bf16.msra.mxu0 %v193_v23 }
   0xb   :  { %33 = vadd.xlane.f32.xlu0 %v32_v3  ;;  %v204_v5 = vpop.eup %203 }
   0xc   :  { %v36_v6 = vmul.f32 32.0, %v204_v5  ;;  %vm40_vm2 = vweird.f32 %v204_v5 }
   0xe   :  { %v37_v7 = vsub.f32 1.0, %v36_v6 }
  0x10   :  { %v38_v8 = vmul.f32 %v204_v5, %v37_v7 }
  0x12   :  { %v39_v9 = vadd.f32 %v204_v5, %v38_v8 }
  0x14   :  { %v41_v10 = vsel %vm40_vm2, %v204_v5, %v39_v9 }
  0x76   :  { %v30_v11 = vpop.xlane.xlu0 %29 }
  0x77   :  { %v42_v12 = vmul.f32 %v41_v10, %v30_v11 }
  0x79   :  { %v44_v13 = vsub.f32 %v25_v0, %v42_v12 }
  0x7b   :  { %v46_v14 = vmul.f32 %v44_v13, %v44_v13 }
  0x7d   :  { %v48_v15 = vsel %vm27_vm0, %v46_v14, 0.0 }
  0x7e   :  { %49 = vadd.xlane.f32.xlu1 %v48_v15  ;;  %v34_v16 = vpop.xlane.xlu0 %33 }
  0x7f   :  { %v43_v17 = vmul.f32 %v41_v10, %v34_v16 }
  0x81   :  { %v45_v18 = vsub.f32 %v26_v2, %v43_v17 }
  0x83   :  { %v47_v19 = vmul.f32 %v45_v18, %v45_v18 }
  0x85   :  { %v51_v20 = vsel %vm31_vm1, %v47_v19, 0.0 }
  0x86   :  { %52 = vadd.xlane.f32.xlu1 %v51_v20 }
  0xf1   :  { %v50_v22 = vpop.xlane.xlu1 %49 }
  0xf2   :  { %v54_v24 = vmul.f32 %v50_v22, %v41_v10 }
  0xf4   :  { %v56_v25 = vadd.f32 1e-05, %v54_v24 }
  0xf6   :  { %205 = vrsqrt.f32 %v56_v25  ;;  %vm64_vm4 = vweird.f32 %v56_v25 }
  0xf9   :  { %v53_v26 = vpop.xlane.xlu1 %52 }
  0xfa   :  { %v55_v27 = vmul.f32 %v53_v26, %v41_v10 }
  0xfc   :  { %v206_v28 = vpop.eup %205  ;;  %v57_v29 = vadd.f32 1e-05, %v55_v27 }
  0xfd   :  { %v59_v30 = vmul.f32 %v206_v28, %v56_v25  ;;  %vm65_vm3 = vweird.f32 %v206_v28 }
  0xfe   :  { %207 = vrsqrt.f32 %v57_v29  ;;  %vm66_vm5 = vmor %vm64_vm4, %vm65_vm3  ;;  %vm74_vm7 = vweird.f32 %v57_v29 }
  0xff   :  { %v60_v31 = vmul.f32 %v206_v28, %v59_v30 }
 0x101   :  { %v61_v32 = vmul.f32 0.5, %v60_v31 }
 0x103   :  { %v62_v33 = vsub.f32 1.5, %v61_v32 }
 0x104   :  { %v208_v34 = vpop.eup %207 }
 0x105   :  { %v63_v35 = vmul.f32 %v206_v28, %v62_v33  ;;  %v69_v36 = vmul.f32 %v208_v34, %v57_v29  ;;  %vm75_vm6 = vweird.f32 %v208_v34 }
 0x106   :  { %vm76_vm8 = vmor %vm74_vm7, %vm75_vm6 }
 0x107   :  { %v70_v37 = vmul.f32 %v208_v34, %v69_v36  ;;  %v67_v38 = vsel %vm66_vm5, %v206_v28, %v63_v35 }
 0x108   :  { %v78_v41 = vmul.f32 %v67_v38, %v44_v13 }
 0x109   :  { %v71_v39 = vmul.f32 0.5, %v70_v37 }
 0x10a   :  { %v84_v46 = vmul.f32 %v200_v42, %v78_v41 }
 0x10b   :  { %v72_v40 = vsub.f32 1.5, %v71_v39 }
 0x10c   :  { %v90_v49 = vadd.f32 %v201_v47, %v84_v46 }
 0x10d   :  { %v73_v43 = vmul.f32 %v208_v34, %v72_v40 }
 0x10f   :  { %v77_v44 = vsel %vm76_vm8, %v208_v34, %v73_v43 }
 0x110   :  { %v79_v45 = vmul.f32 %v77_v44, %v45_v18 }
 0x112   :  { %v85_v48 = vmul.f32 %v200_v42, %v79_v45 }
 0x114   :  { %v91_v50 = vadd.f32 %v201_v47, %v85_v48 }
 0x116   :  { %v92_v51 = vpack.c.bf16 %v91_v50, %v90_v49 }
 0x118   :  { %192 = vmatmul.msk.bf16.vlgmr.msra.gmra.mxu0 %vm27_vm0, %v92_v51 }
 0x195   :  { %v125_v53 = vpop.f32.mrf.mxu0 }
 0x196   :  { %v126_v54 = vadd.f32 %v202_v52, %v125_v53 }
 0x198   :  { %v130_v55 = vmul.f32 0.35355338, %v126_v54  ;;  %v138_v56 = vpack.c.bf16 %v126_v54, %v126_v54 }
 0x19a   :  { %v132_v57 = vpack.c.bf16 %v130_v55, %v130_v55  ;;  %150 = vrot.lane.b32.xlu0 %v138_v56, %s236_s1  ;;  %142 = vrot.lane.b32.xlu2 %v138_v56, %s237_s13 }
 0x19c   :  { %135 = vst.msk [vmem:[#allocation2] sm:$0xf] %vm134_vm9, %v132_v57 }
 0x19d   :  { %v127_v58 = vpop.f32.mrf.mxu0 }
 0x19e   :  { %v128_v59 = vadd.f32 %v202_v52, %v127_v58 }
 0x1a0   :  { %v131_v60 = vmul.f32 0.35355338, %v128_v59  ;;  %v139_v61 = vpack.c.bf16 %v128_v59, %v128_v59 }
 0x1a2   :  { %v133_v62 = vpack.c.bf16 %v131_v60, %v131_v60  ;;  %152 = vrot.lane.b32.xlu1 %v139_v61, %s236_s1  ;;  %144 = vrot.lane.b32.xlu2 %v139_v61, %s237_s13 }
 0x1a4   :  { %137 = vst.msk [vmem:[#allocation2 + $0x4] sm:$0x1] %vm136_vm10, %v133_v62 }
 0x1a5   :  { %170 = dma.vmem_to_hbm [thread:$0]  %s163_s14, 128, %s165_s4, [#allocation3], %s236_s1, %s236_s1, %s239_s17  }
 0x1f4   :  { %v143_v63 = vpop.permute.xlu2 %142 }
 0x1f5   :  { %148 = vst.msk [vmem:[%s333_s6] sm:$0xf] %vm134_vm9, %v143_v63 }
 0x1fc   :  { %v145_v0 = vpop.permute.xlu2 %144 }
 0x1fd   :  { %149 = vst.msk [vmem:[%s333_s6 + $0x4] sm:$0x1] %vm136_vm10, %v145_v0 }
 0x20c   :  { %v151_v1 = vpop.permute.xlu0 %150 }
 0x20d   :  { %156 = vst.msk [vmem:[%s334_s7] sm:$0xf] %vm134_vm9, %v151_v1 }
 0x214   :  { %v153_v2 = vpop.permute.xlu1 %152 }
 0x215   :  { %157 = vst.msk [vmem:[%s334_s7 + $0x4] sm:$0x1] %vm136_vm10, %v153_v2 }
 0x216   :  { %233 = dma.done.wait [#allocation3], 128  }
 0x217   :  { %234 = vsyncadd [#allocation3], 4294967168 }
 0x218   :  { %183 = vsyncpa [#allocation3], 1 }

// kernel: _lambda_.25
= control target key start
LH: loop header
LB: loop body
LE: loop exit
PB: predicated region body
PF: predicated region fallthrough
CT: control target
= control target key end

     0   :  { %10 = vsyncpa [#allocation3], 0  ;;  %s949_s0 = inlined_call_operand.vmem [shape: bf16[2,5,32], index: 0, kind: input, shape index: {}]   ;;  %s950_s1 = inlined_call_operand.vmem [shape: bf16[2,5,32], index: 1, kind: input, shape index: {}]   ;;  %s951_s2 = inlined_call_operand.vmem [shape: bf16[2,5,32], index: 2, kind: input, shape index: {}]   ;;  %s952_s3 = inlined_call_operand.vmem [shape: f32[2,5,32], index: 3, kind: output, shape index: {0}]   ;;  %s953_s4 = inlined_call_operand.hbm [shape: f32[2,1,5], index: 4, kind: output, shape index: {1}]  }
   0x1   :  { %12 = vsyncpa [#allocation3 + $0x1], 0  ;;  %s800_s15 = smov 0   ;;  %s802_s16 = smov 0  }
   0x2   :  { %s804_s17 = smov 0   ;;  %s806_s18 = smov 0  }
   0x3 LB: > { %s821_s19 = sadd.s32 4294967295, %s766_s18   ;;  %s624_s20 = sadd.s32 4294967294, %s766_s18   ;;  %s766_s18 = sphi %s806_s18, %s959_s18   ;;  %s762_s17 = sphi %s804_s17, %s958_s17   ;;  %s758_s16 = sphi %s802_s16, %s957_s16   ;;  %s754_s15 = sphi %s800_s15, %s956_s15  }
   0x4   : > { %s825_s21 = sadd.s32 1, %s766_s18   ;;  %s129_s22 = sadd.s32 1, %s762_s17 }
   0x5   : > { %s126_s23 = ssub.s32 %s766_s18, %s825_s21  ;;  %p139_p0 = scmp.ne.s32.totalorder %s762_s17, %s758_s16 }
   0x6   : > { %p127_p1 = scmp.eq.s32.totalorder %s126_s23, 0  ;;  %p140_p2 = scmp.eq.s32.totalorder %s821_s19, 1 }
   0x7   : > { %p145_p3 = scmp.ne.s32.totalorder %s758_s16, %s754_s15  ;;  %p146_p4 = scmp.eq.s32.totalorder %s624_s20, 1 }
   0x8   : > { %s836_s24 = scalar_select %p127_p1, %s762_s17, %s129_s22  }
   0x9   : > { %p838_p5 = por %p140_p2, %p139_p0  ;;  %p842_p6 = por %p146_p4, %p145_p3 }
   0xa   : > { %p627_p7 = scmp.ge.s32.totalorder %s766_s18, 1  ;;  %p185_p8 = scmp.lt.s32.totalorder %s766_s18, 3 }
   0xc   : > { %p186_p9 = pnand %p627_p7, %p185_p8 }
   0xd   : > { %p221_p10 = scmp.lt.s32.totalorder (!%p186_p9), %s821_s19, 1  ;;  %s768_s9 = smov (!%p186_p9), 112  }
   0xe   : > { %189 = sbr.rel (%p186_p9) target bundleno = 1084 (0x43c), region = 32  ;;  %s769_s10 = smov (!%p186_p9), 104  }
   0xf   : > { %s770_s11 = smov (!%p186_p9), 120   ;;  %s772_s30 = smov (!%p186_p9), 8  }
  0x10   : > { %s517_s7 = scalar_lea.hbm (!%p186_p9), %s953_s4, %s821_s19 }
  0x13   : > { %s850_s27 = scalar_select %p221_p10, %s821_s19, 1  ;;  %vm241_vm0 = vcmask 64512   ;;  %vm261_vm1 = vcmask 36864   ;;  %vm278_vm2 = vcmask 1041408   ;;  %vm279_vm3 = vcmask 1042432  }
  0x14   : > { %v771_v21 = vmov 65535   ;;  %vm274_vm4 = vcmask 39936   ;;  %vm298_vm5 = vcmask 61440   ;;  %vm499_vm6 = vcmask 32768  }
  0x15   : > { %s853_s28 = sshll.u32 %s850_s27, 2  ;;  %v280_v22 = vsel %vm278_vm2, 4294967295, %v771_v21  ;;  %s631_s20 = sshll.u32 %s850_s27, 3 }
  0x16   : > { %s228_s5 = scalar_lea.vmem %s950_s1, %s853_s28  ;;  %s224_s8 = scalar_lea.vmem %s949_s0, %s853_s28  ;;  %v879_v23 = vsel %vm279_vm3, %v280_v22, 0 }
  0x17   : > { %v239_v0 = vld [vmem:[%s228_s5] sm:$0x7]  ;;  %s232_s14 = scalar_lea.vmem %s951_s2, %s853_s28  ;;  %s896_s28 = scalar_lea.vmem %s952_s3, %s631_s20 }
  0x18   : > { %v246_v1 = vsel %vm241_vm0, %v239_v0, 0  ;;  %v238_v2 = vld [vmem:[%s224_s8] sm:$0x7]  ;;  %v306_v3 = vunpack.c.l.b16 %v239_v0  ;;  %s219_s27 = sand.u32 1, %s758_s16   ;;  %s724_s20 = scalar_lea.hbm %s953_s4, 2 }
  0x19   : > { %255 = vmatpush.bf16.xpose.msra.mxu0 %v246_v1  ;;  %v301_v5 = vunpack.c.l.b16 %v238_v2  ;;  %v240_v20 = vld [vmem:[%s232_s14] sm:$0x7]  ;;  %s220_s29 = scalar_lea.vmem [#allocation2], %s219_s27 }
  0x1a   : > { %v307_v4 = vpack.c.b16 %v306_v3, %v306_v3  ;;  %v283_v24 = vand.u32 %v879_v23, %v240_v20  ;;  %v342_v44 = vunpack.c.l.b16 %v240_v20  ;;  %s519_s8 = sshll.u32 %s220_s29, 4  ;;  %s520_s8 = int_to_ptr.vmem [resolvable:$true] %s519_s8 }
  0x1b   : > { %v302_v6 = vpack.c.b16 %v301_v5, %v301_v5 }
  0x1c   : > { %374 = vrot.lane.b32.xlu2 %v307_v4, %s768_s9  ;;  %292 = vmatpush.bf16.msra.mxu1 %v283_v24  ;;  %v343_v45 = vpack.c.b16 %v342_v44, %v342_v44 }
  0x20   : > { %632 = vmatmul.msk.bf16.vlgmr.msra.gmra.mxu0 %vm241_vm0, %v238_v2 }
  0x24   : > { %437 = vrot.lane.b32.xlu2 %v307_v4, %s769_s10 }
  0x2c   : > { %372 = vrot.lane.b32.xlu2 %v302_v6, %s768_s9 }
  0x34   : > { %435 = vrot.lane.b32.xlu2 %v302_v6, %s769_s10 }
  0x76   : > { %v375_v10 = vpop.permute.xlu2 %374 }
  0x77   : > { %v380_v25 = vsel %vm241_vm0, %v375_v10, 0 }
  0x78   : > { %389 = vmatpush.bf16.xpose.msrb.mxu1 %v380_v25 }
  0x7e   : > { %v438_v11 = vpop.permute.xlu2 %437 }
  0x7f   : > { %v443_v16 = vsel %vm241_vm0, %v438_v11, 0 }
  0x80   : > { %452 = vmatpush.bf16.xpose.msrb.mxu0 %v443_v16 }
  0x86   : > { %v373_v15 = vpop.permute.xlu2 %372 }
  0x8e   : > { %v436_v19 = vpop.permute.xlu2 %435 }
  0x8f   : > { %638 = vmatmul.msk.bf16.vlgmr.msrb.gmra.mxu0 %vm241_vm0, %v436_v19 }
  0x9d   : > { %v257_v7 = vpop.f32.mrf.mxu0 }
  0x9e   : > { %v262_v8 = vsel %vm261_vm1, %v257_v7, -inf }
  0x9f   : > { %263 = vmax.xlane.f32.xlu0 %v262_v8 }
  0xa5   : > { %v259_v9 = vpop.f32.mrf.mxu0 }
  0xb3   : > { %308 = vrot.lane.b32.xlu0 %v307_v4, %s770_s11 }
 0x10c   : > { %v454_v32 = vpop.f32.mrf.mxu0 }
 0x10d   : > { %v458_v33 = vsel %vm261_vm1, %v454_v32, -inf }
 0x112   : > { %v264_v12 = vpop.xlane.xlu0 %263 }
 0x113   : > { %v265_v13 = vsub.f32 %v257_v7, %v264_v12 }
 0x114   : > { %v456_v34 = vpop.f32.mrf.mxu0 }
 0x115   : > { %v266_v14 = vmul.f32 1.442695, %v265_v13 }
 0x117   : > { %688 = vpow2.f32 %v266_v14 }
 0x11d   : > { %v689_v17 = vpop.eup %688 }
 0x11e   : > { %v268_v18 = vsel %vm261_vm1, %v689_v17, 0.0 }
 0x11f   : > { %269 = vadd.xlane.f32.xlu1 %v268_v18 }
 0x125   : > { %v309_v26 = vpop.permute.xlu0 %308 }
 0x126   : > { %v314_v27 = vsel %vm241_vm0, %v309_v26, 0 }
 0x127   : > { %323 = vmatpush.bf16.xpose.msra.mxu2 %v314_v27 }
 0x138   : > { %303 = vrot.lane.b32.xlu1 %v302_v6, %s770_s11 }
 0x162   : > { %459 = vmax.xlane.f32.xlu1 %v458_v33 }
 0x192   : > { %v270_v28 = vpop.xlane.xlu1 %269 }
 0x193   : > { %690 = vrcp.f32 %v270_v28 }
 0x199   : > { %v691_v29 = vpop.eup %690 }
 0x19a   : > { %v884_v30 = vmul.f32 %v691_v29, %v689_v17 }
 0x19c   : > { %v273_v31 = vpack.c.bf16 %v884_v30, %v884_v30 }
 0x19e   : > { %633 = vmatmul.msk.bf16.vlgmr.msra.gmra.mxu1 %vm274_vm4, %v273_v31 }
 0x1aa   : > { %v304_v35 = vpop.permute.xlu1 %303 }
 0x1ab   : > { %634 = vmatmul.msk.bf16.vlgmr.msra.gmra.mxu2 %vm241_vm0, %v304_v35 }
 0x1ae   : > { %636 = vmatmul.msk.bf16.vlgmr.msrb.gmra.mxu1 %vm241_vm0, %v373_v15 }
 0x1d5   : > { %v460_v48 = vpop.xlane.xlu1 %459 }
 0x1d6   : > { %v461_v52 = vsub.f32 %v454_v32, %v460_v48 }
 0x1d8   : > { %v462_v54 = vmul.f32 1.442695, %v461_v52 }
 0x21b   : > { %v294_v36 = vpop.f32.mrf.mxu1 }
 0x21c   : > { %299 = vst.msk [vmem:[%s896_s28] sm:$0x1f] %vm298_vm5, %v294_v36 }
 0x223   : > { %v296_v37 = vpop.f32.mrf.mxu1 }
 0x22b   : > { %v391_v38 = vpop.f32.mrf.mxu1 }
 0x22c   : > { %v395_v39 = vsel %vm261_vm1, %v391_v38, -inf }
 0x22d   : > { %396 = vmax.xlane.f32.xlu2 %v395_v39 }
 0x22e   : > { %v325_v40 = vpop.f32.mrf.mxu2 }
 0x22f   : > { %v329_v41 = vsel %vm261_vm1, %v325_v40, -inf }
 0x230   : > { %330 = vmax.xlane.f32.xlu0 %v329_v41 }
 0x233   : > { %v393_v42 = vpop.f32.mrf.mxu1 }
 0x236   : > { %v327_v43 = vpop.f32.mrf.mxu2 }
 0x245   : > { %344 = vrot.lane.b32.xlu2 %v343_v45, %s770_s11 }
 0x2a0   : > { %v397_v46 = vpop.xlane.xlu2 %396 }
 0x2a1   : > { %v398_v47 = vsub.f32 %v391_v38, %v397_v46 }
 0x2a3   : > { %v399_v49 = vmul.f32 1.442695, %v398_v47  ;;  %v331_v50 = vpop.xlane.xlu0 %330 }
 0x2a4   : > { %v332_v51 = vsub.f32 %v325_v40, %v331_v50 }
 0x2a5   : > { %692 = vpow2.f32 %v399_v49 }
 0x2a6   : > { %v333_v53 = vmul.f32 1.442695, %v332_v51 }
 0x2a8   : > { %694 = vpow2.f32 %v333_v53  ;;  %v345_v61 = vpop.permute.xlu2 %344 }
 0x2a9   : > { %696 = vpow2.f32 %v462_v54  ;;  %v350_v62 = vand.u32 %v345_v61, %v879_v23 }
 0x2ab   : > { %v693_v55 = vpop.eup %692  ;;  %359 = vmatpush.bf16.msra.mxu3 %v350_v62 }
 0x2ac   : > { %v401_v56 = vsel %vm261_vm1, %v693_v55, 0.0 }
 0x2ad   : > { %402 = vadd.xlane.f32.xlu1 %v401_v56 }
 0x2ae   : > { %v695_v57 = vpop.eup %694 }
 0x2af   : > { %v335_v58 = vsel %vm261_vm1, %v695_v57, 0.0  ;;  %v697_v59 = vpop.eup %696 }
 0x2b0   : > { %336 = vadd.xlane.f32.xlu0 %v335_v58  ;;  %v464_v60 = vsel %vm261_vm1, %v697_v59, 0.0 }
 0x2b8   : > { %465 = vadd.xlane.f32.xlu0 %v464_v60 }
 0x2c6   : > { %407 = vrot.lane.b32.xlu1 %v343_v45, %s768_s9  ;;  %s521_s9 = sshll.u32 %s517_s7, 4  ;;  %s522_s9 = int_to_ptr.hbm [resolvable:$true] %s521_s9 }
 0x2c7   : > { %s718_s11 = sshra.s32 %s522_s9, 4  ;;  %s719_s11 = int_to_ptr.hbm [resolvable:$true] %s718_s11 }
 0x2c8   : > { %s720_s12 = scalar_lea.hbm %s719_s11, 1  ;;  %p725_p0 = scmp.lt.s32.totalorder %s719_s11, %s953_s4 }
 0x2c9   : > { %p721_p11 = scmp.ne.s32.totalorder %s719_s11, %s720_s12  ;;  %p726_p1 = scmp.lt.s32.totalorder %s724_s20, %s720_s12 }
 0x2cb   : > { %p722_p12 = pnand %p721_p11, %p838_p5  ;;  %p727_p2 = por %p726_p1, %p725_p0 }
 0x2cc   : > { %470 = vrot.lane.b32.xlu0 %v343_v45, %s769_s10  ;;  %s506_s10 = scalar_lea.sflag [#allocation3], %s219_s27 }
 0x2cd   : > { %p723_p13 = pneg %p722_p12 }
 0x2cf   : > { %p728_p3 = pnand %p727_p2, %p723_p13 }
 0x320   : > { %v403_v0 = vpop.xlane.xlu1 %402 }
 0x323   : > { %v337_v63 = vpop.xlane.xlu0 %336 }
 0x324   : > { %698 = vrcp.f32 %v337_v63 }
 0x325   : > { %700 = vrcp.f32 %v403_v0 }
 0x32a   : > { %v699_v1 = vpop.eup %698 }
 0x32b   : > { %v466_v2 = vpop.xlane.xlu0 %465  ;;  %v339_v3 = vmul.f32 %v699_v1, %v695_v57  ;;  %v701_v5 = vpop.eup %700 }
 0x32c   : > { %702 = vrcp.f32 %v466_v2  ;;  %v405_v7 = vmul.f32 %v701_v5, %v693_v55 }
 0x32d   : > { %v340_v4 = vpack.c.bf16 %v339_v3, %v339_v3  ;;  %v371_v6 = vadd.f32 %v339_v3, %v884_v30 }
 0x32e   : > { %v406_v15 = vpack.c.bf16 %v405_v7, %v405_v7 }
 0x32f   : > { %635 = vmatmul.msk.bf16.vlgmr.msra.gmra.mxu3 %vm274_vm4, %v340_v4  ;;  %v434_v10 = vadd.f32 %v405_v7, %v371_v6 }
 0x332   : > { %v703_v8 = vpop.eup %702 }
 0x333   : > { %v468_v9 = vmul.f32 %v703_v8, %v697_v59 }
 0x335   : > { %v497_v11 = vadd.f32 %v468_v9, %v434_v10  ;;  %v469_v18 = vpack.c.bf16 %v468_v9, %v468_v9 }
 0x337   : > { %v498_v12 = vmul.f32 0.25, %v497_v11 }
 0x338   : > { %v408_v13 = vpop.permute.xlu1 %407 }
 0x339   : > { %v413_v14 = vand.u32 %v408_v13, %v879_v23  ;;  %500 = vst.msk [vmem:[%s220_s29] sm:$0x1] %vm499_vm6, %v498_v12 }
 0x33b   : > { %422 = vmatpush.bf16.msrb.mxu3 %v413_v14 }
 0x33e   : > { %v471_v16 = vpop.permute.xlu0 %470 }
 0x33f   : > { %v476_v17 = vand.u32 %v471_v16, %v879_v23  ;;  %637 = vmatmul.msk.bf16.vlgmr.msrb.gmra.mxu3 %vm274_vm4, %v406_v15 }
 0x341   : > { %485 = vmatpush.bf16.msrb.mxu2 %v476_v17 }
 0x344   : > { %639 = vmatmul.msk.bf16.vlgmr.msrb.gmra.mxu2 %vm274_vm4, %v469_v18 }
 0x3b2   : > { %v361_v19 = vpop.f32.mrf.mxu3 }
 0x3b3   : > { %366 = vrot.lane.b32.xlu2 %v361_v19, %s772_s30 }
 0x3ba   : > { %v363_v20 = vpop.f32.mrf.mxu3 }
 0x3bb   : > { %731 = shalt.err (!%p728_p3)
}
 0x3bc   : > { %642 = dma.vmem_to_hbm [thread:$0]  (%p838_p5), %s520_s8, 16, %s522_s9, %s506_s10   ;;  %vm369_vm7 = vcmask 127040   ;;  %vm432_vm8 = vcmask 192640   ;;  %vm495_vm9 = vcmask 258240  }
 0x3bd   : > { %s773_s19 = smov 16   ;;  %s774_s27 = smov 24  }
 0x3c2   : > { %v424_v21 = vpop.f32.mrf.mxu3 }
 0x3c3   : > { %429 = vrot.lane.b32.xlu2 %v424_v21, %s773_s19 }
 0x3c7   : > { %v487_v22 = vpop.f32.mrf.mxu2 }
 0x3c8   : > { %492 = vrot.lane.b32.xlu0 %v487_v22, %s774_s27 }
 0x3ca   : > { %v426_v23 = vpop.f32.mrf.mxu3 }
 0x3cf   : > { %v489_v24 = vpop.f32.mrf.mxu2 }
 0x40d   : > { %v367_v25 = vpop.permute.xlu2 %366 }
 0x40e   : > { %370 = vst.msk [vmem:[%s896_s28] sm:$0x1f] %vm369_vm7, %v367_v25 }
 0x41d   : > { %v430_v26 = vpop.permute.xlu2 %429 }
 0x41e   : > { %433 = vst.msk [vmem:[%s896_s28] sm:$0x1f] %vm432_vm8, %v430_v26 }
 0x43a   : > { %v493_v27 = vpop.permute.xlu0 %492 }
 0x43b   : > { %496 = vst.msk [vmem:[%s896_s28] sm:$0x1f] %vm495_vm9, %v493_v27 }
 0x43c PF: > { %p648_p4 = scmp.ge.s32.totalorder %s766_s18, 2  ;;  %s540_s25 = sand.u32 1, %s754_s15  }
 0x43d   : > { %s541_s29 = scalar_lea.sflag [#allocation3], %s540_s25 }
 0x43e   : > { %p645_p5 = pnand %p648_p4, %p842_p6 }
 0x440   : > { %p646_p7 = pneg %p645_p5 }
 0x442   : > { %749 = dma.done.wait (%p646_p7), %s541_s29, 16  }
 0x443   : > { %751 = vsyncadd (%p646_p7), %s541_s29, 4294967280  ;;  %p15_p8 = scmp.ge.s32.totalorder %s825_s21, 4   ;;  %s956_s15 = smov %s758_s16 }
 0x444   : > { %s957_s16 = smov %s762_s17  ;;  %s958_s17 = smov %s836_s24 }
 0x445   : > { %s959_s18 = smov %s825_s21  ;;  %17 = sbr.rel (!%p15_p8) target bundleno = 3 (0x3), region = 85 }
 0x44a   :  { %546 = vsyncpa [#allocation3], 1 }
 0x44b   :  { %548 = vsyncpa [#allocation3 + $0x1], 1 }

// kernel: _lambda_.28
= control target key start
LH: loop header
LB: loop body
LE: loop exit
PB: predicated region body
PF: predicated region fallthrough
CT: control target
= control target key end

     0   :  { %s972_s18 = smov 0   ;;  %s1092_s0 = inlined_call_operand.vmem [shape: bf16[2,5,32], index: 0, kind: input, shape index: {}]   ;;  %s1093_s1 = inlined_call_operand.vmem [shape: bf16[2,5,32], index: 1, kind: input, shape index: {}]   ;;  %s1094_s2 = inlined_call_operand.vmem [shape: bf16[2,5,32], index: 2, kind: input, shape index: {}]   ;;  %s1095_s3 = inlined_call_operand.vmem [shape: bf16[2,5,32], index: 3, kind: input, shape index: {}]   ;;  %s1096_s4 = inlined_call_operand.vmem [shape: bf16[2,5,32], index: 4, kind: input, shape index: {}]   ;;  %s1097_s5 = inlined_call_operand.vmem [shape: f32[2,5,32], index: 5, kind: output, shape index: {}]  }
   0x1 LB: > { %s859_s19 = sadd.s32 4294967295, %s933_s18   ;;  %p863_p0 = scmp.ge.s32.totalorder %s933_s18, 1  ;;  %s933_s18 = sphi %s972_s18, %s15_s18  }
   0x2   : > { %p222_p1 = scmp.lt.s32.totalorder %s933_s18, 3 }
   0x4   : > { %p223_p2 = pnand %p863_p0, %p222_p1 }
   0x5   : > { %p264_p3 = scmp.lt.s32.totalorder (!%p223_p2), %s859_s19, 1  ;;  %s935_s30 = smov (!%p223_p2), 120  }
   0x6   : > { %226 = sbr.rel (%p223_p2) target bundleno = 1144 (0x478), region = 40  ;;  %s936_s6 = smov (!%p223_p2), 112  }
   0x7   : > { %s937_s7 = smov (!%p223_p2), 104   ;;  %s941_s21 = smov (!%p223_p2), 24  }
   0xb   : > { %s1099_s19 = smov (!%p264_p3, %s859_s19), 1  ;;  %vm294_vm0 = vcmask 64512   ;;  %vm330_vm1 = vcmask 36864   ;;  %vm360_vm2 = vcmask 1041408   ;;  %vm361_vm3 = vcmask 1042432  }
   0xc   : > { %s983_s20 = sshll.u32 %s1099_s19, 2  ;;  %v938_v30 = vmov 65535   ;;  %vm356_vm4 = vcmask 39936   ;;  %s869_s14 = sshll.u32 %s1099_s19, 3  ;;  %vm399_vm5 = vcmask 61440   ;;  %vm528_vm6 = vcmask 127040  }
   0xd   : > { %s271_s23 = scalar_lea.vmem %s1093_s1, %s983_s20  ;;  %s279_s26 = scalar_lea.vmem %s1095_s3, %s983_s20  ;;  %v362_v31 = vsel %vm360_vm2, 4294967295, %v938_v30  ;;  %vm642_vm7 = vcmask 192640   ;;  %vm756_vm8 = vcmask 258240  }
   0xe   : > { %v290_v0 = vld [vmem:[%s271_s23] sm:$0x7]  ;;  %s267_s29 = scalar_lea.vmem %s1092_s0, %s983_s20  ;;  %s283_s10 = scalar_lea.vmem %s1096_s4, %s983_s20  ;;  %v1024_v34 = vsel %vm361_vm3, %v362_v31, 0 }
   0xf   : > { %v292_v1 = vld [vmem:[%s279_s26] sm:$0x7]  ;;  %v299_v2 = vsel %vm294_vm0, %v290_v0, 0  ;;  %v407_v11 = vunpack.c.l.b16 %v290_v0  ;;  %s275_s13 = scalar_lea.vmem %s1094_s2, %s983_s20  ;;  %s1051_s17 = scalar_lea.vmem %s1097_s5, %s869_s14 }
  0x10   : > { %v315_v3 = vsel %vm294_vm0, %v292_v1, 0  ;;  %308 = vmatpush.bf16.xpose.msra.mxu0 %v299_v2  ;;  %v289_v4 = vld [vmem:[%s267_s29] sm:$0x7]  ;;  %v431_v13 = vunpack.c.l.b16 %v292_v1  ;;  %s939_s19 = smov 8   ;;  %s940_s20 = smov 16  }
  0x11   : > { %324 = vmatpush.bf16.xpose.msra.mxu1 %v315_v3  ;;  %v408_v12 = vpack.c.b16 %v407_v11, %v407_v11  ;;  %v402_v15 = vunpack.c.l.b16 %v289_v4  ;;  %v293_v29 = vld [vmem:[%s283_s10] sm:$0x7] }
  0x12   : > { %v432_v14 = vpack.c.b16 %v431_v13, %v431_v13  ;;  %v477_v32 = vunpack.c.l.b16 %v293_v29  ;;  %v1022_v33 = vld [vmem:[%s275_s13] sm:$0x7]  ;;  %v365_v35 = vand.u32 %v1024_v34, %v293_v29 }
  0x13   : > { %409 = vrot.lane.b32.xlu2 %v408_v12, %s935_s30  ;;  %v403_v16 = vpack.c.b16 %v402_v15, %v402_v15  ;;  %v384_v38 = vand.u32 %v1024_v34, %v1022_v33 }
  0x14   : > { %v1027_v36 = vpack.c.b16 %v477_v32, %v477_v32  ;;  %374 = vmatpush.bf16.msra.mxu2 %v365_v35 }
  0x15   : > { %393 = vmatpush.bf16.msra.mxu3 %v384_v38 }
  0x17   : > { %870 = vmatmul.msk.bf16.vlgmr.msra.gmra.mxu0 %vm294_vm0, %v289_v4 }
  0x18   : > { %871 = vmatmul.msk.bf16.vlgmr.msra.gmra.mxu1 %vm294_vm0, %v289_v4 }
  0x1b   : > { %433 = vrot.lane.b32.xlu2 %v432_v14, %s935_s30 }
  0x23   : > { %553 = vrot.lane.b32.xlu2 %v432_v14, %s936_s6 }
  0x2b   : > { %530 = vrot.lane.b32.xlu2 %v403_v16, %s936_s6 }
  0x33   : > { %646 = vrot.lane.b32.xlu2 %v408_v12, %s937_s7 }
  0x3b   : > { %644 = vrot.lane.b32.xlu2 %v403_v16, %s937_s7 }
  0x43   : > { %479 = vrot.lane.b32.xlu2 %v1027_v36, %s935_s30 }
  0x6d   : > { %v410_v28 = vpop.permute.xlu2 %409 }
  0x6e   : > { %v415_v37 = vsel %vm294_vm0, %v410_v28, 0 }
  0x6f   : > { %424 = vmatpush.bf16.xpose.msrb.mxu2 %v415_v37 }
  0x75   : > { %v434_v39 = vpop.permute.xlu2 %433 }
  0x76   : > { %v436_v40 = vsel %vm294_vm0, %v434_v39, 0 }
  0x77   : > { %445 = vmatpush.bf16.xpose.msrb.mxu3 %v436_v40 }
  0x7d   : > { %v554_v44 = vpop.permute.xlu2 %553 }
  0x7e   : > { %v556_v50 = vsel %vm294_vm0, %v554_v44, 0 }
  0x85   : > { %v531_v51 = vpop.permute.xlu2 %530 }
  0x8d   : > { %v647_v55 = vpop.permute.xlu2 %646 }
  0x8e   : > { %v652_v57 = vsel %vm294_vm0, %v647_v55, 0 }
  0x94   : > { %v310_v5 = vpop.f32.mrf.mxu0 }
  0x95   : > { %v326_v6 = vpop.f32.mrf.mxu1  ;;  %v331_v7 = vsel %vm330_vm1, %v310_v5, -inf  ;;  %v645_v59 = vpop.permute.xlu2 %644 }
  0x96   : > { %332 = vmax.xlane.f32.xlu0 %v331_v7  ;;  %v334_v8 = vsel %vm330_vm1, %v326_v6, -inf }
  0x9c   : > { %v312_v9 = vpop.f32.mrf.mxu0 }
  0x9d   : > { %v328_v10 = vpop.f32.mrf.mxu1  ;;  %v480_v7 = vpop.permute.xlu2 %479 }
  0x9e   : > { %335 = vmax.xlane.f32.xlu0 %v334_v8  ;;  %v485_v8 = vand.u32 %v480_v7, %v1024_v34 }
  0xa0   : > { %494 = vmatpush.bf16.msrb.mxu0 %v485_v8 }
  0xb2   : > { %404 = vrot.lane.b32.xlu0 %v403_v16, %s935_s30 }
  0xba   : > { %667 = vrot.lane.b32.xlu0 %v432_v14, %s937_s7 }
 0x109   : > { %v333_v17 = vpop.xlane.xlu0 %332 }
 0x111   : > { %v336_v18 = vpop.xlane.xlu0 %335 }
 0x112   : > { %v337_v19 = vmax.f32 %v333_v17, %v336_v18 }
 0x114   : > { %v338_v20 = vsub.f32 %v310_v5, %v337_v19  ;;  %v341_v22 = vsub.f32 %v326_v6, %v337_v19 }
 0x116   : > { %v339_v21 = vmul.f32 1.442695, %v338_v20  ;;  %v342_v23 = vmul.f32 1.442695, %v341_v22 }
 0x118   : > { %903 = vpow2.f32 %v339_v21  ;;  %v501_v21 = vunpack.c.l.b16 %v1022_v33 }
 0x119   : > { %905 = vpow2.f32 %v342_v23 }
 0x11a   : > { %v502_v22 = vpack.c.b16 %v501_v21, %v501_v21 }
 0x11e   : > { %v904_v24 = vpop.eup %903 }
 0x11f   : > { %v344_v25 = vsel %vm330_vm1, %v904_v24, 0.0  ;;  %v906_v26 = vpop.eup %905 }
 0x120   : > { %345 = vadd.xlane.f32.xlu1 %v344_v25  ;;  %v347_v27 = vsel %vm330_vm1, %v906_v26, 0.0 }
 0x124   : > { %v405_v52 = vpop.permute.xlu0 %404 }
 0x128   : > { %348 = vadd.xlane.f32.xlu1 %v347_v27 }
 0x12c   : > { %v668_v56 = vpop.permute.xlu0 %667 }
 0x12d   : > { %v670_v58 = vsel %vm294_vm0, %v668_v56, 0 }
 0x141   : > { %532 = vrot.lane.b32.xlu1 %v408_v12, %s936_s6 }
 0x193   : > { %v346_v41 = vpop.xlane.xlu1 %345 }
 0x19b   : > { %v349_v42 = vpop.xlane.xlu1 %348 }
 0x19c   : > { %v350_v43 = vadd.f32 %v349_v42, %v346_v41 }
 0x19e   : > { %907 = vrcp.f32 %v350_v43 }
 0x1a4   : > { %v908_v45 = vpop.eup %907 }
 0x1a5   : > { %v354_v46 = vmul.f32 %v908_v45, %v906_v26  ;;  %v352_v47 = vmul.f32 %v908_v45, %v904_v24 }
 0x1a7   : > { %v355_v48 = vpack.c.bf16 %v354_v46, %v354_v46  ;;  %v353_v49 = vpack.c.bf16 %v352_v47, %v352_v47 }
 0x1a9   : > { %872 = vmatmul.msk.bf16.vlgmr.msra.gmra.mxu2 %vm356_vm4, %v355_v48  ;;  %873 = vmatmul.msk.bf16.vlgmr.msra.gmra.mxu3 %vm356_vm4, %v353_v49 }
 0x1aa   : > { %565 = vmatpush.bf16.xpose.msra.mxu3 %v556_v50 }
 0x1b3   : > { %v533_v53 = vpop.permute.xlu1 %532 }
 0x1b4   : > { %v538_v54 = vsel %vm294_vm0, %v533_v53, 0 }
 0x1b5   : > { %547 = vmatpush.bf16.xpose.msra.mxu2 %v538_v54 }
 0x1b9   : > { %874 = vmatmul.msk.bf16.vlgmr.msrb.gmra.mxu2 %vm294_vm0, %v405_v52  ;;  %875 = vmatmul.msk.bf16.vlgmr.msrb.gmra.mxu3 %vm294_vm0, %v405_v52 }
 0x1ba   : > { %679 = vmatpush.bf16.xpose.msrb.mxu3 %v670_v58 }
 0x1bd   : > { %661 = vmatpush.bf16.xpose.msrb.mxu2 %v652_v57 }
 0x1c9   : > { %878 = vmatmul.msk.bf16.vlgmr.msra.gmra.mxu2 %vm294_vm0, %v531_v51  ;;  %879 = vmatmul.msk.bf16.vlgmr.msra.gmra.mxu3 %vm294_vm0, %v531_v51 }
 0x1d9   : > { %882 = vmatmul.msk.bf16.vlgmr.msrb.gmra.mxu2 %vm294_vm0, %v645_v59  ;;  %883 = vmatmul.msk.bf16.vlgmr.msrb.gmra.mxu3 %vm294_vm0, %v645_v59 }
 0x22c   : > { %v376_v60 = vpop.f32.mrf.mxu2  ;;  %v395_v61 = vpop.f32.mrf.mxu3 }
 0x22d   : > { %v396_v62 = vadd.f32 %v395_v61, %v376_v60 }
 0x22f   : > { %400 = vst.msk [vmem:[%s1051_s17] sm:$0x1f] %vm399_vm5, %v396_v62 }
 0x234   : > { %v378_v63 = vpop.f32.mrf.mxu2  ;;  %v397_v0 = vpop.f32.mrf.mxu3 }
 0x23c   : > { %v426_v1 = vpop.f32.mrf.mxu2  ;;  %v447_v2 = vpop.f32.mrf.mxu3 }
 0x23d   : > { %v454_v3 = vsel %vm330_vm1, %v447_v2, -inf  ;;  %v451_v4 = vsel %vm330_vm1, %v426_v1, -inf }
 0x23e   : > { %455 = vmax.xlane.f32.xlu0 %v454_v3  ;;  %452 = vmax.xlane.f32.xlu1 %v451_v4 }
 0x244   : > { %v428_v5 = vpop.f32.mrf.mxu2  ;;  %v449_v6 = vpop.f32.mrf.mxu3 }
 0x24c   : > { %v549_v9 = vpop.f32.mrf.mxu2  ;;  %v567_v10 = vpop.f32.mrf.mxu3 }
 0x24d   : > { %v574_v11 = vsel %vm330_vm1, %v567_v10, -inf  ;;  %v571_v12 = vsel %vm330_vm1, %v549_v9, -inf }
 0x24e   : > { %575 = vmax.xlane.f32.xlu1 %v574_v11  ;;  %572 = vmax.xlane.f32.xlu2 %v571_v12 }
 0x254   : > { %v551_v13 = vpop.f32.mrf.mxu2  ;;  %v569_v14 = vpop.f32.mrf.mxu3 }
 0x25c   : > { %v663_v15 = vpop.f32.mrf.mxu2  ;;  %v681_v16 = vpop.f32.mrf.mxu3 }
 0x25d   : > { %v685_v17 = vsel %vm330_vm1, %v663_v15, -inf  ;;  %v688_v18 = vsel %vm330_vm1, %v681_v16, -inf }
 0x25e   : > { %686 = vmax.xlane.f32.xlu0 %v685_v17  ;;  %689 = vmax.xlane.f32.xlu2 %v688_v18 }
 0x264   : > { %v665_v19 = vpop.f32.mrf.mxu2  ;;  %v683_v20 = vpop.f32.mrf.mxu3 }
 0x272   : > { %596 = vrot.lane.b32.xlu0 %v1027_v36, %s936_s6 }
 0x276   : > { %617 = vrot.lane.b32.xlu2 %v502_v22, %s936_s6 }
 0x2b1   : > { %v453_v23 = vpop.xlane.xlu1 %452  ;;  %v456_v24 = vpop.xlane.xlu0 %455 }
 0x2b2   : > { %v457_v25 = vmax.f32 %v453_v23, %v456_v24 }
 0x2b4   : > { %v458_v26 = vsub.f32 %v426_v1, %v457_v25  ;;  %v461_v27 = vsub.f32 %v447_v2, %v457_v25 }
 0x2b6   : > { %v459_v28 = vmul.f32 1.442695, %v458_v26  ;;  %v462_v29 = vmul.f32 1.442695, %v461_v27 }
 0x2b8   : > { %909 = vpow2.f32 %v459_v28 }
 0x2b9   : > { %911 = vpow2.f32 %v462_v29 }
 0x2be   : > { %v910_v30 = vpop.eup %909 }
 0x2bf   : > { %v912_v31 = vpop.eup %911  ;;  %v464_v32 = vsel %vm330_vm1, %v910_v30, 0.0 }
 0x2c0   : > { %v467_v33 = vsel %vm330_vm1, %v912_v31, 0.0  ;;  %465 = vadd.xlane.f32.xlu1 %v464_v32 }
 0x2c1   : > { %468 = vadd.xlane.f32.xlu0 %v467_v33  ;;  %v576_v35 = vpop.xlane.xlu1 %575  ;;  %v573_v37 = vpop.xlane.xlu2 %572 }
 0x2c2   : > { %v577_v38 = vmax.f32 %v573_v37, %v576_v35 }
 0x2c4   : > { %v578_v39 = vsub.f32 %v549_v9, %v577_v38  ;;  %v581_v41 = vsub.f32 %v567_v10, %v577_v38 }
 0x2c6   : > { %v579_v40 = vmul.f32 1.442695, %v578_v39  ;;  %v582_v42 = vmul.f32 1.442695, %v581_v41 }
 0x2c8   : > { %913 = vpow2.f32 %v579_v40 }
 0x2c9   : > { %915 = vpow2.f32 %v582_v42 }
 0x2ce   : > { %v914_v43 = vpop.eup %913 }
 0x2cf   : > { %v584_v44 = vsel %vm330_vm1, %v914_v43, 0.0  ;;  %v916_v48 = vpop.eup %915 }
 0x2d0   : > { %585 = vadd.xlane.f32.xlu0 %v584_v44  ;;  %v587_v51 = vsel %vm330_vm1, %v916_v48, 0.0 }
 0x2d1   : > { %v690_v45 = vpop.xlane.xlu2 %689  ;;  %v687_v46 = vpop.xlane.xlu0 %686 }
 0x2d2   : > { %v691_v47 = vmax.f32 %v687_v46, %v690_v45 }
 0x2d4   : > { %v695_v49 = vsub.f32 %v681_v16, %v691_v47  ;;  %v692_v56 = vsub.f32 %v663_v15, %v691_v47 }
 0x2d6   : > { %v696_v50 = vmul.f32 1.442695, %v695_v49  ;;  %v693_v57 = vmul.f32 1.442695, %v692_v56 }
 0x2d8   : > { %588 = vadd.xlane.f32.xlu0 %v587_v51  ;;  %917 = vpow2.f32 %v696_v50 }
 0x2d9   : > { %503 = vrot.lane.b32.xlu1 %v502_v22, %s935_s30  ;;  %919 = vpow2.f32 %v693_v57 }
 0x2de   : > { %v918_v52 = vpop.eup %917 }
 0x2df   : > { %v701_v53 = vsel %vm330_vm1, %v918_v52, 0.0  ;;  %v920_v58 = vpop.eup %919 }
 0x2e0   : > { %702 = vadd.xlane.f32.xlu2 %v701_v53  ;;  %v698_v59 = vsel %vm330_vm1, %v920_v58, 0.0 }
 0x2e4   : > { %v597_v54 = vpop.permute.xlu0 %596 }
 0x2e5   : > { %v602_v55 = vand.u32 %v597_v54, %v1024_v34 }
 0x2e7   : > { %611 = vmatpush.bf16.msra.mxu0 %v602_v55 }
 0x2ec   : > { %710 = vrot.lane.b32.xlu0 %v1027_v36, %s937_s7  ;;  %v618_v36 = vpop.permute.xlu2 %617 }
 0x2ed   : > { %v623_v8 = vand.u32 %v618_v36, %v1024_v34 }
 0x2f4   : > { %731 = vrot.lane.b32.xlu0 %v502_v22, %s937_s7 }
 0x303   : > { %699 = vadd.xlane.f32.xlu1 %v698_v59 }
 0x333   : > { %v466_v60 = vpop.xlane.xlu1 %465 }
 0x334   : > { %v469_v61 = vpop.xlane.xlu0 %468 }
 0x335   : > { %v470_v62 = vadd.f32 %v469_v61, %v466_v60 }
 0x337   : > { %921 = vrcp.f32 %v470_v62 }
 0x33d   : > { %v922_v63 = vpop.eup %921 }
 0x33e   : > { %v474_v0 = vmul.f32 %v922_v63, %v912_v31  ;;  %v472_v5 = vmul.f32 %v922_v63, %v910_v30 }
 0x340   : > { %v475_v1 = vpack.c.bf16 %v474_v0, %v474_v0  ;;  %v473_v9 = vpack.c.bf16 %v472_v5, %v472_v5 }
 0x342   : > { %876 = vmatmul.msk.bf16.vlgmr.msrb.gmra.mxu0 %vm356_vm4, %v475_v1 }
 0x343   : > { %v586_v2 = vpop.xlane.xlu0 %585 }
 0x34b   : > { %v504_v3 = vpop.permute.xlu1 %503  ;;  %v589_v4 = vpop.xlane.xlu0 %588 }
 0x34c   : > { %v509_v6 = vand.u32 %v504_v3, %v1024_v34  ;;  %v590_v7 = vadd.f32 %v589_v4, %v586_v2 }
 0x34e   : > { %923 = vrcp.f32 %v590_v7  ;;  %518 = vmatpush.bf16.msrb.mxu1 %v509_v6 }
 0x351   : > { %877 = vmatmul.msk.bf16.vlgmr.msrb.gmra.mxu1 %vm356_vm4, %v473_v9 }
 0x352   : > { %632 = vmatpush.bf16.msra.mxu1 %v623_v8 }
 0x353   : > { %v703_v19 = vpop.xlane.xlu2 %702 }
 0x354   : > { %v924_v10 = vpop.eup %923 }
 0x355   : > { %v594_v11 = vmul.f32 %v924_v10, %v916_v48  ;;  %v592_v13 = vmul.f32 %v924_v10, %v914_v43 }
 0x357   : > { %v595_v12 = vpack.c.bf16 %v594_v11, %v594_v11  ;;  %v593_v15 = vpack.c.bf16 %v592_v13, %v592_v13 }
 0x359   : > { %880 = vmatmul.msk.bf16.vlgmr.msra.gmra.mxu0 %vm356_vm4, %v595_v12 }
 0x35e   : > { %v711_v14 = vpop.permute.xlu0 %710 }
 0x35f   : > { %v716_v16 = vand.u32 %v711_v14, %v1024_v34 }
 0x361   : > { %881 = vmatmul.msk.bf16.vlgmr.msra.gmra.mxu1 %vm356_vm4, %v593_v15  ;;  %725 = vmatpush.bf16.msrb.mxu0 %v716_v16 }
 0x366   : > { %v732_v17 = vpop.permute.xlu0 %731 }
 0x367   : > { %v737_v18 = vand.u32 %v732_v17, %v1024_v34 }
 0x369   : > { %746 = vmatpush.bf16.msrb.mxu1 %v737_v18 }
 0x376   : > { %v700_v20 = vpop.xlane.xlu1 %699 }
 0x377   : > { %v704_v21 = vadd.f32 %v703_v19, %v700_v20 }
 0x379   : > { %925 = vrcp.f32 %v704_v21 }
 0x37f   : > { %v926_v22 = vpop.eup %925 }
 0x380   : > { %v706_v23 = vmul.f32 %v926_v22, %v920_v58  ;;  %v708_v24 = vmul.f32 %v926_v22, %v918_v52 }
 0x382   : > { %v707_v25 = vpack.c.bf16 %v706_v23, %v706_v23  ;;  %v709_v26 = vpack.c.bf16 %v708_v24, %v708_v24 }
 0x384   : > { %884 = vmatmul.msk.bf16.vlgmr.msrb.gmra.mxu0 %vm356_vm4, %v709_v26  ;;  %885 = vmatmul.msk.bf16.vlgmr.msrb.gmra.mxu1 %vm356_vm4, %v707_v25 }
 0x3bf   : > { %v496_v27 = vpop.f32.mrf.mxu0 }
 0x3c7   : > { %v498_v28 = vpop.f32.mrf.mxu0 }
 0x3ce   : > { %v520_v29 = vpop.f32.mrf.mxu1 }
 0x3cf   : > { %v521_v30 = vadd.f32 %v520_v29, %v496_v27 }
 0x3d1   : > { %525 = vrot.lane.b32.xlu0 %v521_v30, %s939_s19 }
 0x3d6   : > { %v522_v34 = vpop.f32.mrf.mxu1  ;;  %v613_v31 = vpop.f32.mrf.mxu0 }
 0x3de   : > { %v615_v32 = vpop.f32.mrf.mxu0  ;;  %v634_v33 = vpop.f32.mrf.mxu1 }
 0x3df   : > { %v635_v35 = vadd.f32 %v634_v33, %v613_v31 }
 0x3e1   : > { %639 = vrot.lane.b32.xlu0 %v635_v35, %s940_s20 }
 0x3e6   : > { %v636_v37 = vpop.f32.mrf.mxu1 }
 0x401   : > { %v727_v38 = vpop.f32.mrf.mxu0  ;;  %v748_v39 = vpop.f32.mrf.mxu1 }
 0x402   : > { %v749_v40 = vadd.f32 %v748_v39, %v727_v38 }
 0x404   : > { %753 = vrot.lane.b32.xlu1 %v749_v40, %s941_s21 }
 0x409   : > { %v729_v41 = vpop.f32.mrf.mxu0  ;;  %v750_v42 = vpop.f32.mrf.mxu1 }
 0x443   : > { %v526_v43 = vpop.permute.xlu0 %525 }
 0x444   : > { %529 = vst.msk [vmem:[%s1051_s17] sm:$0x1f] %vm528_vm6, %v526_v43 }
 0x453   : > { %v640_v44 = vpop.permute.xlu0 %639 }
 0x454   : > { %643 = vst.msk [vmem:[%s1051_s17] sm:$0x1f] %vm642_vm7, %v640_v44 }
 0x476   : > { %v754_v45 = vpop.permute.xlu1 %753 }
 0x477   : > { %757 = vst.msk [vmem:[%s1051_s17] sm:$0x1f] %vm756_vm8, %v754_v45 }
 0x478 PF: > { %s15_s18 = sadd.s32 1, %s933_s18  }
 0x479   : > { %p12_p4 = scmp.ge.s32.totalorder %s15_s18, 4  }
 0x47b   :  { %14 = sbr.rel (!%p12_p4) target bundleno = 1 (0x1), region = 82 }

// kernel: _lambda_.20
= control target key start
LH: loop header
LB: loop body
LE: loop exit
PB: predicated region body
PF: predicated region fallthrough
CT: control target
= control target key end

     0   :  { %13 = vsyncpa [#allocation3], 0  ;;  %vm27_vm0 = vcmask 257024   ;;  %s313_s0 = inlined_call_operand.vmem [shape: f32[4,32], index: 0, kind: input, shape index: {}]   ;;  %s314_s1 = inlined_call_operand.vmem [shape: f32[1,32], index: 1, kind: input, shape index: {}]   ;;  %s315_s2 = inlined_call_operand.vmem [shape: f32[1,32], index: 2, kind: input, shape index: {}]   ;;  %s316_s3 = inlined_call_operand.vmem [shape: bf16[32,96], index: 3, kind: input, shape index: {}]   ;;  %s317_s4 = inlined_call_operand.vmem [shape: f32[1,96], index: 4, kind: input, shape index: {}]   ;;  %s318_s5 = inlined_call_operand.vmem [shape: bf16[4,32], index: 5, kind: output, shape index: {0}]   ;;  %s319_s6 = inlined_call_operand.hbm [shape: bf16[4,32], index: 6, kind: output, shape index: {1}]   ;;  %s320_s7 = inlined_call_operand.hbm [shape: bf16[4,32], index: 7, kind: output, shape index: {2}]  }
   0x1   :  { %v26_v0 = vld [vmem:[%s313_s0] sm:$0xf] }
   0x2   :  { %v28_v1 = vsel %vm27_vm0, %v26_v0, 0.0 }
   0x3   :  { %29 = vadd.xlane.f32.xlu0 %v28_v1 }
   0x4   :  { %14 = vsyncpa [#allocation5], 0  ;;  %v236_v2 = vmov 32.0   ;;  %v171_v14 = vld [vmem:[%s316_s3 + $0x8] sm:$0xff]  ;;  %v170_v15 = vld [vmem:[%s316_s3] sm:$0xff]  ;;  %vm88_vm5 = vcmask 261120  }
   0x5   :  { %180 = vrcp.f32 %v236_v2  ;;  %98 = vmatpush.bf16.msra.mxu0 %v171_v14  ;;  %v177_v25 = vld [vmem:[%s314_s1] ss:$0 sm:$0xff]  ;;  %vm112_vm6 = vcmask 1041408   ;;  %vm107_vm7 = vcmask 254976   ;;  %s237_s11 = smov 96   ;;  %s238_s12 = smov 64  }
   0x6   :  { %v178_v28 = vld [vmem:[%s315_s2] ss:$0 sm:$0xff]  ;;  %s134_s16 = sshll.u32 %s319_s6, 4  ;;  %s240_s17 = smov [#allocation4]   ;;  %s135_s16 = int_to_ptr.hbm [resolvable:$true] %s134_s16 }
   0x7   :  { %v179_v32 = vld [vmem:[%s317_s4] ss:$0 sm:$0xff]  ;;  %s239_s4 = smov [#allocation2]   ;;  %s143_s18 = sshll.u32 %s240_s17, 4  ;;  %s144_s18 = int_to_ptr.vmem [resolvable:$true] %s143_s18 }
   0x8   :  { %s132_s13 = sshll.u32 %s239_s4, 4  ;;  %s145_s20 = sshll.u32 %s320_s7, 4  ;;  %s133_s13 = int_to_ptr.vmem [resolvable:$true] %s132_s13  ;;  %s146_s20 = int_to_ptr.hbm [resolvable:$true] %s145_s20 }
   0x9   :  { %99 = vmatpush.bf16.msra.mxu0 %v170_v15 }
   0xb   :  { %v181_v3 = vpop.eup %180 }
   0xc   :  { %v32_v4 = vmul.f32 32.0, %v181_v3  ;;  %vm36_vm1 = vweird.f32 %v181_v3 }
   0xe   :  { %v33_v5 = vsub.f32 1.0, %v32_v4 }
  0x10   :  { %v34_v6 = vmul.f32 %v181_v3, %v33_v5 }
  0x12   :  { %v35_v7 = vadd.f32 %v181_v3, %v34_v6 }
  0x14   :  { %v37_v8 = vsel %vm36_vm1, %v181_v3, %v35_v7 }
  0x76   :  { %v30_v9 = vpop.xlane.xlu0 %29 }
  0x77   :  { %v38_v10 = vmul.f32 %v37_v8, %v30_v9 }
  0x79   :  { %v39_v11 = vsub.f32 %v26_v0, %v38_v10 }
  0x7b   :  { %v40_v12 = vmul.f32 %v39_v11, %v39_v11 }
  0x7d   :  { %v41_v13 = vsel %vm27_vm0, %v40_v12, 0.0 }
  0x7e   :  { %42 = vadd.xlane.f32.xlu0 %v41_v13 }
  0xf1   :  { %v43_v16 = vpop.xlane.xlu0 %42 }
  0xf2   :  { %v44_v17 = vmul.f32 %v43_v16, %v37_v8 }
  0xf4   :  { %v45_v18 = vadd.f32 1e-05, %v44_v17 }
  0xf6   :  { %182 = vrsqrt.f32 %v45_v18  ;;  %vm52_vm3 = vweird.f32 %v45_v18 }
  0xfc   :  { %v183_v19 = vpop.eup %182 }
  0xfd   :  { %v47_v20 = vmul.f32 %v183_v19, %v45_v18  ;;  %vm53_vm2 = vweird.f32 %v183_v19 }
  0xfe   :  { %vm54_vm4 = vmor %vm52_vm3, %vm53_vm2 }
  0xff   :  { %v48_v21 = vmul.f32 %v183_v19, %v47_v20 }
 0x101   :  { %v49_v22 = vmul.f32 0.5, %v48_v21 }
 0x103   :  { %v50_v23 = vsub.f32 1.5, %v49_v22 }
 0x105   :  { %v51_v24 = vmul.f32 %v183_v19, %v50_v23 }
 0x107   :  { %v55_v26 = vsel %vm54_vm4, %v183_v19, %v51_v24 }
 0x108   :  { %v56_v27 = vmul.f32 %v55_v26, %v39_v11 }
 0x10a   :  { %v61_v29 = vmul.f32 %v177_v25, %v56_v27 }
 0x10c   :  { %v66_v30 = vadd.f32 %v178_v28, %v61_v29 }
 0x10e   :  { %v67_v31 = vpack.c.bf16 %v66_v30, %v66_v30 }
 0x110   :  { %169 = vmatmul.msk.bf16.vlgmr.msra.gmra.mxu0 %vm88_vm5, %v67_v31 }
 0x18d   :  { %v101_v33 = vpop.f32.mrf.mxu0 }
 0x18e   :  { %v102_v34 = vadd.f32 %v179_v32, %v101_v33 }
 0x190   :  { %v105_v35 = vmul.f32 0.35355338, %v102_v34  ;;  %v109_v36 = vpack.c.bf16 %v102_v34, %v102_v34 }
 0x192   :  { %v106_v37 = vpack.c.bf16 %v105_v35, %v105_v35  ;;  %v111_v38 = vrot.slane %v109_v36, 2 }
 0x194   :  { %v115_v39 = vsel %vm112_vm6, %v109_v36, %v111_v38  ;;  %108 = vst.msk [vmem:[%s318_s5] sm:$0x3] %vm107_vm7, %v106_v37 }
 0x195   :  { %v103_v40 = vpop.f32.mrf.mxu0  ;;  %117 = vrot.lane.b32.xlu1 %v115_v39, %s237_s11 }
 0x19d   :  { %121 = vrot.lane.b32.xlu1 %v115_v39, %s238_s12 }
 0x207   :  { %v118_v41 = vpop.permute.xlu1 %117 }
 0x208   :  { %120 = vst.msk [vmem:[#allocation2] sm:$0x3] %vm107_vm7, %v118_v41 }
 0x209   :  { %137 = dma.vmem_to_hbm [thread:$0]  %s133_s13, 32, %s135_s16, [#allocation3]  }
 0x20f   :  { %v122_v42 = vpop.permute.xlu1 %121 }
 0x210   :  { %124 = vst.msk [vmem:[#allocation4] sm:$0x3] %vm107_vm7, %v122_v42 }
 0x211   :  { %148 = dma.vmem_to_hbm [thread:$0]  %s144_s18, 32, %s146_s20, [#allocation5]  }
 0x212   :  { %232 = dma.done.wait [#allocation3], 32  }
 0x213   :  { %233 = vsyncadd [#allocation3], 4294967264 }
 0x214   :  { %234 = dma.done.wait [#allocation5], 32  }
 0x215   :  { %235 = vsyncadd [#allocation5], 4294967264 }
 0x216   :  { %159 = vsyncpa [#allocation3], 1 }
 0x217   :  { %160 = vsyncpa [#allocation5], 1 }

// kernel: _lambda_.22
= control target key start
LH: loop header
LB: loop body
LE: loop exit
PB: predicated region body
PF: predicated region fallthrough
CT: control target
= control target key end

     0   :  { %10 = vsyncpa [#allocation3], 0  ;;  %s948_s0 = inlined_call_operand.vmem [shape: bf16[2,2,32], index: 0, kind: input, shape index: {}]   ;;  %s949_s1 = inlined_call_operand.vmem [shape: bf16[2,5,32], index: 1, kind: input, shape index: {}]   ;;  %s950_s2 = inlined_call_operand.vmem [shape: bf16[2,5,32], index: 2, kind: input, shape index: {}]   ;;  %s951_s3 = inlined_call_operand.vmem [shape: f32[2,2,32], index: 3, kind: output, shape index: {0}]   ;;  %s952_s4 = inlined_call_operand.hbm [shape: f32[2,1,5], index: 4, kind: output, shape index: {1}]  }
   0x1   :  { %12 = vsyncpa [#allocation3 + $0x1], 0  ;;  %s799_s15 = smov 0   ;;  %s801_s16 = smov 0  }
   0x2   :  { %s803_s17 = smov 0   ;;  %s805_s18 = smov 0  }
   0x3 LB: > { %s820_s19 = sadd.s32 4294967295, %s765_s18   ;;  %s624_s20 = sadd.s32 4294967294, %s765_s18   ;;  %s765_s18 = sphi %s805_s18, %s958_s18   ;;  %s761_s17 = sphi %s803_s17, %s957_s17   ;;  %s757_s16 = sphi %s801_s16, %s956_s16   ;;  %s753_s15 = sphi %s799_s15, %s955_s15  }
   0x4   : > { %s824_s21 = sadd.s32 1, %s765_s18   ;;  %s129_s22 = sadd.s32 1, %s761_s17 }
   0x5   : > { %s126_s23 = ssub.s32 %s765_s18, %s824_s21  ;;  %p139_p0 = scmp.ne.s32.totalorder %s761_s17, %s757_s16 }
   0x6   : > { %p127_p1 = scmp.eq.s32.totalorder %s126_s23, 0  ;;  %p140_p2 = scmp.eq.s32.totalorder %s820_s19, 1 }
   0x7   : > { %p145_p3 = scmp.ne.s32.totalorder %s757_s16, %s753_s15  ;;  %p146_p4 = scmp.eq.s32.totalorder %s624_s20, 1 }
   0x8   : > { %s835_s24 = scalar_select %p127_p1, %s761_s17, %s129_s22  }
   0x9   : > { %p837_p5 = por %p140_p2, %p139_p0  ;;  %p841_p6 = por %p146_p4, %p145_p3 }
   0xa   : > { %p627_p7 = scmp.ge.s32.totalorder %s765_s18, 1  ;;  %p184_p8 = scmp.lt.s32.totalorder %s765_s18, 3 }
   0xc   : > { %p185_p9 = pnand %p627_p7, %p184_p8 }
   0xd   : > { %p219_p10 = scmp.lt.s32.totalorder (!%p185_p9), %s820_s19, 1  ;;  %s767_s9 = smov (!%p185_p9), 112  }
   0xe   : > { %188 = sbr.rel (%p185_p9) target bundleno = 1084 (0x43c), region = 32  ;;  %s768_s10 = smov (!%p185_p9), 104  }
   0xf   : > { %s769_s11 = smov (!%p185_p9), 120   ;;  %s771_s30 = smov (!%p185_p9), 8  }
  0x10   : > { %s520_s7 = scalar_lea.hbm (!%p185_p9), %s952_s4, %s820_s19 }
  0x13   : > { %s849_s27 = scalar_select %p219_p10, %s820_s19, 1  ;;  %vm238_vm0 = vcmask 64512   ;;  %vm258_vm1 = vcmask 33792   ;;  %vm275_vm2 = vcmask 1041408   ;;  %vm276_vm3 = vcmask 1042432  }
  0x14   : > { %v770_v22 = vmov 65535   ;;  %vm271_vm4 = vcmask 39936   ;;  %vm295_vm5 = vcmask 58368   ;;  %vm502_vm6 = vcmask 32768  }
  0x15   : > { %s628_s28 = sshll.u32 %s849_s27, 2  ;;  %s221_s5 = scalar_lea.vmem %s948_s0, %s849_s27  ;;  %v277_v23 = vsel %vm275_vm2, 4294967295, %v770_v22 }
  0x16   : > { %s225_s8 = scalar_lea.vmem %s949_s1, %s628_s28  ;;  %v235_v0 = vld [vmem:[%s221_s5] sm:$0x1]  ;;  %s229_s14 = scalar_lea.vmem %s950_s2, %s628_s28  ;;  %v878_v24 = vsel %vm276_vm3, %v277_v23, 0 }
  0x17   : > { %v236_v1 = vld [vmem:[%s225_s8] sm:$0x7]  ;;  %297 = vst [vmem:[#allocation1] ss:$9 sm:$0xff] %v235_v0  ;;  %s630_s20 = sshll.u32 %s849_s27, 1  ;;  %s217_s27 = sand.u32 1, %s757_s16  }
  0x18   : > { %v243_v2 = vsel %vm238_vm0, %v236_v1, 0  ;;  %v303_v3 = vunpack.c.l.b16 %v236_v1  ;;  %v237_v21 = vld [vmem:[%s229_s14] sm:$0x7]  ;;  %s895_s28 = scalar_lea.vmem %s951_s3, %s630_s20  ;;  %s218_s29 = scalar_lea.vmem [#allocation2], %s217_s27 }
  0x19   : > { %252 = vmatpush.bf16.xpose.msra.mxu0 %v243_v2  ;;  %v280_v25 = vand.u32 %v878_v24, %v237_v21  ;;  %v339_v45 = vunpack.c.l.b16 %v237_v21  ;;  %s522_s8 = sshll.u32 %s218_s29, 4  ;;  %s723_s20 = scalar_lea.hbm %s952_s4, 2  ;;  %s523_s8 = int_to_ptr.vmem [resolvable:$true] %s522_s8 }
  0x1a   : > { %v304_v5 = vpack.c.b16 %v303_v3, %v303_v3 }
  0x1b   : > { %289 = vmatpush.bf16.msra.mxu1 %v280_v25  ;;  %v340_v46 = vpack.c.b16 %v339_v45, %v339_v45 }
  0x1c   : > { %374 = vrot.lane.b32.xlu2 %v304_v5, %s767_s9 }
  0x1e   : > { %v298_v4 = vld [vmem:[#allocation1] sm:$0xff] }
  0x1f   : > { %369 = vst [vmem:[#allocation1] ss:$9 sm:$0xff] %v235_v0 }
  0x20   : > { %631 = vmatmul.msk.bf16.vlgmr.msra.gmra.mxu0 %vm238_vm0, %v235_v0 }
  0x24   : > { %440 = vrot.lane.b32.xlu2 %v304_v5, %s768_s10 }
  0x26   : > { %v370_v6 = vld [vmem:[#allocation1] sm:$0xff] }
  0x27   : > { %435 = vst [vmem:[#allocation1] ss:$9 sm:$0xff] %v235_v0 }
  0x2c   : > { %372 = vrot.lane.b32.xlu2 %v370_v6, %s767_s9 }
  0x2e   : > { %v436_v7 = vld [vmem:[#allocation1] sm:$0xff] }
  0x34   : > { %438 = vrot.lane.b32.xlu2 %v436_v7, %s768_s10 }
  0x76   : > { %v375_v11 = vpop.permute.xlu2 %374 }
  0x77   : > { %v380_v26 = vsel %vm238_vm0, %v375_v11, 0 }
  0x78   : > { %389 = vmatpush.bf16.xpose.msrb.mxu1 %v380_v26 }
  0x7e   : > { %v441_v12 = vpop.permute.xlu2 %440 }
  0x7f   : > { %v446_v17 = vsel %vm238_vm0, %v441_v12, 0 }
  0x80   : > { %455 = vmatpush.bf16.xpose.msrb.mxu0 %v446_v17 }
  0x86   : > { %v373_v16 = vpop.permute.xlu2 %372 }
  0x8e   : > { %v439_v20 = vpop.permute.xlu2 %438 }
  0x8f   : > { %637 = vmatmul.msk.bf16.vlgmr.msrb.gmra.mxu0 %vm238_vm0, %v439_v20 }
  0x9d   : > { %v254_v8 = vpop.f32.mrf.mxu0 }
  0x9e   : > { %v259_v9 = vsel %vm258_vm1, %v254_v8, -inf }
  0x9f   : > { %260 = vmax.xlane.f32.xlu0 %v259_v9 }
  0xa5   : > { %v256_v10 = vpop.f32.mrf.mxu0 }
  0xb3   : > { %305 = vrot.lane.b32.xlu0 %v304_v5, %s769_s11 }
 0x10c   : > { %v457_v33 = vpop.f32.mrf.mxu0 }
 0x10d   : > { %v461_v34 = vsel %vm258_vm1, %v457_v33, -inf }
 0x112   : > { %v261_v13 = vpop.xlane.xlu0 %260 }
 0x113   : > { %v262_v14 = vsub.f32 %v254_v8, %v261_v13 }
 0x114   : > { %v459_v35 = vpop.f32.mrf.mxu0 }
 0x115   : > { %v263_v15 = vmul.f32 1.442695, %v262_v14 }
 0x117   : > { %687 = vpow2.f32 %v263_v15 }
 0x11d   : > { %v688_v18 = vpop.eup %687 }
 0x11e   : > { %v265_v19 = vsel %vm258_vm1, %v688_v18, 0.0 }
 0x11f   : > { %266 = vadd.xlane.f32.xlu1 %v265_v19 }
 0x125   : > { %v306_v27 = vpop.permute.xlu0 %305 }
 0x126   : > { %v311_v28 = vsel %vm238_vm0, %v306_v27, 0 }
 0x127   : > { %320 = vmatpush.bf16.xpose.msra.mxu2 %v311_v28 }
 0x138   : > { %300 = vrot.lane.b32.xlu1 %v298_v4, %s769_s11 }
 0x162   : > { %462 = vmax.xlane.f32.xlu1 %v461_v34 }
 0x192   : > { %v267_v29 = vpop.xlane.xlu1 %266 }
 0x193   : > { %689 = vrcp.f32 %v267_v29 }
 0x199   : > { %v690_v30 = vpop.eup %689 }
 0x19a   : > { %v883_v31 = vmul.f32 %v690_v30, %v688_v18 }
 0x19c   : > { %v270_v32 = vpack.c.bf16 %v883_v31, %v883_v31 }
 0x19e   : > { %632 = vmatmul.msk.bf16.vlgmr.msra.gmra.mxu1 %vm271_vm4, %v270_v32 }
 0x1aa   : > { %v301_v36 = vpop.permute.xlu1 %300 }
 0x1ab   : > { %633 = vmatmul.msk.bf16.vlgmr.msra.gmra.mxu2 %vm238_vm0, %v301_v36 }
 0x1ae   : > { %635 = vmatmul.msk.bf16.vlgmr.msrb.gmra.mxu1 %vm238_vm0, %v373_v16 }
 0x1d5   : > { %v463_v49 = vpop.xlane.xlu1 %462 }
 0x1d6   : > { %v464_v53 = vsub.f32 %v457_v33, %v463_v49 }
 0x1d8   : > { %v465_v55 = vmul.f32 1.442695, %v464_v53 }
 0x21b   : > { %v291_v37 = vpop.f32.mrf.mxu1 }
 0x21c   : > { %296 = vst.msk [vmem:[%s895_s28] sm:$0x3] %vm295_vm5, %v291_v37 }
 0x223   : > { %v293_v38 = vpop.f32.mrf.mxu1 }
 0x22b   : > { %v391_v39 = vpop.f32.mrf.mxu1 }
 0x22c   : > { %v395_v40 = vsel %vm258_vm1, %v391_v39, -inf }
 0x22d   : > { %396 = vmax.xlane.f32.xlu2 %v395_v40 }
 0x22e   : > { %v322_v41 = vpop.f32.mrf.mxu2 }
 0x22f   : > { %v326_v42 = vsel %vm258_vm1, %v322_v41, -inf }
 0x230   : > { %327 = vmax.xlane.f32.xlu0 %v326_v42 }
 0x233   : > { %v393_v43 = vpop.f32.mrf.mxu1 }
 0x236   : > { %v324_v44 = vpop.f32.mrf.mxu2 }
 0x245   : > { %341 = vrot.lane.b32.xlu2 %v340_v46, %s769_s11 }
 0x2a0   : > { %v397_v47 = vpop.xlane.xlu2 %396 }
 0x2a1   : > { %v398_v48 = vsub.f32 %v391_v39, %v397_v47 }
 0x2a3   : > { %v399_v50 = vmul.f32 1.442695, %v398_v48  ;;  %v328_v51 = vpop.xlane.xlu0 %327 }
 0x2a4   : > { %v329_v52 = vsub.f32 %v322_v41, %v328_v51 }
 0x2a5   : > { %691 = vpow2.f32 %v399_v50 }
 0x2a6   : > { %v330_v54 = vmul.f32 1.442695, %v329_v52 }
 0x2a8   : > { %693 = vpow2.f32 %v330_v54  ;;  %v342_v62 = vpop.permute.xlu2 %341 }
 0x2a9   : > { %695 = vpow2.f32 %v465_v55  ;;  %v347_v63 = vand.u32 %v342_v62, %v878_v24 }
 0x2ab   : > { %v692_v56 = vpop.eup %691  ;;  %356 = vmatpush.bf16.msra.mxu3 %v347_v63 }
 0x2ac   : > { %v401_v57 = vsel %vm258_vm1, %v692_v56, 0.0 }
 0x2ad   : > { %402 = vadd.xlane.f32.xlu1 %v401_v57 }
 0x2ae   : > { %v694_v58 = vpop.eup %693 }
 0x2af   : > { %v332_v59 = vsel %vm258_vm1, %v694_v58, 0.0  ;;  %v696_v60 = vpop.eup %695 }
 0x2b0   : > { %333 = vadd.xlane.f32.xlu0 %v332_v59  ;;  %v467_v61 = vsel %vm258_vm1, %v696_v60, 0.0 }
 0x2b8   : > { %468 = vadd.xlane.f32.xlu0 %v467_v61 }
 0x2c6   : > { %407 = vrot.lane.b32.xlu1 %v340_v46, %s767_s9  ;;  %s524_s9 = sshll.u32 %s520_s7, 4  ;;  %s525_s9 = int_to_ptr.hbm [resolvable:$true] %s524_s9 }
 0x2c7   : > { %s717_s11 = sshra.s32 %s525_s9, 4  ;;  %s718_s11 = int_to_ptr.hbm [resolvable:$true] %s717_s11 }
 0x2c8   : > { %s719_s12 = scalar_lea.hbm %s718_s11, 1  ;;  %p724_p0 = scmp.lt.s32.totalorder %s718_s11, %s952_s4 }
 0x2c9   : > { %p720_p11 = scmp.ne.s32.totalorder %s718_s11, %s719_s12  ;;  %p725_p1 = scmp.lt.s32.totalorder %s723_s20, %s719_s12 }
 0x2cb   : > { %p721_p12 = pnand %p720_p11, %p837_p5  ;;  %p726_p2 = por %p725_p1, %p724_p0 }
 0x2cc   : > { %473 = vrot.lane.b32.xlu0 %v340_v46, %s768_s10  ;;  %s509_s10 = scalar_lea.sflag [#allocation3], %s217_s27 }
 0x2cd   : > { %p722_p13 = pneg %p721_p12 }
 0x2cf   : > { %p727_p3 = pnand %p726_p2, %p722_p13 }
 0x320   : > { %v403_v1 = vpop.xlane.xlu1 %402 }
 0x323   : > { %v334_v0 = vpop.xlane.xlu0 %333 }
 0x324   : > { %697 = vrcp.f32 %v334_v0 }
 0x325   : > { %699 = vrcp.f32 %v403_v1 }
 0x32a   : > { %v698_v2 = vpop.eup %697 }
 0x32b   : > { %v469_v3 = vpop.xlane.xlu0 %468  ;;  %v336_v4 = vmul.f32 %v698_v2, %v694_v58  ;;  %v700_v6 = vpop.eup %699 }
 0x32c   : > { %701 = vrcp.f32 %v469_v3  ;;  %v405_v8 = vmul.f32 %v700_v6, %v692_v56 }
 0x32d   : > { %v337_v5 = vpack.c.bf16 %v336_v4, %v336_v4  ;;  %v368_v7 = vadd.f32 %v336_v4, %v883_v31 }
 0x32e   : > { %v406_v16 = vpack.c.bf16 %v405_v8, %v405_v8 }
 0x32f   : > { %634 = vmatmul.msk.bf16.vlgmr.msra.gmra.mxu3 %vm271_vm4, %v337_v5  ;;  %v434_v11 = vadd.f32 %v405_v8, %v368_v7 }
 0x332   : > { %v702_v9 = vpop.eup %701 }
 0x333   : > { %v471_v10 = vmul.f32 %v702_v9, %v696_v60 }
 0x335   : > { %v500_v12 = vadd.f32 %v471_v10, %v434_v11  ;;  %v472_v19 = vpack.c.bf16 %v471_v10, %v471_v10 }
 0x337   : > { %v501_v13 = vmul.f32 0.25, %v500_v12 }
 0x338   : > { %v408_v14 = vpop.permute.xlu1 %407 }
 0x339   : > { %v413_v15 = vand.u32 %v408_v14, %v878_v24  ;;  %503 = vst.msk [vmem:[%s218_s29] sm:$0x1] %vm502_vm6, %v501_v13 }
 0x33b   : > { %422 = vmatpush.bf16.msrb.mxu3 %v413_v15 }
 0x33e   : > { %v474_v17 = vpop.permute.xlu0 %473 }
 0x33f   : > { %v479_v18 = vand.u32 %v474_v17, %v878_v24  ;;  %636 = vmatmul.msk.bf16.vlgmr.msrb.gmra.mxu3 %vm271_vm4, %v406_v16 }
 0x341   : > { %488 = vmatpush.bf16.msrb.mxu2 %v479_v18 }
 0x344   : > { %638 = vmatmul.msk.bf16.vlgmr.msrb.gmra.mxu2 %vm271_vm4, %v472_v19 }
 0x3b2   : > { %v358_v20 = vpop.f32.mrf.mxu3 }
 0x3b3   : > { %363 = vrot.lane.b32.xlu2 %v358_v20, %s771_s30 }
 0x3ba   : > { %v360_v21 = vpop.f32.mrf.mxu3 }
 0x3bb   : > { %730 = shalt.err (!%p727_p3)
}
 0x3bc   : > { %641 = dma.vmem_to_hbm [thread:$0]  (%p837_p5), %s523_s8, 16, %s525_s9, %s509_s10   ;;  %vm366_vm7 = vcmask 123968   ;;  %vm432_vm8 = vcmask 189568   ;;  %vm498_vm9 = vcmask 255168  }
 0x3bd   : > { %s772_s19 = smov 16   ;;  %s773_s27 = smov 24  }
 0x3c2   : > { %v424_v22 = vpop.f32.mrf.mxu3 }
 0x3c3   : > { %429 = vrot.lane.b32.xlu2 %v424_v22, %s772_s19 }
 0x3c7   : > { %v490_v23 = vpop.f32.mrf.mxu2 }
 0x3c8   : > { %495 = vrot.lane.b32.xlu0 %v490_v23, %s773_s27 }
 0x3ca   : > { %v426_v24 = vpop.f32.mrf.mxu3 }
 0x3cf   : > { %v492_v25 = vpop.f32.mrf.mxu2 }
 0x40d   : > { %v364_v26 = vpop.permute.xlu2 %363 }
 0x40e   : > { %367 = vst.msk [vmem:[%s895_s28] sm:$0x3] %vm366_vm7, %v364_v26 }
 0x41d   : > { %v430_v27 = vpop.permute.xlu2 %429 }
 0x41e   : > { %433 = vst.msk [vmem:[%s895_s28] sm:$0x3] %vm432_vm8, %v430_v27 }
 0x43a   : > { %v496_v28 = vpop.permute.xlu0 %495 }
 0x43b   : > { %499 = vst.msk [vmem:[%s895_s28] sm:$0x3] %vm498_vm9, %v496_v28 }
 0x43c PF: > { %p647_p4 = scmp.ge.s32.totalorder %s765_s18, 2  ;;  %s543_s25 = sand.u32 1, %s753_s15  }
 0x43d   : > { %s544_s29 = scalar_lea.sflag [#allocation3], %s543_s25 }
 0x43e   : > { %p644_p5 = pnand %p647_p4, %p841_p6 }
 0x440   : > { %p645_p7 = pneg %p644_p5 }
 0x442   : > { %748 = dma.done.wait (%p645_p7), %s544_s29, 16  }
 0x443   : > { %750 = vsyncadd (%p645_p7), %s544_s29, 4294967280  ;;  %p15_p8 = scmp.ge.s32.totalorder %s824_s21, 4   ;;  %s955_s15 = smov %s757_s16 }
 0x444   : > { %s956_s16 = smov %s761_s17  ;;  %s957_s17 = smov %s835_s24 }
 0x445   : > { %s958_s18 = smov %s824_s21  ;;  %17 = sbr.rel (!%p15_p8) target bundleno = 3 (0x3), region = 85 }
 0x44a   :  { %549 = vsyncpa [#allocation3], 1 }
 0x44b   :  { %551 = vsyncpa [#allocation3 + $0x1], 1 }

// kernel: _lambda_.23
= control target key start
LH: loop header
LB: loop body
LE: loop exit
PB: predicated region body
PF: predicated region fallthrough
CT: control target
= control target key end

     0   :  { %vm58_vm0 = vcmask 261120   ;;  %vm77_vm1 = vcmask 257024   ;;  %v325_v11 = vmov 32.0   ;;  %s451_s2 = inlined_call_operand.vmem [shape: bf16[32,32], index: 2, kind: input, shape index: {}]   ;;  %s452_s0 = inlined_call_operand.vmem [shape: f32[4,32], index: 0, kind: input, shape index: {}]   ;;  %s453_s3 = inlined_call_operand.vmem [shape: f32[1,32], index: 3, kind: input, shape index: {}, may-alias: {3,5,9}]   ;;  %s454_s1 = inlined_call_operand.vmem [shape: f32[4,32], index: 1, kind: input, shape index: {}]   ;;  %s455_s4 = inlined_call_operand.vmem [shape: f32[1,32], index: 4, kind: input, shape index: {}]   ;;  %s456_s5 = inlined_call_operand.vmem [shape: f32[1,32], index: 5, kind: input, shape index: {}, may-alias: {3,5,9}]   ;;  %s457_s7 = inlined_call_operand.vmem [shape: f32[1,128], index: 7, kind: input, shape index: {}]   ;;  %s458_s6 = inlined_call_operand.vmem [shape: bf16[32,128], index: 6, kind: input, shape index: {}]   ;;  %s459_s8 = inlined_call_operand.vmem [shape: bf16[128,32], index: 8, kind: input, shape index: {}]   ;;  %s460_s9 = inlined_call_operand.vmem [shape: f32[1,32], index: 9, kind: input, shape index: {}, may-alias: {3,5,9}]   ;;  %s461_s10 = inlined_call_operand.vmem [shape: f32[4,32], index: 10, kind: output, shape index: {}]  }
   0x1   :  { %v302_v0 = vld [vmem:[%s451_s2 + $0x8] sm:$0xff]  ;;  %v301_v1 = vld [vmem:[%s451_s2] sm:$0xff]  ;;  %319 = vrcp.f32 %v325_v11  ;;  %v312_v25 = vld [vmem:[%s459_s8 + $0x38] sm:$0xff] }
   0x2   :  { %68 = vmatpush.bf16.msra.mxu0 %v302_v0  ;;  %v36_v2 = vld [vmem:[%s452_s0] sm:$0xf]  ;;  %v304_v23 = vld [vmem:[%s458_s6 + $0x8] sm:$0xff]  ;;  %232 = vmatpush.bf16.msra.mxu2 %v312_v25  ;;  %v311_v42 = vld [vmem:[%s459_s8 + $0x30] sm:$0xff] }
   0x3   :  { %v37_v3 = vpack.c.bf16 %v36_v2, %v36_v2  ;;  %v314_v4 = vld [vmem:[%s453_s3] ss:$0 sm:$0xff]  ;;  %147 = vmatpush.bf16.msra.mxu1 %v304_v23  ;;  %v310_v43 = vld [vmem:[%s459_s8 + $0x28] sm:$0xff]  ;;  %v308_v45 = vld [vmem:[%s459_s8 + $0x18] sm:$0xff] }
   0x4   :  { %v75_v6 = vld [vmem:[%s454_s1] sm:$0xf]  ;;  %v307_v46 = vld [vmem:[%s459_s8 + $0x10] sm:$0xff]  ;;  %v306_v47 = vld [vmem:[%s459_s8 + $0x8] sm:$0xff] }
   0x5   :  { %v303_v24 = vld [vmem:[%s458_s6] sm:$0xff] }
   0x6   :  { %69 = vmatpush.bf16.msra.mxu0 %v301_v1  ;;  %v315_v35 = vld [vmem:[%s455_s4] ss:$0 sm:$0xff]  ;;  %233 = vmatpush.bf16.msra.mxu2 %v311_v42 }
   0x7   :  { %v320_v12 = vpop.eup %319  ;;  %148 = vmatpush.bf16.msra.mxu1 %v303_v24  ;;  %v316_v38 = vld [vmem:[%s456_s5] ss:$0 sm:$0xff] }
   0x8   :  { %v82_v13 = vmul.f32 32.0, %v320_v12  ;;  %vm86_vm2 = vweird.f32 %v320_v12  ;;  %v309_v44 = vld [vmem:[%s459_s8 + $0x20] sm:$0xff] }
   0x9   :  { %259 = vmatmul.msk.bf16.vlgmr.msra.gmra.mxu0 %vm58_vm0, %v37_v3  ;;  %v305_v48 = vld [vmem:[%s459_s8] sm:$0xff] }
   0xa   :  { %v83_v14 = vsub.f32 1.0, %v82_v13  ;;  %234 = vmatpush.bf16.msra.mxu2 %v310_v43  ;;  %v317_v49 = vld [vmem:[%s457_s7] ss:$0 sm:$0xff] }
   0xb   :  { %v318_v63 = vld [vmem:[%s460_s9] ss:$0 sm:$0xff] }
   0xc   :  { %v84_v15 = vmul.f32 %v320_v12, %v83_v14 }
   0xe   :  { %v85_v16 = vadd.f32 %v320_v12, %v84_v15  ;;  %235 = vmatpush.bf16.msra.mxu2 %v309_v44 }
  0x10   :  { %v87_v17 = vsel %vm86_vm2, %v320_v12, %v85_v16 }
  0x12   :  { %236 = vmatpush.bf16.msra.mxu2 %v308_v45 }
  0x16   :  { %237 = vmatpush.bf16.msra.mxu2 %v307_v46 }
  0x1a   :  { %238 = vmatpush.bf16.msra.mxu2 %v306_v47 }
  0x1e   :  { %239 = vmatpush.bf16.msra.mxu2 %v305_v48 }
  0x86   :  { %v71_v5 = vpop.f32.mrf.mxu0 }
  0x87   :  { %v72_v7 = vadd.f32 %v314_v4, %v71_v5 }
  0x89   :  { %v397_v8 = vadd.f32 %v75_v6, %v72_v7 }
  0x8b   :  { %v78_v9 = vsel %vm77_vm1, %v397_v8, 0.0 }
  0x8c   :  { %79 = vadd.xlane.f32.xlu0 %v78_v9 }
  0x8e   :  { %v73_v10 = vpop.f32.mrf.mxu0 }
  0xff   :  { %v80_v18 = vpop.xlane.xlu0 %79 }
 0x100   :  { %v88_v19 = vmul.f32 %v87_v17, %v80_v18 }
 0x102   :  { %v89_v20 = vsub.f32 %v397_v8, %v88_v19 }
 0x104   :  { %v90_v21 = vmul.f32 %v89_v20, %v89_v20 }
 0x106   :  { %v91_v22 = vsel %vm77_vm1, %v90_v21, 0.0 }
 0x107   :  { %92 = vadd.xlane.f32.xlu0 %v91_v22 }
 0x17a   :  { %v93_v26 = vpop.xlane.xlu0 %92 }
 0x17b   :  { %v94_v27 = vmul.f32 %v93_v26, %v87_v17 }
 0x17d   :  { %v95_v28 = vadd.f32 1e-05, %v94_v27 }
 0x17f   :  { %321 = vrsqrt.f32 %v95_v28  ;;  %vm102_vm4 = vweird.f32 %v95_v28 }
 0x185   :  { %v322_v29 = vpop.eup %321 }
 0x186   :  { %v97_v30 = vmul.f32 %v322_v29, %v95_v28  ;;  %vm103_vm3 = vweird.f32 %v322_v29 }
 0x187   :  { %vm104_vm5 = vmor %vm102_vm4, %vm103_vm3 }
 0x188   :  { %v98_v31 = vmul.f32 %v322_v29, %v97_v30 }
 0x18a   :  { %v99_v32 = vmul.f32 0.5, %v98_v31 }
 0x18c   :  { %v100_v33 = vsub.f32 1.5, %v99_v32 }
 0x18e   :  { %v101_v34 = vmul.f32 %v322_v29, %v100_v33 }
 0x190   :  { %v105_v36 = vsel %vm104_vm5, %v322_v29, %v101_v34 }
 0x191   :  { %v106_v37 = vmul.f32 %v105_v36, %v89_v20 }
 0x193   :  { %v111_v39 = vmul.f32 %v315_v35, %v106_v37 }
 0x195   :  { %v116_v40 = vadd.f32 %v316_v38, %v111_v39 }
 0x197   :  { %v117_v41 = vpack.c.bf16 %v116_v40, %v116_v40 }
 0x199   :  { %268 = vmatmul.msk.bf16.vlgmr.msra.gmra.mxu1 %vm58_vm0, %v117_v41 }
 0x216   :  { %v150_v50 = vpop.f32.mrf.mxu1 }
 0x217   :  { %v151_v51 = vadd.f32 %v317_v49, %v150_v50 }
 0x219   :  { %v154_v52 = vmul.f32 %v151_v51, %v151_v51 }
 0x21b   :  { %v155_v53 = vmul.f32 %v154_v52, %v151_v51 }
 0x21d   :  { %v156_v54 = vmul.f32 0.044715, %v155_v53 }
 0x21e   :  { %v152_v55 = vpop.f32.mrf.mxu1 }
 0x21f   :  { %v157_v56 = vadd.f32 %v156_v54, %v151_v51 }
 0x221   :  { %v158_v57 = vmul.f32 0.7978846, %v157_v56 }
 0x223   :  { %323 = vtanh.f32 %v158_v57 }
 0x229   :  { %v324_v58 = vpop.eup %323 }
 0x22a   :  { %v160_v59 = vadd.f32 1.0, %v324_v58 }
 0x22c   :  { %v161_v60 = vmul.f32 0.5, %v160_v59 }
 0x22e   :  { %v162_v61 = vmul.f32 %v161_v60, %v151_v51 }
 0x230   :  { %v163_v62 = vpack.c.bf16 %v162_v61, %v162_v61 }
 0x232   :  { %240 = vmatmul.bf16.vlgmr.msra.gmra.mxu2 %v163_v62 }
 0x2b5   :  { %v241_v0 = vpop.f32.mrf.mxu2 }
 0x2b6   :  { %v242_v1 = vadd.f32 %v318_v63, %v241_v0 }
 0x2b8   :  { %v245_v2 = vadd.f32 %v242_v1, %v397_v8 }
 0x2ba   :  { %246 = vst.msk [vmem:[%s461_s10] sm:$0xf] %vm77_vm1, %v245_v2 }
 0x2bd   :  { %v243_v3 = vpop.f32.mrf.mxu2 }

</bundles_post_ra>
